<compile_context>
chip_gen: v5e
topology: v5e:2x2
jax: 0.10.0
libtpu: 0.0.40
codegen_flags: <defaults>
</compile_context>

<pallas_src>
import functools

import jax
import jax.numpy as jnp
from jax import lax
from jax.experimental import pallas as pl
from jax.experimental.pallas import tpu as pltpu

EPS = 1e-5
SUBLANE = 8


def _round_up(x, m):
    return (x + m - 1) // m * m


def _vmem_limit_bytes():
    """~75% of physical VMEM: ~96 MiB on v5e/v6e (128 MiB), ~48 MiB on v7x (64 MiB)."""
    try:
        cap = int(pltpu.get_tpu_info().vmem_capacity_bytes)
    except Exception:
        cap = 64 * 1024 * 1024
    return max(32 * 1024 * 1024, (cap * 3) // 4)


# ----------------------------------------------------------------------------
# In-kernel helpers
# ----------------------------------------------------------------------------
def _conv3x3_from_padded(src_ref, w_ref, h, w):
    """3x3 unit-stride conv over a zero-bordered, VMEM-resident image.

      src_ref : (h+2, w+2, C)  zero-bordered image (bf16)
      w_ref   : (3, 3*C, Cop)  taps merged over ky per kx (BN scale folded, bf16)
    Returns an (h*w, Cop) f32 accumulator (3 MXU matmuls, K = 3*C).
    """
    c = src_ref.shape[-1]
    cop = w_ref.shape[-1]
    acc = jnp.zeros((h * w, cop), jnp.float32)
    for kx in range(3):
        op = jnp.concatenate(
            [src_ref[ky:ky + h, kx:kx + w, :] for ky in range(3)], axis=-1)
        acc = acc + jnp.dot(op.reshape(h * w, 3 * c), w_ref[kx],
                            preferred_element_type=jnp.float32)
    return acc


# ----------------------------------------------------------------------------
# Kernels (one batch element per grid step)
# ----------------------------------------------------------------------------
def _fused_block_kernel_s1(x_ref, w1_ref, b1_ref, w2_ref, b2_ref, *rest,
                           h, w, has_ds):
    """Whole BasicBlock, stride 1.

      x_ref  : (h, w, Cin_p)  unpadded input image (bf16)
      w1_ref : (3, 3*Cin_p, Cop), w2_ref: (3, 3*Cop, Cop)  BN-folded taps (bf16)
      b1/b2  : (1, Cop) f32 folded-BN biases
      [wd_ref: (Cin_p, Cop), bd_ref: (1, Cop)]  fused 1x1 downsample shortcut
      o_ref  : (h*w, Cop)
      xp_ref : VMEM (h+2, w+2, Cin_p) scratch (in-kernel zero padding)
      rp_ref : VMEM (h+2, w+2, Cop)   scratch (conv1 output, never hits HBM)
    """
    if has_ds:
        wd_ref, bd_ref, o_ref, xp_ref, rp_ref = rest
    else:
        o_ref, xp_ref, rp_ref = rest

    cop = o_ref.shape[-1]

    # In-kernel 1-pixel zero padding of the input, resident in VMEM.
    xp_ref[...] = jnp.zeros_like(xp_ref)
    xp_ref[1:h + 1, 1:w + 1, :] = x_ref[...]

    # conv1 + folded-BN bias + ReLU -> zero-bordered bf16 VMEM intermediate.
    r = _conv3x3_from_padded(xp_ref, w1_ref, h, w) + b1_ref[...]
    r = jnp.maximum(r, 0.0).astype(jnp.bfloat16)
    rp_ref[...] = jnp.zeros_like(rp_ref)
    rp_ref[1:h + 1, 1:w + 1, :] = r.reshape(h, w, cop)

    # conv2 + folded-BN bias.
    y = _conv3x3_from_padded(rp_ref, w2_ref, h, w) + b2_ref[...]

    # Shortcut: fused 1x1 projection (downsample) or direct add (identity).
    if has_ds:
        src = x_ref[...].reshape(h * w, x_ref.shape[-1])
        y = y + jnp.dot(src, wd_ref[...],
                        preferred_element_type=jnp.float32) + bd_ref[...]
    else:
        y = y + x_ref[...].reshape(h * w, cop).astype(jnp.float32)

    o_ref[...] = jnp.maximum(y, 0.0).astype(o_ref.dtype)


def _fused_block_kernel_patches(p_ref, w1_ref, b1_ref, w2_ref, b2_ref,
                                wd_ref, bd_ref, o_ref, rp_ref, *, h, w, cin_p):
    """Whole BasicBlock with a strided conv1 fed by pre-gathered patches.

      p_ref  : (h*w, 9*cin_p)  patches at the strided output positions (bf16)
      w1_ref : (9*cin_p, Cop)  conv1 weights, im2col order (bf16)
    conv2 / shortcut / epilogue identical to the stride-1 kernel.
    """
    cop = o_ref.shape[-1]

    # conv1 at the strided positions: one GEMM with K = 9*Cin.
    r = jnp.dot(p_ref[...], w1_ref[...],
                preferred_element_type=jnp.float32) + b1_ref[...]
    r = jnp.maximum(r, 0.0).astype(jnp.bfloat16)
    rp_ref[...] = jnp.zeros_like(rp_ref)
    rp_ref[1:h + 1, 1:w + 1, :] = r.reshape(h, w, cop)

    y = _conv3x3_from_padded(rp_ref, w2_ref, h, w) + b2_ref[...]

    # Shortcut source = strided input pixels = centre tap of the patch tensor.
    src = p_ref[:, 4 * cin_p:5 * cin_p]
    y = y + jnp.dot(src, wd_ref[...],
                    preferred_element_type=jnp.float32) + bd_ref[...]
    o_ref[...] = jnp.maximum(y, 0.0).astype(o_ref.dtype)


# ----------------------------------------------------------------------------
# pallas_call wrappers
# ----------------------------------------------------------------------------
def _fused_block_s1(x, w1, b1, w2, b2, wd=None, bd=None, out_dtype=jnp.float32):
    N, H, W, Cin_p = x.shape
    Cop = w2.shape[-1]
    has_ds = wd is not None

    in_specs = [
        pl.BlockSpec((None, H, W, Cin_p), lambda n: (n, 0, 0, 0)),
        pl.BlockSpec((3, 3 * Cin_p, Cop), lambda n: (0, 0, 0)),
        pl.BlockSpec((1, Cop), lambda n: (0, 0)),
        pl.BlockSpec((3, 3 * Cop, Cop), lambda n: (0, 0, 0)),
        pl.BlockSpec((1, Cop), lambda n: (0, 0)),
    ]
    args = [x, w1, b1, w2, b2]
    if has_ds:
        in_specs += [pl.BlockSpec((Cin_p, Cop), lambda n: (0, 0)),
                     pl.BlockSpec((1, Cop), lambda n: (0, 0))]
        args += [wd, bd]

    kernel = functools.partial(_fused_block_kernel_s1, h=H, w=W, has_ds=has_ds)
    return pl.pallas_call(
        kernel,
        out_shape=jax.ShapeDtypeStruct((N, H * W, Cop), out_dtype),
        grid=(N,),
        in_specs=in_specs,
        out_specs=pl.BlockSpec((None, H * W, Cop), lambda n: (n, 0, 0)),
        scratch_shapes=[pltpu.VMEM((H + 2, W + 2, Cin_p), jnp.bfloat16),
                        pltpu.VMEM((H + 2, W + 2, Cop), jnp.bfloat16)],
        compiler_params=pltpu.CompilerParams(
            dimension_semantics=("parallel",),
            vmem_limit_bytes=_vmem_limit_bytes()),
    )(*args)


def _fused_block_strided(patches, w1g, b1, w2, b2, wd, bd, Ho, Wo, cin_p,
                         out_dtype=jnp.float32):
    N, Mo, K1 = patches.shape
    Cop = w2.shape[-1]
    kernel = functools.partial(_fused_block_kernel_patches, h=Ho, w=Wo,
                               cin_p=cin_p)
    return pl.pallas_call(
        kernel,
        out_shape=jax.ShapeDtypeStruct((N, Mo, Cop), out_dtype),
        grid=(N,),
        in_specs=[
            pl.BlockSpec((None, Mo, K1), lambda n: (n, 0, 0)),
            pl.BlockSpec((K1, Cop), lambda n: (0, 0)),
            pl.BlockSpec((1, Cop), lambda n: (0, 0)),
            pl.BlockSpec((3, 3 * Cop, Cop), lambda n: (0, 0, 0)),
            pl.BlockSpec((1, Cop), lambda n: (0, 0)),
            pl.BlockSpec((cin_p, Cop), lambda n: (0, 0)),
            pl.BlockSpec((1, Cop), lambda n: (0, 0)),
        ],
        out_specs=pl.BlockSpec((None, Mo, Cop), lambda n: (n, 0, 0)),
        scratch_shapes=[pltpu.VMEM((Ho + 2, Wo + 2, Cop), jnp.bfloat16)],
        compiler_params=pltpu.CompilerParams(
            dimension_semantics=("parallel",),
            vmem_limit_bytes=_vmem_limit_bytes()),
    )(patches, w1g, b1, w2, b2, wd, bd)


# ----------------------------------------------------------------------------
# Wrapper-side glue: BN folding, weight prep, strided patch gather.
# ----------------------------------------------------------------------------
def _fold_bn(gamma, beta, mean, var):
    scale = gamma / jnp.sqrt(var + EPS)
    bias = beta - mean * scale
    return scale, bias


def _pad_last(a, size):
    pad = size - a.shape[-1]
    if pad == 0:
        return a
    return jnp.pad(a, [(0, 0)] * (a.ndim - 1) + [(0, pad)])


def _prep_w3x3_ky_merged(w_oihw, scale, cin_pad, cop):
    """(Cout, Cin, 3, 3) OIHW -> (3[kx], 3*cin_pad[ky*C + c], cop), BN scale folded."""
    co, ci = w_oihw.shape[0], w_oihw.shape[1]
    w = jnp.transpose(w_oihw, (3, 2, 1, 0)) * scale            # (kx, ky, ci, co)
    w = jnp.pad(w, ((0, 0), (0, 0), (0, cin_pad - ci), (0, cop - co)))
    return w.reshape(3, 3 * cin_pad, cop).astype(jnp.bfloat16)


def _prep_w3x3_flat(w_oihw, scale, cin_pad, cop):
    """(Cout, Cin, 3, 3) OIHW -> (9*cin_pad, cop) in im2col (ky, kx, c) order."""
    co, ci = w_oihw.shape[0], w_oihw.shape[1]
    w = jnp.transpose(w_oihw, (2, 3, 1, 0)) * scale            # (ky, kx, ci, co)
    w = jnp.pad(w, ((0, 0), (0, 0), (0, cin_pad - ci), (0, cop - co)))
    return w.reshape(9 * cin_pad, cop).astype(jnp.bfloat16)


def _im2col_3x3_strided(x_nhwc, stride):
    """Patches gathered only at the strided output positions (downsample blocks).
    TODO(synk): gather these taps in-kernel to avoid this HBM materialization."""
    N, H, W, C = x_nhwc.shape
    Ho = (H - 1) // stride + 1
    Wo = (W - 1) // stride + 1
    xp = jnp.pad(x_nhwc, ((0, 0), (1, 1), (1, 1), (0, 0)))
    cols = []
    for ky in range(3):
        for kx in range(3):
            cols.append(xp[:, ky:ky + stride * (Ho - 1) + 1:stride,
                           kx:kx + stride * (Wo - 1) + 1:stride, :])
    patches = jnp.concatenate(cols, axis=-1)                   # (N, Ho, Wo, 9C)
    return patches.reshape(N, Ho * Wo, 9 * C), Ho, Wo


# ----------------------------------------------------------------------------
# BasicBlock forward (Pallas) — takes NCHW like the PyTorch module.
# ----------------------------------------------------------------------------
def basic_block_forward(x_nchw, params, stride=1):
    N, Cin, H, W = x_nchw.shape
    Cout = params["w1"].shape[0]
    has_ds = params.get("wd") is not None
    if not has_ds:
        assert Cin == Cout and stride == 1, (
            "identity shortcut requires in_chan == out_chan and stride == 1")

    Cop = _round_up(Cout, SUBLANE)      # sublane-aligned only; no 64->128 inflation
    Cin_p = _round_up(Cin, SUBLANE)

    # NCHW -> NHWC, bf16 for the MXU, pad contraction channels.
    x = jnp.transpose(x_nchw, (0, 2, 3, 1)).astype(jnp.bfloat16)
    x = _pad_last(x, Cin_p)

    # Fold BN running stats: scale into conv weights, bias kept f32 for epilogue.
    s1, b1 = _fold_bn(params["g1"], params["b1"], params["m1"], params["v1"])
    s2, b2 = _fold_bn(params["g2"], params["b2"], params["m2"], params["v2"])
    w2 = _prep_w3x3_ky_merged(params["w2"], s2, Cop, Cop)
    b1p = _pad_last(b1, Cop).reshape(1, Cop).astype(jnp.float32)
    b2p = _pad_last(b2, Cop).reshape(1, Cop).astype(jnp.float32)

    wdp = bdp = None
    if has_ds:
        sd, bd = _fold_bn(params["gd"], params["bd"], params["md"], params["vd"])
        wd_mat = params["wd"][:, :, 0, 0].T * sd[None, :]       # (Cin, Cout)
        wdp = jnp.pad(wd_mat, ((0, Cin_p - Cin),
                               (0, Cop - Cout))).astype(jnp.bfloat16)
        bdp = _pad_last(bd, Cop).reshape(1, Cop).astype(jnp.float32)

    if stride == 1:
        w1 = _prep_w3x3_ky_merged(params["w1"], s1, Cin_p, Cop)
        out = _fused_block_s1(x, w1, b1p, w2, b2p, wdp, bdp)
        Ho, Wo = H, W
    else:
        w1g = _prep_w3x3_flat(params["w1"], s1, Cin_p, Cop)
        patches, Ho, Wo = _im2col_3x3_strided(x, stride)
        out = _fused_block_strided(patches, w1g, b1p, w2, b2p, wdp, bdp,
                                   Ho, Wo, Cin_p)

    out = out.reshape(N, Ho, Wo, Cop)
    if Cop != Cout:
        out = out[..., :Cout]
    return jnp.transpose(out, (0, 3, 1, 2))                     # NHWC -> NCHW


# ----------------------------------------------------------------------------
# Pure-JAX reference (eval-mode BN) for correctness checking.
# ----------------------------------------------------------------------------
def basic_block_reference(x, params, stride=1):
    def conv(x, w, s, pad):
        return lax.conv_general_dilated(
            x, w, (s, s), [(pad, pad), (pad, pad)],
            dimension_numbers=("NCHW", "OIHW", "NCHW"))

    def bn(x, g, b, m, v):
        inv = g / jnp.sqrt(v + EPS)
        return x * inv[None, :, None, None] + (b - m * inv)[None, :, None, None]

    r = jax.nn.relu(bn(conv(x, params["w1"], stride, 1),
                       params["g1"], params["b1"], params["m1"], params["v1"]))
    r = bn(conv(r, params["w2"], 1, 1),
           params["g2"], params["b2"], params["m2"], params["v2"])
    shortcut = x
    if params.get("wd") is not None:
        shortcut = bn(conv(x, params["wd"], stride, 0),
                      params["gd"], params["bd"], params["md"], params["vd"])
    return jax.nn.relu(shortcut + r)


# ----------------------------------------------------------------------------
# Deterministic parameter construction + test.
# ----------------------------------------------------------------------------
def make_params(key, in_chan, out_chan, stride):
    keys = jax.random.split(key, 16)
    p = {
        "w1": 0.1 * jax.random.normal(keys[0], (out_chan, in_chan, 3, 3), jnp.float32),
        "g1": 1.0 + 0.1 * jax.random.normal(keys[1], (out_chan,), jnp.float32),
        "b1": 0.1 * jax.random.normal(keys[2], (out_chan,), jnp.float32),
        "m1": 0.1 * jax.random.normal(keys[3], (out_chan,), jnp.float32),
        "v1": 1.0 + 0.1 * jnp.abs(jax.random.normal(keys[4], (out_chan,), jnp.float32)),
        "w2": 0.1 * jax.random.normal(keys[5], (out_chan, out_chan, 3, 3), jnp.float32),
        "g2": 1.0 + 0.1 * jax.random.normal(keys[6], (out_chan,), jnp.float32),
        "b2": 0.1 * jax.random.normal(keys[7], (out_chan,), jnp.float32),
        "m2": 0.1 * jax.random.normal(keys[8], (out_chan,), jnp.float32),
        "v2": 1.0 + 0.1 * jnp.abs(jax.random.normal(keys[9], (out_chan,), jnp.float32)),
        "wd": None,
    }
    if in_chan != out_chan or stride != 1:
        p["wd"] = 0.1 * jax.random.normal(keys[10], (out_chan, in_chan, 1, 1), jnp.float32)
        p["gd"] = 1.0 + 0.1 * jax.random.normal(keys[11], (out_chan,), jnp.float32)
        p["bd"] = 0.1 * jax.random.normal(keys[12], (out_chan,), jnp.float32)
        p["md"] = 0.1 * jax.random.normal(keys[13], (out_chan,), jnp.float32)
        p["vd"] = 1.0 + 0.1 * jnp.abs(jax.random.normal(keys[14], (out_chan,), jnp.float32))
    return p


if __name__ == "__main__":
    key = jax.random.PRNGKey(0)
    fwd = jax.jit(basic_block_forward, static_argnames=("stride",))

    configs = [
        # (N, Cin, Cout, H, W, stride)
        (2, 4, 8, 16, 16, 1),   # channel-change shortcut (fused 1x1 projection)
        (2, 8, 8, 16, 16, 1),   # identity shortcut (direct residual add, no matmul)
        (2, 4, 8, 16, 16, 2),   # strided conv1 + strided 1x1 shortcut
    ]
    for idx, (N, Cin, Cout, H, W, stride) in enumerate(configs):
        kx_, kp_ = jax.random.split(jax.random.fold_in(key, idx))
        x = jax.random.normal(kx_, (N, Cin, H, W), jnp.float32)
        params = make_params(kp_, Cin, Cout, stride)

        out = jax.block_until_ready(fwd(x, params, stride=stride))
        ref = jax.block_until_ready(basic_block_reference(x, params, stride=stride))

        assert out.shape == ref.shape, (idx, out.shape, ref.shape)
        max_err = float(jnp.max(jnp.abs(out - ref)))
        # bf16 MXU inputs + bf16 VMEM intermediate -> loosened tolerance.
        assert jnp.allclose(out, ref, atol=5e-2, rtol=5e-2), (idx, max_err)

    print("KERNEL_OK")
</pallas_src>

<mosaic_0001>
module attributes {stable_mosaic.version = 11 : i64} {
  func.func @_fused_block_kernel_s1(%arg0: i32, %arg1: memref<1x16x16x8xbf16, #tpu.memory_space<vmem>>, %arg2: memref<3x24x8xbf16, #tpu.memory_space<vmem>>, %arg3: memref<1x8xf32, #tpu.memory_space<vmem>>, %arg4: memref<3x24x8xbf16, #tpu.memory_space<vmem>>, %arg5: memref<1x8xf32, #tpu.memory_space<vmem>>, %arg6: memref<8x8xbf16, #tpu.memory_space<vmem>>, %arg7: memref<1x8xf32, #tpu.memory_space<vmem>>, %arg8: memref<1x256x8xf32, #tpu.memory_space<vmem>>, %arg9: memref<18x18x8xbf16, #tpu.memory_space<vmem>>, %arg10: memref<18x18x8xbf16, #tpu.memory_space<vmem>>) attributes {dimension_semantics = [#tpu.dimension_semantics<parallel>], iteration_bounds = array<i64: 2>, scalar_prefetch = 0 : i64, scratch_operands = 2 : i64, tpu.core_type = #tpu.core_type<tc>, window_params = [{transform_indices = @transform_0, window_bounds = array<i64: 1, 16, 16, 8>}, {pipeline_mode = #tpu.pipeline_mode<synchronous>, transform_indices = @transform_1, window_bounds = array<i64: 3, 24, 8>}, {pipeline_mode = #tpu.pipeline_mode<synchronous>, transform_indices = @transform_2, window_bounds = array<i64: 1, 8>}, {pipeline_mode = #tpu.pipeline_mode<synchronous>, transform_indices = @transform_3, window_bounds = array<i64: 3, 24, 8>}, {pipeline_mode = #tpu.pipeline_mode<synchronous>, transform_indices = @transform_4, window_bounds = array<i64: 1, 8>}, {pipeline_mode = #tpu.pipeline_mode<synchronous>, transform_indices = @transform_5, window_bounds = array<i64: 8, 8>}, {pipeline_mode = #tpu.pipeline_mode<synchronous>, transform_indices = @transform_6, window_bounds = array<i64: 1, 8>}, {transform_indices = @transform_7, window_bounds = array<i64: 1, 256, 8>}]} {
    %cst = arith.constant 0.000000e+00 : bf16
    %0 = vector.broadcast %cst : bf16 to vector<18x18x8xbf16>
    %c0 = arith.constant 0 : index
    %c0_0 = arith.constant 0 : index
    %c0_1 = arith.constant 0 : index
    %1 = vector.load %arg9[%c0, %c0_0, %c0_1] : memref<18x18x8xbf16, #tpu.memory_space<vmem>>, vector<18x18x8xbf16>
    tpu.vector_store %arg9[%c0, %c0_0, %c0_1], %0 {strides = array<i32>} : memref<18x18x8xbf16, #tpu.memory_space<vmem>>, vector<18x18x8xbf16>,
    %c0_2 = arith.constant 0 : index
    %c0_3 = arith.constant 0 : index
    %c0_4 = arith.constant 0 : index
    %c0_5 = arith.constant 0 : index
    %2 = vector.load %arg1[%c0_2, %c0_3, %c0_4, %c0_5] : memref<1x16x16x8xbf16, #tpu.memory_space<vmem>>, vector<1x16x16x8xbf16>
    %3 = vector.shape_cast %2 : vector<1x16x16x8xbf16> to vector<16x16x8xbf16>
    %c1 = arith.constant 1 : index
    %c1_6 = arith.constant 1 : index
    %c0_7 = arith.constant 0 : index
    %4 = vector.load %arg9[%c1, %c1_6, %c0_7] : memref<18x18x8xbf16, #tpu.memory_space<vmem>>, vector<16x16x8xbf16>
    tpu.vector_store %arg9[%c1, %c1_6, %c0_7], %3 {strides = array<i32>} : memref<18x18x8xbf16, #tpu.memory_space<vmem>>, vector<16x16x8xbf16>,
    %cst_8 = arith.constant 0.000000e+00 : f32
    %5 = vector.broadcast %cst_8 : f32 to vector<256x8xf32>
    %c0_9 = arith.constant 0 : index
    %c0_10 = arith.constant 0 : index
    %c0_11 = arith.constant 0 : index
    %6 = vector.load %arg9[%c0_9, %c0_10, %c0_11] : memref<18x18x8xbf16, #tpu.memory_space<vmem>>, vector<16x16x8xbf16>
    %c1_12 = arith.constant 1 : index
    %c0_13 = arith.constant 0 : index
    %c0_14 = arith.constant 0 : index
    %7 = vector.load %arg9[%c1_12, %c0_13, %c0_14] : memref<18x18x8xbf16, #tpu.memory_space<vmem>>, vector<16x16x8xbf16>
    %c2 = arith.constant 2 : index
    %c0_15 = arith.constant 0 : index
    %c0_16 = arith.constant 0 : index
    %8 = vector.load %arg9[%c2, %c0_15, %c0_16] : memref<18x18x8xbf16, #tpu.memory_space<vmem>>, vector<16x16x8xbf16>
    %9 = tpu.concatenate %6, %7, %8 in 2 : vector<16x16x8xbf16>, vector<16x16x8xbf16>, vector<16x16x8xbf16> -> vector<16x16x24xbf16>
    %10 = vector.shape_cast %9 : vector<16x16x24xbf16> to vector<256x24xbf16>
    %c0_17 = arith.constant 0 : index
    %c0_18 = arith.constant 0 : index
    %c0_19 = arith.constant 0 : index
    %11 = vector.load %arg2[%c0_17, %c0_18, %c0_19] : memref<3x24x8xbf16, #tpu.memory_space<vmem>>, vector<1x24x8xbf16>
    %12 = vector.shape_cast %11 : vector<1x24x8xbf16> to vector<24x8xbf16>
    %cst_20 = arith.constant dense<0.000000e+00> : vector<256x8xf32>
    %13 = tpu.matmul %10, %12, %cst_20 {dimension_numbers = #tpu.dot_dimension_numbers<[1], [0], [0], [1], [0, 0, 1, 1], [], []>} : vector<256x24xbf16>, vector<24x8xbf16>, vector<256x8xf32> -> vector<256x8xf32>
    %14 = arith.addf %5, %13 : vector<256x8xf32>
    %c0_21 = arith.constant 0 : index
    %c1_22 = arith.constant 1 : index
    %c0_23 = arith.constant 0 : index
    %15 = vector.load %arg9[%c0_21, %c1_22, %c0_23] : memref<18x18x8xbf16, #tpu.memory_space<vmem>>, vector<16x16x8xbf16>
    %c1_24 = arith.constant 1 : index
    %c1_25 = arith.constant 1 : index
    %c0_26 = arith.constant 0 : index
    %16 = vector.load %arg9[%c1_24, %c1_25, %c0_26] : memref<18x18x8xbf16, #tpu.memory_space<vmem>>, vector<16x16x8xbf16>
    %c2_27 = arith.constant 2 : index
    %c1_28 = arith.constant 1 : index
    %c0_29 = arith.constant 0 : index
    %17 = vector.load %arg9[%c2_27, %c1_28, %c0_29] : memref<18x18x8xbf16, #tpu.memory_space<vmem>>, vector<16x16x8xbf16>
    %18 = tpu.concatenate %15, %16, %17 in 2 : vector<16x16x8xbf16>, vector<16x16x8xbf16>, vector<16x16x8xbf16> -> vector<16x16x24xbf16>
    %19 = vector.shape_cast %18 : vector<16x16x24xbf16> to vector<256x24xbf16>
    %c1_30 = arith.constant 1 : index
    %c0_31 = arith.constant 0 : index
    %c0_32 = arith.constant 0 : index
    %20 = vector.load %arg2[%c1_30, %c0_31, %c0_32] : memref<3x24x8xbf16, #tpu.memory_space<vmem>>, vector<1x24x8xbf16>
    %21 = vector.shape_cast %20 : vector<1x24x8xbf16> to vector<24x8xbf16>
    %cst_33 = arith.constant dense<0.000000e+00> : vector<256x8xf32>
    %22 = tpu.matmul %19, %21, %cst_33 {dimension_numbers = #tpu.dot_dimension_numbers<[1], [0], [0], [1], [0, 0, 1, 1], [], []>} : vector<256x24xbf16>, vector<24x8xbf16>, vector<256x8xf32> -> vector<256x8xf32>
    %23 = arith.addf %14, %22 : vector<256x8xf32>
    %c0_34 = arith.constant 0 : index
    %c2_35 = arith.constant 2 : index
    %c0_36 = arith.constant 0 : index
    %24 = vector.load %arg9[%c0_34, %c2_35, %c0_36] : memref<18x18x8xbf16, #tpu.memory_space<vmem>>, vector<16x16x8xbf16>
    %c1_37 = arith.constant 1 : index
    %c2_38 = arith.constant 2 : index
    %c0_39 = arith.constant 0 : index
    %25 = vector.load %arg9[%c1_37, %c2_38, %c0_39] : memref<18x18x8xbf16, #tpu.memory_space<vmem>>, vector<16x16x8xbf16>
    %c2_40 = arith.constant 2 : index
    %c2_41 = arith.constant 2 : index
    %c0_42 = arith.constant 0 : index
    %26 = vector.load %arg9[%c2_40, %c2_41, %c0_42] : memref<18x18x8xbf16, #tpu.memory_space<vmem>>, vector<16x16x8xbf16>
    %27 = tpu.concatenate %24, %25, %26 in 2 : vector<16x16x8xbf16>, vector<16x16x8xbf16>, vector<16x16x8xbf16> -> vector<16x16x24xbf16>
    %28 = vector.shape_cast %27 : vector<16x16x24xbf16> to vector<256x24xbf16>
    %c2_43 = arith.constant 2 : index
    %c0_44 = arith.constant 0 : index
    %c0_45 = arith.constant 0 : index
    %29 = vector.load %arg2[%c2_43, %c0_44, %c0_45] : memref<3x24x8xbf16, #tpu.memory_space<vmem>>, vector<1x24x8xbf16>
    %30 = vector.shape_cast %29 : vector<1x24x8xbf16> to vector<24x8xbf16>
    %cst_46 = arith.constant dense<0.000000e+00> : vector<256x8xf32>
    %31 = tpu.matmul %28, %30, %cst_46 {dimension_numbers = #tpu.dot_dimension_numbers<[1], [0], [0], [1], [0, 0, 1, 1], [], []>} : vector<256x24xbf16>, vector<24x8xbf16>, vector<256x8xf32> -> vector<256x8xf32>
    %32 = arith.addf %23, %31 : vector<256x8xf32>
    %c0_47 = arith.constant 0 : index
    %c0_48 = arith.constant 0 : index
    %33 = vector.load %arg3[%c0_47, %c0_48] : memref<1x8xf32, #tpu.memory_space<vmem>>, vector<1x8xf32>
    %34 = vector.broadcast %33 : vector<1x8xf32> to vector<256x8xf32>
    %35 = arith.addf %32, %34 : vector<256x8xf32>
    %cst_49 = arith.constant 0.000000e+00 : f32
    %36 = vector.broadcast %cst_49 : f32 to vector<256x8xf32>
    %37 = arith.maximumf %35, %36 : vector<256x8xf32>
    %38 = arith.truncf %37 : vector<256x8xf32> to vector<256x8xbf16>
    %cst_50 = arith.constant 0.000000e+00 : bf16
    %39 = vector.broadcast %cst_50 : bf16 to vector<18x18x8xbf16>
    %c0_51 = arith.constant 0 : index
    %c0_52 = arith.constant 0 : index
    %c0_53 = arith.constant 0 : index
    %40 = vector.load %arg10[%c0_51, %c0_52, %c0_53] : memref<18x18x8xbf16, #tpu.memory_space<vmem>>, vector<18x18x8xbf16>
    tpu.vector_store %arg10[%c0_51, %c0_52, %c0_53], %39 {strides = array<i32>} : memref<18x18x8xbf16, #tpu.memory_space<vmem>>, vector<18x18x8xbf16>,
    %41 = vector.shape_cast %38 : vector<256x8xbf16> to vector<16x16x8xbf16>
    %c1_54 = arith.constant 1 : index
    %c1_55 = arith.constant 1 : index
    %c0_56 = arith.constant 0 : index
    %42 = vector.load %arg10[%c1_54, %c1_55, %c0_56] : memref<18x18x8xbf16, #tpu.memory_space<vmem>>, vector<16x16x8xbf16>
    tpu.vector_store %arg10[%c1_54, %c1_55, %c0_56], %41 {strides = array<i32>} : memref<18x18x8xbf16, #tpu.memory_space<vmem>>, vector<16x16x8xbf16>,
    %cst_57 = arith.constant 0.000000e+00 : f32
    %43 = vector.broadcast %cst_57 : f32 to vector<256x8xf32>
    %c0_58 = arith.constant 0 : index
    %c0_59 = arith.constant 0 : index
    %c0_60 = arith.constant 0 : index
    %44 = vector.load %arg10[%c0_58, %c0_59, %c0_60] : memref<18x18x8xbf16, #tpu.memory_space<vmem>>, vector<16x16x8xbf16>
    %c1_61 = arith.constant 1 : index
    %c0_62 = arith.constant 0 : index
    %c0_63 = arith.constant 0 : index
    %45 = vector.load %arg10[%c1_61, %c0_62, %c0_63] : memref<18x18x8xbf16, #tpu.memory_space<vmem>>, vector<16x16x8xbf16>
    %c2_64 = arith.constant 2 : index
    %c0_65 = arith.constant 0 : index
    %c0_66 = arith.constant 0 : index
    %46 = vector.load %arg10[%c2_64, %c0_65, %c0_66] : memref<18x18x8xbf16, #tpu.memory_space<vmem>>, vector<16x16x8xbf16>
    %47 = tpu.concatenate %44, %45, %46 in 2 : vector<16x16x8xbf16>, vector<16x16x8xbf16>, vector<16x16x8xbf16> -> vector<16x16x24xbf16>
    %48 = vector.shape_cast %47 : vector<16x16x24xbf16> to vector<256x24xbf16>
    %c0_67 = arith.constant 0 : index
    %c0_68 = arith.constant 0 : index
    %c0_69 = arith.constant 0 : index
    %49 = vector.load %arg4[%c0_67, %c0_68, %c0_69] : memref<3x24x8xbf16, #tpu.memory_space<vmem>>, vector<1x24x8xbf16>
    %50 = vector.shape_cast %49 : vector<1x24x8xbf16> to vector<24x8xbf16>
    %cst_70 = arith.constant dense<0.000000e+00> : vector<256x8xf32>
    %51 = tpu.matmul %48, %50, %cst_70 {dimension_numbers = #tpu.dot_dimension_numbers<[1], [0], [0], [1], [0, 0, 1, 1], [], []>} : vector<256x24xbf16>, vector<24x8xbf16>, vector<256x8xf32> -> vector<256x8xf32>
    %52 = arith.addf %43, %51 : vector<256x8xf32>
    %c0_71 = arith.constant 0 : index
    %c1_72 = arith.constant 1 : index
    %c0_73 = arith.constant 0 : index
    %53 = vector.load %arg10[%c0_71, %c1_72, %c0_73] : memref<18x18x8xbf16, #tpu.memory_space<vmem>>, vector<16x16x8xbf16>
    %c1_74 = arith.constant 1 : index
    %c1_75 = arith.constant 1 : index
    %c0_76 = arith.constant 0 : index
    %54 = vector.load %arg10[%c1_74, %c1_75, %c0_76] : memref<18x18x8xbf16, #tpu.memory_space<vmem>>, vector<16x16x8xbf16>
    %c2_77 = arith.constant 2 : index
    %c1_78 = arith.constant 1 : index
    %c0_79 = arith.constant 0 : index
    %55 = vector.load %arg10[%c2_77, %c1_78, %c0_79] : memref<18x18x8xbf16, #tpu.memory_space<vmem>>, vector<16x16x8xbf16>
    %56 = tpu.concatenate %53, %54, %55 in 2 : vector<16x16x8xbf16>, vector<16x16x8xbf16>, vector<16x16x8xbf16> -> vector<16x16x24xbf16>
    %57 = vector.shape_cast %56 : vector<16x16x24xbf16> to vector<256x24xbf16>
    %c1_80 = arith.constant 1 : index
    %c0_81 = arith.constant 0 : index
    %c0_82 = arith.constant 0 : index
    %58 = vector.load %arg4[%c1_80, %c0_81, %c0_82] : memref<3x24x8xbf16, #tpu.memory_space<vmem>>, vector<1x24x8xbf16>
    %59 = vector.shape_cast %58 : vector<1x24x8xbf16> to vector<24x8xbf16>
    %cst_83 = arith.constant dense<0.000000e+00> : vector<256x8xf32>
    %60 = tpu.matmul %57, %59, %cst_83 {dimension_numbers = #tpu.dot_dimension_numbers<[1], [0], [0], [1], [0, 0, 1, 1], [], []>} : vector<256x24xbf16>, vector<24x8xbf16>, vector<256x8xf32> -> vector<256x8xf32>
    %61 = arith.addf %52, %60 : vector<256x8xf32>
    %c0_84 = arith.constant 0 : index
    %c2_85 = arith.constant 2 : index
    %c0_86 = arith.constant 0 : index
    %62 = vector.load %arg10[%c0_84, %c2_85, %c0_86] : memref<18x18x8xbf16, #tpu.memory_space<vmem>>, vector<16x16x8xbf16>
    %c1_87 = arith.constant 1 : index
    %c2_88 = arith.constant 2 : index
    %c0_89 = arith.constant 0 : index
    %63 = vector.load %arg10[%c1_87, %c2_88, %c0_89] : memref<18x18x8xbf16, #tpu.memory_space<vmem>>, vector<16x16x8xbf16>
    %c2_90 = arith.constant 2 : index
    %c2_91 = arith.constant 2 : index
    %c0_92 = arith.constant 0 : index
    %64 = vector.load %arg10[%c2_90, %c2_91, %c0_92] : memref<18x18x8xbf16, #tpu.memory_space<vmem>>, vector<16x16x8xbf16>
    %65 = tpu.concatenate %62, %63, %64 in 2 : vector<16x16x8xbf16>, vector<16x16x8xbf16>, vector<16x16x8xbf16> -> vector<16x16x24xbf16>
    %66 = vector.shape_cast %65 : vector<16x16x24xbf16> to vector<256x24xbf16>
    %c2_93 = arith.constant 2 : index
    %c0_94 = arith.constant 0 : index
    %c0_95 = arith.constant 0 : index
    %67 = vector.load %arg4[%c2_93, %c0_94, %c0_95] : memref<3x24x8xbf16, #tpu.memory_space<vmem>>, vector<1x24x8xbf16>
    %68 = vector.shape_cast %67 : vector<1x24x8xbf16> to vector<24x8xbf16>
    %cst_96 = arith.constant dense<0.000000e+00> : vector<256x8xf32>
    %69 = tpu.matmul %66, %68, %cst_96 {dimension_numbers = #tpu.dot_dimension_numbers<[1], [0], [0], [1], [0, 0, 1, 1], [], []>} : vector<256x24xbf16>, vector<24x8xbf16>, vector<256x8xf32> -> vector<256x8xf32>
    %70 = arith.addf %61, %69 : vector<256x8xf32>
    %c0_97 = arith.constant 0 : index
    %c0_98 = arith.constant 0 : index
    %71 = vector.load %arg5[%c0_97, %c0_98] : memref<1x8xf32, #tpu.memory_space<vmem>>, vector<1x8xf32>
    %72 = vector.broadcast %71 : vector<1x8xf32> to vector<256x8xf32>
    %73 = arith.addf %70, %72 : vector<256x8xf32>
    %c0_99 = arith.constant 0 : index
    %c0_100 = arith.constant 0 : index
    %c0_101 = arith.constant 0 : index
    %c0_102 = arith.constant 0 : index
    %74 = vector.load %arg1[%c0_99, %c0_100, %c0_101, %c0_102] : memref<1x16x16x8xbf16, #tpu.memory_space<vmem>>, vector<1x16x16x8xbf16>
    %75 = vector.shape_cast %74 : vector<1x16x16x8xbf16> to vector<16x16x8xbf16>
    %76 = vector.shape_cast %75 : vector<16x16x8xbf16> to vector<256x8xbf16>
    %c0_103 = arith.constant 0 : index
    %c0_104 = arith.constant 0 : index
    %77 = vector.load %arg6[%c0_103, %c0_104] : memref<8x8xbf16, #tpu.memory_space<vmem>>, vector<8x8xbf16>
    %cst_105 = arith.constant dense<0.000000e+00> : vector<256x8xf32>
    %78 = tpu.matmul %76, %77, %cst_105 {dimension_numbers = #tpu.dot_dimension_numbers<[1], [0], [0], [1], [0, 0, 1, 1], [], []>} : vector<256x8xbf16>, vector<8x8xbf16>, vector<256x8xf32> -> vector<256x8xf32>
    %79 = arith.addf %73, %78 : vector<256x8xf32>
    %c0_106 = arith.constant 0 : index
    %c0_107 = arith.constant 0 : index
    %80 = vector.load %arg7[%c0_106, %c0_107] : memref<1x8xf32, #tpu.memory_space<vmem>>, vector<1x8xf32>
    %81 = vector.broadcast %80 : vector<1x8xf32> to vector<256x8xf32>
    %82 = arith.addf %79, %81 : vector<256x8xf32>
    %cst_108 = arith.constant 0.000000e+00 : f32
    %83 = vector.broadcast %cst_108 : f32 to vector<256x8xf32>
    %84 = arith.maximumf %82, %83 : vector<256x8xf32>
    %c0_109 = arith.constant 0 : index
    %c0_110 = arith.constant 0 : index
    %c0_111 = arith.constant 0 : index
    %85 = vector.load %arg8[%c0_109, %c0_110, %c0_111] : memref<1x256x8xf32, #tpu.memory_space<vmem>>, vector<1x256x8xf32>
    %86 = vector.shape_cast %85 : vector<1x256x8xf32> to vector<256x8xf32>
    %87 = vector.shape_cast %84 : vector<256x8xf32> to vector<1x256x8xf32>
    tpu.vector_store %arg8[%c0_109, %c0_110, %c0_111], %87 {strides = array<i32>} : memref<1x256x8xf32, #tpu.memory_space<vmem>>, vector<1x256x8xf32>,
    return
  }
  func.func @transform_0(%arg0: i32) -> (i32, i32, i32, i32) {
    %c0_i32 = arith.constant 0 : i32
    %c0_i32_0 = arith.constant 0 : i32
    %c0_i32_1 = arith.constant 0 : i32
    %c0_i32_2 = arith.constant 0 : i32
    return %arg0, %c0_i32, %c0_i32_0, %c0_i32_1 : i32, i32, i32, i32
  }
  func.func @transform_1(%arg0: i32) -> (i32, i32, i32) {
    %c0_i32 = arith.constant 0 : i32
    %c0_i32_0 = arith.constant 0 : i32
    %c0_i32_1 = arith.constant 0 : i32
    %c0_i32_2 = arith.constant 0 : i32
    return %c0_i32, %c0_i32_0, %c0_i32_1 : i32, i32, i32
  }
  func.func @transform_2(%arg0: i32) -> (i32, i32) {
    %c0_i32 = arith.constant 0 : i32
    %c0_i32_0 = arith.constant 0 : i32
    %c0_i32_1 = arith.constant 0 : i32
    return %c0_i32, %c0_i32_0 : i32, i32
  }
  func.func @transform_3(%arg0: i32) -> (i32, i32, i32) {
    %c0_i32 = arith.constant 0 : i32
    %c0_i32_0 = arith.constant 0 : i32
    %c0_i32_1 = arith.constant 0 : i32
    %c0_i32_2 = arith.constant 0 : i32
    return %c0_i32, %c0_i32_0, %c0_i32_1 : i32, i32, i32
  }
  func.func @transform_4(%arg0: i32) -> (i32, i32) {
    %c0_i32 = arith.constant 0 : i32
    %c0_i32_0 = arith.constant 0 : i32
    %c0_i32_1 = arith.constant 0 : i32
    return %c0_i32, %c0_i32_0 : i32, i32
  }
  func.func @transform_5(%arg0: i32) -> (i32, i32) {
    %c0_i32 = arith.constant 0 : i32
    %c0_i32_0 = arith.constant 0 : i32
    %c0_i32_1 = arith.constant 0 : i32
    return %c0_i32, %c0_i32_0 : i32, i32
  }
  func.func @transform_6(%arg0: i32) -> (i32, i32) {
    %c0_i32 = arith.constant 0 : i32
    %c0_i32_0 = arith.constant 0 : i32
    %c0_i32_1 = arith.constant 0 : i32
    return %c0_i32, %c0_i32_0 : i32, i32
  }
  func.func @transform_7(%arg0: i32) -> (i32, i32, i32) {
    %c0_i32 = arith.constant 0 : i32
    %c0_i32_0 = arith.constant 0 : i32
    %c0_i32_1 = arith.constant 0 : i32
    return %arg0, %c0_i32, %c0_i32_0 : i32, i32, i32
  }
}

</mosaic_0001>

<bundles_post_ra>
// kernel: basic_block_forward.1
= control target key start
LH: loop header
LB: loop body
LE: loop exit
PB: predicated region body
PF: predicated region fallthrough
CT: control target
= control target key end

     0   :  { %s6458_s24 = smov 0   ;;  %s8236_s0 = inlined_call_operand.vmem [shape: bf16[2,16,16,8], index: 0, kind: input, shape index: {}]   ;;  %s8237_s1 = inlined_call_operand.vmem [shape: bf16[3,24,8], index: 1, kind: input, shape index: {}]   ;;  %s8238_s2 = inlined_call_operand.vmem [shape: f32[1,8], index: 2, kind: input, shape index: {}]   ;;  %s8239_s3 = inlined_call_operand.vmem [shape: bf16[3,24,8], index: 3, kind: input, shape index: {}]   ;;  %s8240_s4 = inlined_call_operand.vmem [shape: f32[1,8], index: 4, kind: input, shape index: {}]   ;;  %s8241_s5 = inlined_call_operand.vmem [shape: bf16[8,8], index: 5, kind: input, shape index: {}]   ;;  %s8242_s6 = inlined_call_operand.vmem [shape: f32[1,8], index: 6, kind: input, shape index: {}]   ;;  %s8243_s7 = inlined_call_operand.vmem [shape: f32[2,256,8], index: 7, kind: output, shape index: {}]  }
   0x1 LB: > { %s5612_s25 = sadd.s32 4294967295, %s6413_s24   ;;  %p5616_p0 = scmp.ge.s32.totalorder %s6413_s24, 1  ;;  %s6413_s24 = sphi %s6458_s24, %s17_s24  }
   0x2   : > { %p237_p1 = scmp.lt.s32.totalorder %s6413_s24, 3 }
   0x4   : > { %p238_p2 = pnand %p5616_p0, %p237_p1 }
   0x5   : > { %p269_p3 = scmp.lt.s32.totalorder (!%p238_p2), %s5612_s25, 1  ;;  %s6416_s30 = smov (!%p238_p2), 16  }
   0x6   : > { %241 = sbr.rel (%p238_p2) target bundleno = 999 (0x3e7), region = 48  ;;  %s6417_s8 = smov (!%p238_p2), 8  }
   0xb   : > { %vm280_vm0 = vcmask 60416   ;;  %v6415_v0 = vmov 0   ;;  %s8251_s25 = smov (!%p269_p3, %s5612_s25), 1  ;;  %vm368_vm1 = vsmask.f32 256  ;;  %vm283_vm2 = vcmask 57344  }
   0xc   : > { %288 = vst.msk [vmem:[#allocation2 + $0x18] sm:$0xf] %vm280_vm0, %v6415_v0  ;;  %s5835_s26 = sshll.u32 %s8251_s25, 7  ;;  %vm369_vm3 = vsmask.f32 4368  ;;  %vm6715_vm7 = vmand %vm283_vm2, %vm368_vm1  ;;  %vm1854_vm8 = vcmask 1043456  }
   0xd   : > { %289 = vst.msk [vmem:[#allocation2 + $0x1c] sm:$0xf] %vm280_vm0, %v6415_v0  ;;  %s6480_s29 = scalar_lea.vmem %s8236_s0, %s5835_s26  ;;  %vm693_vm4 = vsmask.f32 7938  ;;  %vm6493_vm5 = vmor %vm368_vm1, %vm369_vm3  ;;  %vm1259_vm9 = vcmask 130048   ;;  %vm1210_vm10 = vcmask 64512  }
   0xe   : > { %281 = vst.msk [vmem:[#allocation2] sm:$0xf] %vm280_vm0, %v6415_v0  ;;  %v338_v1 = vld [vmem:[%s6480_s29 + $0x8] sm:$0xf]  ;;  %v339_v2 = vld [vmem:[%s6480_s29 + $0xc] sm:$0xf]  ;;  %vm6503_vm6 = vmand %vm280_vm0, %vm693_vm4 }
   0xf   : > { %282 = vst.msk [vmem:[#allocation2 + $0x4] sm:$0xf] %vm280_vm0, %v6415_v0  ;;  %v389_v3 = vshrl.u32 %v338_v1, 16  ;;  %v392_v4 = vshll.u32 %v338_v1, 16  ;;  %v397_v5 = vshrl.u32 %v339_v2, 16  ;;  %v400_v6 = vshll.u32 %v339_v2, 16 }
  0x10   : > { %284 = vst.msk [vmem:[#allocation2 + $0x8] sm:$0x1] %vm283_vm2, %v6415_v0  ;;  %v336_v18 = vld [vmem:[%s6480_s29] sm:$0xf]  ;;  %v337_v22 = vld [vmem:[%s6480_s29 + $0x4] sm:$0xf] }
  0x11   : > { %285 = vst.msk [vmem:[#allocation2 + $0xc] sm:$0xf] %vm280_vm0, %v6415_v0  ;;  %v391_v8 = vrot.slane %v389_v3, 7  ;;  %v6497_v9 = vrot.slane %v397_v5, 7  ;;  %v372_v23 = vshrl.u32 %v336_v18, 16  ;;  %v380_v26 = vshrl.u32 %v337_v22, 16 }
  0x12   : > { %286 = vst.msk [vmem:[#allocation2 + $0x10] sm:$0xf] %vm280_vm0, %v6415_v0  ;;  %v341_v24 = vld [vmem:[%s6480_s29 + $0x14] sm:$0xf]  ;;  %v340_v25 = vld [vmem:[%s6480_s29 + $0x10] sm:$0xf] }
  0x13   : > { %287 = vst.msk [vmem:[#allocation2 + $0x14] sm:$0x1] %vm283_vm2, %v6415_v0  ;;  %v704_v11 = vld [vmem:[#allocation2 + $0x18] sm:$0xf]  ;;  %v394_v12 = vor.u32 %v392_v4, %v391_v8  ;;  %v395_v13 = vrot.slane %v391_v8, 4  ;;  %v402_v14 = vor.u32 %v400_v6, %v6497_v9  ;;  %v374_v27 = vrot.slane %v372_v23, 7 }
  0x14   : > { %290 = vst.msk [vmem:[#allocation2 + $0x20] sm:$0x1] %vm283_vm2, %v6415_v0  ;;  %v375_v28 = vshll.u32 %v336_v18, 16  ;;  %v414_v29 = vshrl.u32 %v341_v24, 16  ;;  %v406_v30 = vshrl.u32 %v340_v25, 16  ;;  %v382_v33 = vrot.slane %v380_v26, 7 }
  0x15   : > { %291 = vst.msk [vmem:[#allocation2 + $0x24] sm:$0xf] %vm280_vm0, %v6415_v0  ;;  %v403_v15 = vsel %vm6493_vm5, %v395_v13, %v402_v14  ;;  %v705_v16 = vsel %vm6503_vm6, %v394_v12, %v704_v11  ;;  %v383_v34 = vshll.u32 %v337_v22, 16  ;;  %v404_v36 = vrot.slane %v6497_v9, 4  ;;  %v343_v41 = vld [vmem:[%s6480_s29 + $0x1c] sm:$0xf] }
  0x16   : > { %292 = vst.msk [vmem:[#allocation2 + $0x28] sm:$0xf] %vm280_vm0, %v6415_v0  ;;  %v416_v37 = vrot.slane %v414_v29, 7  ;;  %v377_v38 = vor.u32 %v375_v28, %v374_v27  ;;  %v408_v39 = vrot.slane %v406_v30, 7  ;;  %v409_v40 = vshll.u32 %v340_v25, 16  ;;  %s5836_s9 = sshll.u32 %s8251_s25, 8 }
  0x17   : > { %293 = vst.msk [vmem:[#allocation2 + $0x2c] sm:$0x1] %vm283_vm2, %v6415_v0  ;;  %v378_v42 = vrot.slane %v374_v27, 4  ;;  %v385_v43 = vor.u32 %v383_v34, %v382_v33  ;;  %v431_v45 = vshrl.u32 %v343_v41, 16  ;;  %v387_v47 = vrot.slane %v382_v33, 4  ;;  %s7931_s11 = scalar_lea.vmem %s8243_s7, %s5836_s9 }
  0x18   : > { %294 = vst.msk [vmem:[#allocation2 + $0x30] sm:$0xf] %vm280_vm0, %v6415_v0  ;;  %v695_v44 = vld [vmem:[#allocation2 + $0xc] sm:$0xf]  ;;  %v417_v48 = vshll.u32 %v341_v24, 16  ;;  %v421_v51 = vrot.slane %v416_v37, 4  ;;  %v411_v55 = vor.u32 %v409_v40, %v408_v39 }
  0x19   : > { %706 = vst [vmem:[#allocation2 + $0x18] sm:$0xf] %v705_v16  ;;  %v433_v52 = vrot.slane %v431_v45, 7  ;;  %v696_v53 = vsel %vm6503_vm6, %v377_v38, %v695_v44  ;;  %v342_v56 = vld [vmem:[%s6480_s29 + $0x18] sm:$0xf]  ;;  %v386_v57 = vsel %vm6493_vm5, %v378_v42, %v385_v43  ;;  %v412_v62 = vrot.slane %v408_v39, 4 }
  0x1a   : > { %707 = vst.msk [vmem:[#allocation2 + $0x1c] sm:$0xf] %vm280_vm0, %v403_v15  ;;  %v701_v50 = vld [vmem:[#allocation2 + $0x14] sm:$0x1]  ;;  %v423_v59 = vshrl.u32 %v342_v56, 16  ;;  %v419_v63 = vor.u32 %v417_v48, %v416_v37  ;;  %v426_v4 = vshll.u32 %v342_v56, 16 }
  0x1b   : > { %295 = vst.msk [vmem:[#allocation2 + $0x34] sm:$0xf] %vm280_vm0, %v6415_v0  ;;  %v708_v46 = vld [vmem:[#allocation2 + $0x20] sm:$0x1]  ;;  %v702_v61 = vsel %vm6715_vm7, %v387_v47, %v701_v50  ;;  %v438_v2 = vrot.slane %v433_v52, 4  ;;  %v434_v5 = vshll.u32 %v343_v41, 16 }
  0x1c   : > { %296 = vst.msk [vmem:[#allocation2 + $0x38] sm:$0x1] %vm283_vm2, %v6415_v0  ;;  %v711_v58 = vld [vmem:[#allocation2 + $0x24] sm:$0xf]  ;;  %v709_v60 = vsel %vm6715_vm7, %v404_v36, %v708_v46  ;;  %v425_v3 = vrot.slane %v423_v59, 7  ;;  %v420_v15 = vsel %vm6493_vm5, %v412_v62, %v419_v63  ;;  %vm1805_vm11 = vcmask 195584  }
  0x1d   : > { %297 = vst.msk [vmem:[#allocation2 + $0x3c] sm:$0xf] %vm280_vm0, %v6415_v0  ;;  %v360_v8 = vld [vmem:[%s6480_s29 + $0x60] sm:$0xf]  ;;  %v361_v9 = vld [vmem:[%s6480_s29 + $0x64] sm:$0xf]  ;;  %v436_v13 = vor.u32 %v434_v5, %v433_v52 }
  0x1e   : > { %298 = vst.msk [vmem:[#allocation2 + $0x40] sm:$0xf] %vm280_vm0, %v6415_v0  ;;  %v715_v54 = vld [vmem:[#allocation2 + $0x2c] sm:$0x1]  ;;  %v428_v11 = vor.u32 %v426_v4, %v425_v3  ;;  %v429_v12 = vrot.slane %v425_v3, 4  ;;  %v576_v14 = vshrl.u32 %v360_v8, 16 }
  0x1f   : > { %299 = vst.msk [vmem:[#allocation2 + $0x44] sm:$0x1] %vm283_vm2, %v6415_v0  ;;  %v716_v6 = vsel %vm6715_vm7, %v421_v51, %v715_v54  ;;  %v718_v16 = vld [vmem:[#allocation2 + $0x30] sm:$0xf]  ;;  %v579_v27 = vshll.u32 %v360_v8, 16  ;;  %v587_v33 = vshll.u32 %v361_v9, 16 }
  0x20   : > { %300 = vst.msk [vmem:[#allocation2 + $0x48] sm:$0xf] %vm280_vm0, %v6415_v0  ;;  %v6122_v20 = vld [vmem:[#allocation2 + $0x18] sm:$0xe]  ;;  %v437_v22 = vsel %vm6493_vm5, %v429_v12, %v436_v13  ;;  %v578_v25 = vrot.slane %v576_v14, 7  ;;  %vm2448_vm12 = vcmask 1046528  }
  0x21   : > { %v5924_v17 = vld [vmem:[#allocation2 + $0x18] sm:$0xff]   ;;  %301 = vst.msk [vmem:[#allocation2 + $0x4c] sm:$0xf] %vm280_vm0, %v6415_v0  ;;  %vm1631_vm13 = vsmask.f32 7424 }
  0x22   : > { %1178 = vrot.lane.b32.xlu1 %v5924_v17, %s6416_s30  ;;  %302 = vst.msk [vmem:[#allocation2 + $0x50] sm:$0x1] %vm283_vm2, %v6415_v0  ;;  %1068 = vrot.lane.b32.xlu0 %v5924_v17, %s6417_s8  ;;  %v6121_v19 = vld [vmem:[#allocation2 + $0x18] sm:$0xf0]  ;;  %v6098_v32 = vld [vmem:[#allocation2 + $0x18] sm:$0xe]  ;;  %v581_v42 = vor.u32 %v579_v27, %v578_v25 }
  0x23   : > { %303 = vst.msk [vmem:[#allocation2 + $0x54] sm:$0xf] %vm280_vm0, %v6415_v0  ;;  %v6123_v21 = vor.u32 %v6122_v20, %v6121_v19  ;;  %v6097_v31 = vld [vmem:[#allocation2 + $0x18] sm:$0xf0]  ;;  %v722_v1 = vld [vmem:[#allocation2 + $0x38] sm:$0x1]  ;;  %v719_v19 = vsel %vm6503_vm6, %v428_v11, %v718_v16 }
  0x24   : > { %304 = vst.msk [vmem:[#allocation2 + $0x58] sm:$0xf] %vm280_vm0, %v6415_v0  ;;  %v6099_v35 = vor.u32 %v6098_v32, %v6097_v31  ;;  %v584_v17 = vshrl.u32 %v361_v9, 16  ;;  %v723_v18 = vsel %vm6715_vm7, %v438_v2, %v722_v1  ;;  %v362_v20 = vld [vmem:[%s6480_s29 + $0x68] sm:$0xf]  ;;  %v582_v47 = vrot.slane %v578_v25, 4 }
  0x25   : > { %305 = vst.msk [vmem:[#allocation2 + $0x5c] sm:$0x1] %vm283_vm2, %v6415_v0  ;;  %2304 = vrot.lane.b32.xlu2 %v6123_v21, %s6416_s30  ;;  %v363_v21 = vld [vmem:[%s6480_s29 + $0x6c] sm:$0xf]  ;;  %v593_v23 = vshrl.u32 %v362_v20, 16  ;;  %v596_v32 = vshll.u32 %v362_v20, 16 }
  0x26   : > { %306 = vst.msk [vmem:[#allocation2 + $0x60] sm:$0xf] %vm280_vm0, %v6415_v0  ;;  %v601_v24 = vshrl.u32 %v363_v21, 16  ;;  %v6754_v28 = vrot.slane %v584_v17, 7  ;;  %v604_v41 = vshll.u32 %v363_v21, 16 }
  0x27   : > { %307 = vst.msk [vmem:[#allocation2 + $0x64] sm:$0xf] %vm280_vm0, %v6415_v0  ;;  %v595_v31 = vrot.slane %v593_v23, 7  ;;  %v344_v1 = vld [vmem:[%s6480_s29 + $0x20] sm:$0xf] }
  0x28   : > { %308 = vst.msk [vmem:[#allocation2 + $0x68] sm:$0x1] %vm283_vm2, %v6415_v0  ;;  %v589_v48 = vor.u32 %v587_v33, %v6754_v28  ;;  %v345_v2 = vld [vmem:[%s6480_s29 + $0x24] sm:$0xf]  ;;  %v440_v5 = vshrl.u32 %v344_v1, 16  ;;  %v443_v11 = vshll.u32 %v344_v1, 16 }
  0x29   : > { %309 = vst.msk [vmem:[#allocation2 + $0x6c] sm:$0xf] %vm280_vm0, %v6415_v0  ;;  %v598_v39 = vor.u32 %v596_v32, %v595_v31  ;;  %v599_v45 = vrot.slane %v595_v31, 4  ;;  %v591_v16 = vrot.slane %v6754_v28, 4  ;;  %v451_v20 = vshll.u32 %v345_v2, 16 }
  0x2a   : > { %310 = vst.msk [vmem:[#allocation2 + $0x70] sm:$0xf] %vm280_vm0, %v6415_v0  ;;  %v590_v59 = vsel %vm6493_vm5, %v582_v47, %v589_v48  ;;  %v442_v9 = vrot.slane %v440_v5, 7  ;;  %v725_v21 = vld [vmem:[#allocation2 + $0x3c] sm:$0xf] }
  0x2b   : > { %311 = vst.msk [vmem:[#allocation2 + $0x74] sm:$0x1] %vm283_vm2, %v6415_v0  ;;  %v365_v33 = vld [vmem:[%s6480_s29 + $0x74] sm:$0xf]  ;;  %v364_v48 = vld [vmem:[%s6480_s29 + $0x70] sm:$0xf] }
  0x2c   : > { %312 = vst.msk [vmem:[#allocation2 + $0x78] sm:$0xf] %vm280_vm0, %v6415_v0  ;;  %v445_v17 = vor.u32 %v443_v11, %v442_v9 }
  0x2d   : > { %313 = vst.msk [vmem:[#allocation2 + $0x7c] sm:$0xf] %vm280_vm0, %v6415_v0  ;;  %2226 = vrot.lane.b32.xlu2 %v6099_v35, %s6417_s8  ;;  %v603_v35 = vrot.slane %v601_v24, 7 }
  0x2e   : > { %314 = vst.msk [vmem:[#allocation2 + $0x80] sm:$0x1] %vm283_vm2, %v6415_v0  ;;  %v726_v23 = vsel %vm6503_vm6, %v445_v17, %v725_v21 }
  0x2f   : > { %315 = vst.msk [vmem:[#allocation2 + $0x84] sm:$0xf] %vm280_vm0, %v6415_v0  ;;  %v606_v54 = vor.u32 %v604_v41, %v603_v35  ;;  %v608_v4 = vrot.slane %v603_v35, 4 }
  0x30   : > { %316 = vst.msk [vmem:[#allocation2 + $0x88] sm:$0xf] %vm280_vm0, %v6415_v0 }
  0x31   : > { %317 = vst.msk [vmem:[#allocation2 + $0x8c] sm:$0x1] %vm283_vm2, %v6415_v0 }
  0x32   : > { %318 = vst.msk [vmem:[#allocation2 + $0x90] sm:$0xf] %vm280_vm0, %v6415_v0 }
  0x33   : > { %319 = vst.msk [vmem:[#allocation2 + $0x94] sm:$0xf] %vm280_vm0, %v6415_v0 }
  0x34   : > { %320 = vst.msk [vmem:[#allocation2 + $0x98] sm:$0x1] %vm283_vm2, %v6415_v0 }
  0x35   : > { %321 = vst.msk [vmem:[#allocation2 + $0x9c] sm:$0xf] %vm280_vm0, %v6415_v0 }
  0x36   : > { %322 = vst.msk [vmem:[#allocation2 + $0xa0] sm:$0xf] %vm280_vm0, %v6415_v0 }
  0x37   : > { %323 = vst.msk [vmem:[#allocation2 + $0xa4] sm:$0x1] %vm283_vm2, %v6415_v0 }
  0x38   : > { %324 = vst.msk [vmem:[#allocation2 + $0xa8] sm:$0xf] %vm280_vm0, %v6415_v0 }
  0x39   : > { %325 = vst.msk [vmem:[#allocation2 + $0xac] sm:$0xf] %vm280_vm0, %v6415_v0 }
  0x3a   : > { %326 = vst.msk [vmem:[#allocation2 + $0xb0] sm:$0x1] %vm283_vm2, %v6415_v0 }
  0x3b   : > { %327 = vst.msk [vmem:[#allocation2 + $0xb4] sm:$0xf] %vm280_vm0, %v6415_v0 }
  0x3c   : > { %328 = vst.msk [vmem:[#allocation2 + $0xb8] sm:$0xf] %vm280_vm0, %v6415_v0  ;;  %v781_v56 = vld [vmem:[#allocation2 + $0x9c] sm:$0xf] }
  0x3d   : > { %329 = vst.msk [vmem:[#allocation2 + $0xbc] sm:$0x1] %vm283_vm2, %v6415_v0  ;;  %v782_v63 = vsel %vm6503_vm6, %v581_v42, %v781_v56 }
  0x3e   : > { %330 = vst.msk [vmem:[#allocation2 + $0xc0] sm:$0xf] %vm280_vm0, %v6415_v0 }
  0x3f   : > { %331 = vst.msk [vmem:[#allocation2 + $0xc4] sm:$0xf] %vm280_vm0, %v6415_v0  ;;  %v788_v46 = vld [vmem:[#allocation2 + $0xa8] sm:$0xf] }
  0x40   : > { %332 = vst.msk [vmem:[#allocation2 + $0xc8] sm:$0x1] %vm283_vm2, %v6415_v0 }
  0x41   : > { %333 = vst.msk [vmem:[#allocation2 + $0xcc] sm:$0xf] %vm280_vm0, %v6415_v0 }
  0x42   : > { %334 = vst.msk [vmem:[#allocation2 + $0xd0] sm:$0xf] %vm280_vm0, %v6415_v0 }
  0x43   : > { %335 = vst.msk [vmem:[#allocation2 + $0xd4] sm:$0x1] %vm283_vm2, %v6415_v0 }
  0x44   : > { %2782 = vst.msk [vmem:[#allocation3] sm:$0xf] %vm280_vm0, %v6415_v0 }
  0x45   : > { %2783 = vst.msk [vmem:[#allocation3 + $0x4] sm:$0xf] %vm280_vm0, %v6415_v0 }
  0x46   : > { %2784 = vst.msk [vmem:[#allocation3 + $0x8] sm:$0x1] %vm283_vm2, %v6415_v0 }
  0x47   : > { %2785 = vst.msk [vmem:[#allocation3 + $0xc] sm:$0xf] %vm280_vm0, %v6415_v0 }
  0x48   : > { %2786 = vst.msk [vmem:[#allocation3 + $0x10] sm:$0xf] %vm280_vm0, %v6415_v0 }
  0x49   : > { %2787 = vst.msk [vmem:[#allocation3 + $0x14] sm:$0x1] %vm283_vm2, %v6415_v0 }
  0x4a   : > { %2788 = vst.msk [vmem:[#allocation3 + $0x18] sm:$0xf] %vm280_vm0, %v6415_v0 }
  0x4b   : > { %2789 = vst.msk [vmem:[#allocation3 + $0x1c] sm:$0xf] %vm280_vm0, %v6415_v0 }
  0x4c   : > { %2790 = vst.msk [vmem:[#allocation3 + $0x20] sm:$0x1] %vm283_vm2, %v6415_v0 }
  0x4d   : > { %2791 = vst.msk [vmem:[#allocation3 + $0x24] sm:$0xf] %vm280_vm0, %v6415_v0 }
  0x4e   : > { %2792 = vst.msk [vmem:[#allocation3 + $0x28] sm:$0xf] %vm280_vm0, %v6415_v0 }
  0x4f   : > { %2793 = vst.msk [vmem:[#allocation3 + $0x2c] sm:$0x1] %vm283_vm2, %v6415_v0 }
  0x50   : > { %2794 = vst.msk [vmem:[#allocation3 + $0x30] sm:$0xf] %vm280_vm0, %v6415_v0 }
  0x51   : > { %2795 = vst.msk [vmem:[#allocation3 + $0x34] sm:$0xf] %vm280_vm0, %v6415_v0 }
  0x52   : > { %2796 = vst.msk [vmem:[#allocation3 + $0x38] sm:$0x1] %vm283_vm2, %v6415_v0 }
  0x53   : > { %2797 = vst.msk [vmem:[#allocation3 + $0x3c] sm:$0xf] %vm280_vm0, %v6415_v0 }
  0x54   : > { %2798 = vst.msk [vmem:[#allocation3 + $0x40] sm:$0xf] %vm280_vm0, %v6415_v0 }
  0x55   : > { %2799 = vst.msk [vmem:[#allocation3 + $0x44] sm:$0x1] %vm283_vm2, %v6415_v0 }
  0x56   : > { %2800 = vst.msk [vmem:[#allocation3 + $0x48] sm:$0xf] %vm280_vm0, %v6415_v0 }
  0x57   : > { %2801 = vst.msk [vmem:[#allocation3 + $0x4c] sm:$0xf] %vm280_vm0, %v6415_v0 }
  0x58   : > { %2802 = vst.msk [vmem:[#allocation3 + $0x50] sm:$0x1] %vm283_vm2, %v6415_v0 }
  0x59   : > { %2803 = vst.msk [vmem:[#allocation3 + $0x54] sm:$0xf] %vm280_vm0, %v6415_v0 }
  0x5a   : > { %2804 = vst.msk [vmem:[#allocation3 + $0x58] sm:$0xf] %vm280_vm0, %v6415_v0 }
  0x5b   : > { %2805 = vst.msk [vmem:[#allocation3 + $0x5c] sm:$0x1] %vm283_vm2, %v6415_v0 }
  0x5c   : > { %2806 = vst.msk [vmem:[#allocation3 + $0x60] sm:$0xf] %vm280_vm0, %v6415_v0 }
  0x5d   : > { %2807 = vst.msk [vmem:[#allocation3 + $0x64] sm:$0xf] %vm280_vm0, %v6415_v0 }
  0x5e   : > { %2808 = vst.msk [vmem:[#allocation3 + $0x68] sm:$0x1] %vm283_vm2, %v6415_v0 }
  0x5f   : > { %2809 = vst.msk [vmem:[#allocation3 + $0x6c] sm:$0xf] %vm280_vm0, %v6415_v0 }
  0x60   : > { %2810 = vst.msk [vmem:[#allocation3 + $0x70] sm:$0xf] %vm280_vm0, %v6415_v0 }
  0x61   : > { %2811 = vst.msk [vmem:[#allocation3 + $0x74] sm:$0x1] %vm283_vm2, %v6415_v0 }
  0x62   : > { %2812 = vst.msk [vmem:[#allocation3 + $0x78] sm:$0xf] %vm280_vm0, %v6415_v0 }
  0x63   : > { %2813 = vst.msk [vmem:[#allocation3 + $0x7c] sm:$0xf] %vm280_vm0, %v6415_v0 }
  0x64   : > { %2814 = vst.msk [vmem:[#allocation3 + $0x80] sm:$0x1] %vm283_vm2, %v6415_v0 }
  0x65   : > { %2815 = vst.msk [vmem:[#allocation3 + $0x84] sm:$0xf] %vm280_vm0, %v6415_v0 }
  0x66   : > { %2816 = vst.msk [vmem:[#allocation3 + $0x88] sm:$0xf] %vm280_vm0, %v6415_v0 }
  0x67   : > { %2817 = vst.msk [vmem:[#allocation3 + $0x8c] sm:$0x1] %vm283_vm2, %v6415_v0 }
  0x68   : > { %2818 = vst.msk [vmem:[#allocation3 + $0x90] sm:$0xf] %vm280_vm0, %v6415_v0 }
  0x69   : > { %2819 = vst.msk [vmem:[#allocation3 + $0x94] sm:$0xf] %vm280_vm0, %v6415_v0 }
  0x6a   : > { %2820 = vst.msk [vmem:[#allocation3 + $0x98] sm:$0x1] %vm283_vm2, %v6415_v0 }
  0x6b   : > { %2821 = vst.msk [vmem:[#allocation3 + $0x9c] sm:$0xf] %vm280_vm0, %v6415_v0 }
  0x6c   : > { %2822 = vst.msk [vmem:[#allocation3 + $0xa0] sm:$0xf] %vm280_vm0, %v6415_v0 }
  0x6d   : > { %2823 = vst.msk [vmem:[#allocation3 + $0xa4] sm:$0x1] %vm283_vm2, %v6415_v0 }
  0x6e   : > { %2824 = vst.msk [vmem:[#allocation3 + $0xa8] sm:$0xf] %vm280_vm0, %v6415_v0 }
  0x6f   : > { %2825 = vst.msk [vmem:[#allocation3 + $0xac] sm:$0xf] %vm280_vm0, %v6415_v0 }
  0x70   : > { %2826 = vst.msk [vmem:[#allocation3 + $0xb0] sm:$0x1] %vm283_vm2, %v6415_v0 }
  0x71   : > { %2827 = vst.msk [vmem:[#allocation3 + $0xb4] sm:$0xf] %vm280_vm0, %v6415_v0 }
  0x72   : > { %2828 = vst.msk [vmem:[#allocation3 + $0xb8] sm:$0xf] %vm280_vm0, %v6415_v0 }
  0x73   : > { %2829 = vst.msk [vmem:[#allocation3 + $0xbc] sm:$0x1] %vm283_vm2, %v6415_v0 }
  0x74   : > { %2830 = vst.msk [vmem:[#allocation3 + $0xc0] sm:$0xf] %vm280_vm0, %v6415_v0 }
  0x75   : > { %2831 = vst.msk [vmem:[#allocation3 + $0xc4] sm:$0xf] %vm280_vm0, %v6415_v0 }
  0x76   : > { %2832 = vst.msk [vmem:[#allocation3 + $0xc8] sm:$0x1] %vm283_vm2, %v6415_v0 }
  0x77   : > { %2833 = vst.msk [vmem:[#allocation3 + $0xcc] sm:$0xf] %vm280_vm0, %v6415_v0 }
  0x78   : > { %2834 = vst.msk [vmem:[#allocation3 + $0xd0] sm:$0xf] %vm280_vm0, %v6415_v0 }
  0x79   : > { %2835 = vst.msk [vmem:[#allocation3 + $0xd4] sm:$0x1] %vm283_vm2, %v6415_v0  ;;  %v712_v0 = vsel %vm6503_vm6, %v411_v55, %v711_v58  ;;  %v789_v55 = vsel %vm6503_vm6, %v598_v39, %v788_v46  ;;  %v607_v58 = vsel %vm6493_vm5, %v599_v45, %v606_v54  ;;  %v610_v54 = vshrl.u32 %v364_v48, 16 }
  0x7a   : > { %697 = vst [vmem:[#allocation2 + $0xc] sm:$0xf] %v696_v53 }
  0x7b   : > { %698 = vst.msk [vmem:[#allocation2 + $0x10] sm:$0xf] %vm280_vm0, %v386_v57  ;;  %v612_v56 = vrot.slane %v610_v54, 7 }
  0x7c   : > { %710 = vst [vmem:[#allocation2 + $0x20] sm:$0x1] %v709_v60  ;;  %v792_v60 = vld [vmem:[#allocation2 + $0xb0] sm:$0x1] }
  0x7d   : > { %703 = vst [vmem:[#allocation2 + $0x14] sm:$0x1] %v702_v61  ;;  %v793_v8 = vsel %vm6715_vm7, %v608_v4, %v792_v60 }
  0x7e   : > { %717 = vst [vmem:[#allocation2 + $0x2c] sm:$0x1] %v716_v6  ;;  %v448_v6 = vshrl.u32 %v345_v2, 16 }
  0x7f   : > { %713 = vst [vmem:[#allocation2 + $0x24] sm:$0xf] %v712_v0 }
  0x80   : > { %714 = vst.msk [vmem:[#allocation2 + $0x28] sm:$0xf] %vm280_vm0, %v420_v15  ;;  %v450_v15 = vrot.slane %v448_v6, 7 }
  0x81   : > { %v6370_v26 = vld [vmem:[#allocation2 + $0xc] sm:$0xe]  ;;  %724 = vst [vmem:[#allocation2 + $0x38] sm:$0x1] %v723_v18  ;;  %v785_v18 = vld [vmem:[#allocation2 + $0xa4] sm:$0x1] }
  0x82   : > { %v842_v29 = vld [vmem:[#allocation2 + $0xc] sm:$0xff]   ;;  %720 = vst [vmem:[#allocation2 + $0x30] sm:$0xf] %v719_v19  ;;  %v446_v19 = vrot.slane %v442_v9, 4  ;;  %v453_v25 = vor.u32 %v451_v20, %v450_v15  ;;  %v455_v41 = vrot.slane %v450_v15, 4 }
  0x83   : > { %v6369_v30 = vld [vmem:[#allocation2 + $0xc] sm:$0xf0]  ;;  %v1327_v34 = vld [vmem:[#allocation2 + $0x20] sm:$0x1]  ;;  %721 = vst.msk [vmem:[#allocation2 + $0x34] sm:$0xf] %vm280_vm0, %v437_v22  ;;  %1066 = vrot.lane.b32.xlu0 %v842_v29, %s6417_s8  ;;  %v786_v22 = vsel %vm6715_vm7, %v591_v16, %v785_v18 }
  0x84   : > { %v1312_v36 = vld [vmem:[#allocation2 + $0x20] sm:$0x1]  ;;  %v1311_v37 = vld [vmem:[#allocation2 + $0x14] sm:$0x1]  ;;  %v1487_v38 = vunpack.c.l.b16 %v1327_v34  ;;  %v6371_v40 = vor.u32 %v6370_v26, %v6369_v30  ;;  %790 = vst [vmem:[#allocation2 + $0xa8] sm:$0xf] %v789_v55  ;;  %v454_v28 = vsel %vm6493_vm5, %v446_v19, %v453_v25 }
  0x85   : > { %v1408_v50 = vunpack.c.l.b16 %v1312_v36  ;;  %v1407_v51 = vunpack.c.l.b16 %v1311_v37  ;;  %v1328_v57 = vld [vmem:[#allocation2 + $0x2c] sm:$0x1]  ;;  %791 = vst.msk [vmem:[#allocation2 + $0xac] sm:$0xf] %vm280_vm0, %v607_v58  ;;  %v618_v36 = vshrl.u32 %v365_v33, 16  ;;  %v621_v58 = vshll.u32 %v365_v33, 16 }
  0x86   : > { %v1503_v43 = vpack.c.b16 %v1487_v38, %v1487_v38  ;;  %v6373_v44 = vld [vmem:[#allocation2 + $0x24] sm:$0xe]  ;;  %2224 = vrot.lane.b32.xlu1 %v6371_v40, %s6417_s8  ;;  %783 = vst [vmem:[#allocation2 + $0x9c] sm:$0xf] %v782_v63  ;;  %v1488_v12 = vunpack.c.l.b16 %v1328_v57  ;;  %v1313_v26 = vld [vmem:[#allocation2 + $0x2c] sm:$0x1] }
  0x87   : > { %v876_v52 = vld [vmem:[#allocation2 + $0x24] sm:$0xff]   ;;  %v1424_v61 = vpack.c.b16 %v1408_v50, %v1408_v50  ;;  %v1423_v62 = vpack.c.b16 %v1407_v51, %v1407_v51  ;;  %784 = vst.msk [vmem:[#allocation2 + $0xa0] sm:$0xf] %vm280_vm0, %v590_v59  ;;  %v1409_v29 = vunpack.c.l.b16 %v1313_v26  ;;  %v620_v38 = vrot.slane %v618_v36, 7  ;;  %v795_v63 = vld [vmem:[#allocation2 + $0xb4] sm:$0xf] }
  0x88   : > { %v6372_v53 = vld [vmem:[#allocation2 + $0x24] sm:$0xf0]  ;;  %1519 = vrot.lane.b32.xlu2 %v1503_v43, %s6416_s30  ;;  %v6376_v0 = vld [vmem:[#allocation2 + $0x24] sm:$0xe]  ;;  %794 = vst [vmem:[#allocation2 + $0xb0] sm:$0x1] %v793_v8  ;;  %v1504_v24 = vpack.c.b16 %v1488_v12, %v1488_v12 }
  0x89   : > { %v6374_v3 = vor.u32 %v6373_v44, %v6372_v53  ;;  %v845_v13 = vld [vmem:[#allocation2 + $0x24] sm:$0xff]   ;;  %787 = vst [vmem:[#allocation2 + $0xa4] sm:$0x1] %v786_v22  ;;  %v6125_v31 = vld [vmem:[#allocation2 + $0x30] sm:$0xe]  ;;  %v1425_v32 = vpack.c.b16 %v1409_v29, %v1409_v29  ;;  %v625_v42 = vrot.slane %v620_v38, 4 }
  0x8a   : > { %v6375_v14 = vld [vmem:[#allocation2 + $0x24] sm:$0xf0]  ;;  %727 = vst [vmem:[#allocation2 + $0x3c] sm:$0xf] %v726_v23  ;;  %v6124_v30 = vld [vmem:[#allocation2 + $0x30] sm:$0xf0] }
  0x8b   : > { %1439 = vrot.lane.b32.xlu0 %v1423_v62, %s6417_s8  ;;  %v6377_v27 = vor.u32 %v6376_v0, %v6375_v14  ;;  %728 = vst.msk [vmem:[#allocation2 + $0x40] sm:$0xf] %vm280_vm0, %v454_v28  ;;  %v1329_v34 = vld [vmem:[#allocation2 + $0x38] sm:$0x1]  ;;  %v6126_v35 = vor.u32 %v6125_v31, %v6124_v30  ;;  %v729_v43 = vld [vmem:[#allocation2 + $0x44] sm:$0x1]  ;;  %v623_v62 = vor.u32 %v621_v58, %v620_v38 }
  0x8c   : > { %v1489_v39 = vunpack.c.l.b16 %v1329_v34  ;;  %v799_v44 = vld [vmem:[#allocation2 + $0xbc] sm:$0x1]  ;;  %v730_v45 = vsel %vm6715_vm7, %v455_v41, %v729_v43  ;;  %v6066_v50 = vld [vmem:[#allocation2 + $0x30] sm:$0xff]   ;;  %v1314_v55 = vld [vmem:[#allocation2 + $0x38] sm:$0x1]  ;;  %v613_v57 = vshll.u32 %v364_v48, 16 }
  0x8d   : > { %v800_v46 = vsel %vm6715_vm7, %v625_v42, %v799_v44  ;;  %731 = vst [vmem:[#allocation2 + $0x44] sm:$0x1] %v730_v45  ;;  %v1410_v59 = vunpack.c.l.b16 %v1314_v55  ;;  %v6808_v4 = vld [vmem:[#allocation2 + $0xa8] sm:$0xff]   ;;  %v736_v19 = vld [vmem:[#allocation2 + $0x50] sm:$0x1] }
  0x8e   : > { %1441 = vrot.lane.b32.xlu1 %v1424_v61, %s6417_s8  ;;  %v1505_v47 = vpack.c.b16 %v1489_v39, %v1489_v39  ;;  %v865_v51 = vld [vmem:[#allocation2 + $0x9c] sm:$0xff]   ;;  %801 = vst [vmem:[#allocation2 + $0xbc] sm:$0x1] %v800_v46  ;;  %v615_v60 = vor.u32 %v613_v57, %v612_v56  ;;  %v616_v61 = vrot.slane %v612_v56, 4  ;;  %v346_v9 = vld [vmem:[%s6480_s29 + $0x28] sm:$0xf] }
  0x8f   : > { %v1339_v5 = vld [vmem:[#allocation2 + $0xb0] sm:$0x1]  ;;  %v1426_v6 = vpack.c.b16 %v1410_v59, %v1410_v59  ;;  %v457_v11 = vshrl.u32 %v346_v9, 16  ;;  %v460_v16 = vshll.u32 %v346_v9, 16  ;;  %v366_v33 = vld [vmem:[%s6480_s29 + $0x78] sm:$0xf] }
  0x90   : > { %2306 = vrot.lane.b32.xlu2 %v6374_v3, %s6416_s30  ;;  %v1323_v37 = vld [vmem:[#allocation2 + $0xa4] sm:$0x1]  ;;  %v624_v1 = vsel %vm6493_vm5, %v616_v61, %v623_v62  ;;  %v796_v2 = vsel %vm6503_vm6, %v615_v60, %v795_v63  ;;  %v347_v3 = vld [vmem:[%s6480_s29 + $0x2c] sm:$0xf]  ;;  %v367_v34 = vld [vmem:[%s6480_s29 + $0x7c] sm:$0xf] }
  0x91   : > { %v1419_v40 = vunpack.c.l.b16 %v1323_v37  ;;  %797 = vst [vmem:[#allocation2 + $0xb4] sm:$0xf] %v796_v2  ;;  %v465_v0 = vshrl.u32 %v347_v3, 16  ;;  %v459_v15 = vrot.slane %v457_v11, 7  ;;  %v468_v17 = vshll.u32 %v347_v3, 16 }
  0x92   : > { %798 = vst.msk [vmem:[#allocation2 + $0xb8] sm:$0xf] %vm280_vm0, %v624_v1  ;;  %v880_v26 = vld [vmem:[#allocation2 + $0x3c] sm:$0xff]   ;;  %v6101_v36 = vld [vmem:[#allocation2 + $0x30] sm:$0xe]  ;;  %v627_v37 = vshrl.u32 %v366_v33, 16 }
  0x93   : > { %1180 = vrot.lane.b32.xlu0 %v876_v52, %s6416_s30  ;;  %v6798_v52 = vld [vmem:[#allocation2 + $0x9c] sm:$0xf0]  ;;  %v1435_v53 = vpack.c.b16 %v1419_v40, %v1419_v40  ;;  %v467_v12 = vrot.slane %v465_v0, 7  ;;  %v462_v20 = vor.u32 %v460_v16, %v459_v15  ;;  %v463_v21 = vrot.slane %v459_v15, 4  ;;  %v6264_v44 = vld [vmem:[#allocation2 + $0x3c] sm:$0xe] }
  0x94   : > { %v1330_v8 = vld [vmem:[#allocation2 + $0x44] sm:$0x1]  ;;  %v635_v38 = vshrl.u32 %v367_v34, 16  ;;  %v629_v39 = vrot.slane %v627_v37, 7  ;;  %v630_v40 = vshll.u32 %v366_v33, 16  ;;  %v638_v42 = vshll.u32 %v367_v34, 16 }
  0x95   : > { %v1490_v14 = vunpack.c.l.b16 %v1330_v8  ;;  %v472_v18 = vrot.slane %v467_v12, 4  ;;  %v470_v23 = vor.u32 %v468_v17, %v467_v12  ;;  %v802_v48 = vld [vmem:[#allocation2 + $0xc0] sm:$0xf]  ;;  %v349_v56 = vld [vmem:[%s6480_s29 + $0x34] sm:$0xf] }
  0x96   : > { %1521 = vrot.lane.b32.xlu1 %v1504_v24, %s6416_s30  ;;  %v732_v24 = vld [vmem:[#allocation2 + $0x48] sm:$0xf]  ;;  %v637_v41 = vrot.slane %v635_v38, 7  ;;  %v632_v45 = vor.u32 %v630_v40, %v629_v39  ;;  %v633_v46 = vrot.slane %v629_v39, 4  ;;  %v6266_v54 = vld [vmem:[#allocation2 + $0x3c] sm:$0xf0] }
  0x97   : > { %v737_v25 = vsel %vm6715_vm7, %v472_v18, %v736_v19  ;;  %v1506_v28 = vpack.c.b16 %v1490_v14, %v1490_v14  ;;  %v733_v29 = vsel %vm6503_vm6, %v462_v20, %v732_v24  ;;  %v348_v57 = vld [vmem:[%s6480_s29 + $0x30] sm:$0xf]  ;;  %v1340_v58 = vld [vmem:[#allocation2 + $0xbc] sm:$0x1]  ;;  %v482_v60 = vshrl.u32 %v349_v56, 16  ;;  %v6875_v37 = vld [vmem:[%s8237_s1] sm:$0xff] }
  0x98   : > { %2228 = vrot.lane.b32.xlu2 %v6377_v27, %s6417_s8  ;;  %v6263_v27 = vld [vmem:[#allocation2 + $0x3c] sm:$0xf0]  ;;  %738 = vst [vmem:[#allocation2 + $0x50] sm:$0x1] %v737_v25  ;;  %v1324_v59 = vld [vmem:[#allocation2 + $0xb0] sm:$0x1]  ;;  %v1500_v3 = vunpack.c.l.b16 %v1340_v58  ;;  %v6857_v25 = vpop.permute.xlu2 %2304 }
  0x99   : > { %v900_v30 = vld [vmem:[#allocation2 + $0xb4] sm:$0xff]   ;;  %734 = vst [vmem:[#allocation2 + $0x48] sm:$0xf] %v733_v29  ;;  %v6265_v55 = vor.u32 %v6264_v44, %v6263_v27  ;;  %v474_v61 = vshrl.u32 %v348_v57, 16  ;;  %v484_v62 = vrot.slane %v482_v60, 7  ;;  %v477_v1 = vshll.u32 %v348_v57, 16 }
  0x9a   : > { %v6820_v31 = vld [vmem:[#allocation2 + $0xb4] sm:$0xf0]  ;;  %v485_v2 = vshll.u32 %v349_v56, 16  ;;  %v743_v8 = vld [vmem:[#allocation2 + $0x5c] sm:$0x1]  ;;  %v1516_v15 = vpack.c.b16 %v1500_v3, %v1500_v3  ;;  %v642_v18 = vrot.slane %v637_v41, 4 }
  0x9b   : > { %1070 = vrot.lane.b32.xlu0 %v845_v13, %s6417_s8  ;;  %v1499_v13 = vunpack.c.l.b16 %v1339_v5  ;;  %v476_v63 = vrot.slane %v474_v61, 7  ;;  %v1420_v5 = vunpack.c.l.b16 %v1324_v59  ;;  %v739_v12 = vld [vmem:[#allocation2 + $0x54] sm:$0xf]  ;;  %v6267_v16 = vld [vmem:[#allocation2 + $0x3c] sm:$0xe] }
  0x9c   : > { %v487_v11 = vor.u32 %v485_v2, %v484_v62  ;;  %v1315_v19 = vld [vmem:[#allocation2 + $0x44] sm:$0x1]  ;;  %v806_v20 = vld [vmem:[#allocation2 + $0xc8] sm:$0x1]  ;;  %v350_v57 = vld [vmem:[%s6480_s29 + $0x38] sm:$0xf] }
  0x9d   : > { %v1515_v22 = vpack.c.b16 %v1499_v13, %v1499_v13  ;;  %v479_v0 = vor.u32 %v477_v1, %v476_v63  ;;  %v480_v9 = vrot.slane %v476_v63, 4  ;;  %v807_v24 = vsel %vm6715_vm7, %v642_v18, %v806_v20  ;;  %v1294_v27 = vld [vmem:[%s8237_s1 + $0x8] sm:$0xf]  ;;  %v351_v58 = vld [vmem:[%s6480_s29 + $0x3c] sm:$0xf] }
  0x9e   : > { %1443 = vrot.lane.b32.xlu1 %v1425_v32, %s6417_s8  ;;  %v471_v32 = vsel %vm6493_vm5, %v463_v21, %v470_v23  ;;  %v6852_v23 = vld [vmem:[#allocation2 + $0xb4] sm:$0xf0]  ;;  %808 = vst [vmem:[#allocation2 + $0xc8] sm:$0x1] %v807_v24  ;;  %v491_v61 = vshrl.u32 %v350_v57, 16 }
  0x9f   : > { %735 = vst.msk [vmem:[#allocation2 + $0x4c] sm:$0xf] %vm280_vm0, %v471_v32  ;;  %v740_v14 = vsel %vm6503_vm6, %v479_v0, %v739_v12  ;;  %v488_v17 = vsel %vm6493_vm5, %v480_v9, %v487_v11  ;;  %v1331_v33 = vld [vmem:[#allocation2 + $0x50] sm:$0x1]  ;;  %v6902_v1 = vld [vmem:[%s8237_s1 + $0x18] sm:$0xff]  ;;  %v494_v9 = vshll.u32 %v350_v57, 16 }
  0xa0   : > { %2308 = vrot.lane.b32.xlu2 %v6126_v35, %s6416_s30  ;;  %v6100_v35 = vld [vmem:[#allocation2 + $0x30] sm:$0xf0]  ;;  %741 = vst [vmem:[#allocation2 + $0x54] sm:$0xf] %v740_v14  ;;  %v6128_v39 = vld [vmem:[#allocation2 + $0x48] sm:$0xe]  ;;  %v6877_v40 = vpop.permute.xlu2 %2226 }
  0xa1   : > { %v6102_v43 = vor.u32 %v6101_v36, %v6100_v35  ;;  %742 = vst.msk [vmem:[#allocation2 + $0x58] sm:$0xf] %vm280_vm0, %v488_v17  ;;  %v1491_v36 = vunpack.c.l.b16 %v1331_v33  ;;  %v6104_v60 = vld [vmem:[#allocation2 + $0x48] sm:$0xe]  ;;  %v502_v12 = vshll.u32 %v351_v58, 16 }
  0xa2   : > { %v6073_v57 = vld [vmem:[#allocation2] sm:$0xf0] }
  0xa3   : > { %1182 = vrot.lane.b32.xlu0 %v6066_v50, %s6416_s30  ;;  %v1507_v44 = vpack.c.b16 %v1491_v36, %v1491_v36 }
  0xa5   : > { %v1341_v35 = vld [vmem:[#allocation2 + $0xc8] sm:$0x1] }
  0xa6   : > { %1523 = vrot.lane.b32.xlu1 %v1505_v47, %s6416_s30  ;;  %v640_v47 = vor.u32 %v638_v42, %v637_v41  ;;  %v6850_v21 = vld [vmem:[#allocation2 + $0x48] sm:$0xff]   ;;  %v1501_v41 = vunpack.c.l.b16 %v1341_v35  ;;  %v5666_v42 = vld [vmem:[%s8237_s1 + $0x20] sm:$0xf] }
  0xa7   : > { %v6127_v38 = vld [vmem:[#allocation2 + $0x48] sm:$0xf0]  ;;  %v6379_v14 = vld [vmem:[#allocation2 + $0x54] sm:$0xe]  ;;  %v1326_v36 = vld [vmem:[#allocation2 + $0xc8] sm:$0x1] }
  0xa8   : > { %1463 = vrot.lane.b32.xlu2 %v1435_v53, %s6417_s8  ;;  %v850_v53 = vld [vmem:[#allocation2 + $0x3c] sm:$0xff]   ;;  %v6103_v56 = vld [vmem:[#allocation2 + $0x48] sm:$0xf0]  ;;  %v884_v18 = vld [vmem:[#allocation2 + $0x54] sm:$0xff]  }
  0xa9   : > { %v6105_v0 = vor.u32 %v6104_v60, %v6103_v56  ;;  %v358_v56 = vld [vmem:[%s6480_s29 + $0x58] sm:$0xf] }
  0xab   : > { %1090 = vrot.lane.b32.xlu0 %v865_v51, %s6417_s8  ;;  %v803_v51 = vsel %vm6503_vm6, %v632_v45, %v802_v48  ;;  %v2506_v45 = vunpack.c.l.b16 %v5666_v42  ;;  %v5623_v48 = vld [vmem:[%s8237_s1 + $0x14] sm:$0xf] }
  0xac   : > { %804 = vst [vmem:[#allocation2 + $0xc0] sm:$0xf] %v803_v51  ;;  %v1801_v51 = vunpack.c.l.b16 %v5623_v48 }
  0xae   : > { %1202 = vrot.lane.b32.xlu1 %v6808_v4, %s6416_s30 }
  0xb0   : > { %1445 = vrot.lane.b32.xlu2 %v1426_v6, %s6417_s8  ;;  %v489_v6 = vrot.slane %v484_v62, 4  ;;  %v499_v62 = vshrl.u32 %v351_v58, 16  ;;  %v904_v58 = vld [vmem:[#allocation2 + $0xcc] sm:$0xff]  }
  0xb2   : > { %v744_v13 = vsel %vm6715_vm7, %v489_v6, %v743_v8  ;;  %v1316_v6 = vld [vmem:[#allocation2 + $0x50] sm:$0x1]  ;;  %v6910_v11 = vrot.slane %v499_v62, 7  ;;  %v559_v62 = vshrl.u32 %v358_v56, 16 }
  0xb3   : > { %1543 = vrot.lane.b32.xlu0 %v1515_v22, %s6416_s30  ;;  %745 = vst [vmem:[#allocation2 + $0x5c] sm:$0x1] %v744_v13  ;;  %v869_v22 = vld [vmem:[#allocation2 + $0xb4] sm:$0xff]   ;;  %v5838_v8 = vld [vmem:[%s8237_s1 + $0xc] sm:$0xff]  ;;  %v1412_v17 = vunpack.c.l.b16 %v1316_v6  ;;  %v1295_v6 = vld [vmem:[#allocation2 + $0x8] sm:$0x1] }
  0xb6   : > { %1072 = vrot.lane.b32.xlu1 %v6066_v50, %s6417_s8  ;;  %v641_v50 = vsel %vm6493_vm5, %v633_v46, %v640_v47  ;;  %v1325_v46 = vld [vmem:[#allocation2 + $0xbc] sm:$0x1]  ;;  %v1517_v47 = vpack.c.b16 %v1501_v41, %v1501_v41 }
  0xb7   : > { %805 = vst.msk [vmem:[#allocation2 + $0xc4] sm:$0xf] %vm280_vm0, %v641_v50  ;;  %v2508_v50 = vpack.c.b16 %v2506_v45, %v2506_v45 }
  0xb8   : > { %1525 = vrot.lane.b32.xlu2 %v1506_v28, %s6416_s30  ;;  %v1952_v28 = vunpack.c.l.b16 %v1294_v27 }
  0xba   : > { %v1954_v29 = vpack.c.b16 %v1952_v28, %v1952_v28  ;;  %v1332_v27 = vld [vmem:[#allocation2 + $0x5c] sm:$0x1] }
  0xbb   : > { %2230 = vrot.lane.b32.xlu0 %v6102_v43, %s6417_s8  ;;  %v6129_v43 = vor.u32 %v6128_v39, %v6127_v38  ;;  %v1492_v35 = vunpack.c.l.b16 %v1332_v27  ;;  %v6933_v38 = vpop.permute.xlu0 %1068  ;;  %v1422_v39 = vunpack.c.l.b16 %v1326_v36 }
  0xbc   : > { %v6867_v34 = vsel %vm1854_vm8, %v1954_v29, 0  ;;  %v352_v29 = vld [vmem:[%s6480_s29 + $0x40] sm:$0xf] }
  0xbd   : > { %1997 = vmatpush.bf16.msra.mxu1 %v6867_v34  ;;  %v511_v42 = vshll.u32 %v352_v29, 16 }
  0xbe   : > { %1184 = vrot.lane.b32.xlu1 %v880_v26, %s6416_s30  ;;  %v1411_v26 = vunpack.c.l.b16 %v1315_v19  ;;  %v6904_v3 = vld [vmem:[#allocation2 + $0xc0] sm:$0xff]   ;;  %v6378_v19 = vld [vmem:[#allocation2 + $0x54] sm:$0xf0] }
  0xbf   : > { %v6380_v28 = vor.u32 %v6379_v14, %v6378_v19  ;;  %v778_v14 = vld [vmem:[#allocation2 + $0x98] sm:$0x1] }
  0xc0   : > { %1204 = vrot.lane.b32.xlu2 %v900_v30, %s6416_s30  ;;  %v6268_v30 = vor.u32 %v6267_v16, %v6266_v54  ;;  %v1427_v32 = vpack.c.b16 %v1411_v26, %v1411_v26  ;;  %v6890_v54 = vsel %vm1854_vm8, %v2508_v50, 0  ;;  %v746_v16 = vld [vmem:[#allocation2 + $0x60] sm:$0xf]  ;;  %v1428_v26 = vpack.c.b16 %v1412_v17, %v1412_v17  ;;  %v753_v50 = vld [vmem:[#allocation2 + $0x6c] sm:$0xf] }
  0xc1   : > { %1998 = vmatpush.bf16.msra.mxu1 %v6875_v37  ;;  %2567 = vmatpush.bf16.msra.mxu2 %v6890_v54 }
  0xc3   : > { %2310 = vrot.lane.b32.xlu0 %v6265_v55, %s6416_s30  ;;  %v1803_v55 = vpack.c.b16 %v1801_v51, %v1801_v51  ;;  %v1508_v51 = vpack.c.b16 %v1492_v35, %v1492_v35  ;;  %v1342_v35 = vld [vmem:[#allocation2 + $0xd4] sm:$0x1] }
  0xc5   : > { %v1856_v59 = vsel %vm1854_vm8, %v1803_v55, 0  ;;  %2568 = vmatpush.bf16.msra.mxu2 %v6902_v1 }
  0xc6   : > { %1092 = vrot.lane.b32.xlu1 %v6808_v4, %s6417_s8  ;;  %v1436_v4 = vpack.c.b16 %v1420_v5, %v1420_v5  ;;  %1864 = vmatpush.bf16.msra.mxu0 %v1856_v59  ;;  %v493_v5 = vrot.slane %v491_v61, 7 }
  0xc7   : > { %6239 = vmatpush.bf16.msra.mxu3 %v1856_v59  ;;  %v6945_v59 = vld [vmem:[#allocation2 + $0xcc] sm:$0xf0] }
  0xc8   : > { %1074 = vrot.lane.b32.xlu2 %v850_v53, %s6417_s8  ;;  %v1421_v53 = vunpack.c.l.b16 %v1325_v46  ;;  %v497_v13 = vrot.slane %v493_v5, 4 }
  0xca   : > { %v1437_v2 = vpack.c.b16 %v1421_v53, %v1421_v53  ;;  %1865 = vmatpush.bf16.msra.mxu0 %v5838_v8  ;;  %v1438_v53 = vpack.c.b16 %v1422_v39, %v1422_v39 }
  0xcb   : > { %1465 = vrot.lane.b32.xlu0 %v1436_v4, %s6417_s8  ;;  %v504_v4 = vor.u32 %v502_v12, %v6910_v11  ;;  %6240 = vmatpush.bf16.msra.mxu3 %v5838_v8  ;;  %v1317_v8 = vld [vmem:[#allocation2 + $0x5c] sm:$0x1]  ;;  %v562_v12 = vshll.u32 %v358_v56, 16 }
  0xcd   : > { %v505_v20 = vsel %vm6493_vm5, %v497_v13, %v504_v4  ;;  %v5860_v13 = vld [vmem:[#allocation2] sm:$0xff]  }
  0xce   : > { %1545 = vrot.lane.b32.xlu1 %v1516_v15, %s6416_s30  ;;  %v496_v15 = vor.u32 %v494_v9, %v493_v5  ;;  %749 = vst.msk [vmem:[#allocation2 + $0x64] sm:$0xf] %vm280_vm0, %v505_v20  ;;  %v6074_v5 = vld [vmem:[#allocation2] sm:$0xe]  ;;  %v561_v9 = vrot.slane %v559_v62, 7 }
  0xcf   : > { %6241 = vmatpush.bf16.msrb.mxu3 %v6867_v34  ;;  %v6931_v34 = vpop.permute.xlu1 %1178 }
  0xd0   : > { %1186 = vrot.lane.b32.xlu2 %v6850_v21, %s6416_s30  ;;  %v564_v17 = vor.u32 %v562_v12, %v561_v9  ;;  %v565_v19 = vrot.slane %v561_v9, 4 }
  0xd3   : > { %1447 = vrot.lane.b32.xlu0 %v1427_v32, %s6417_s8  ;;  %6242 = vmatpush.bf16.msrb.mxu3 %v6875_v37  ;;  %v508_v32 = vshrl.u32 %v352_v29, 16 }
  0xd5   : > { %v510_v41 = vrot.slane %v508_v32, 7  ;;  %v853_v32 = vld [vmem:[#allocation2 + $0x54] sm:$0xff]  }
  0xd6   : > { %2232 = vrot.lane.b32.xlu1 %v6268_v30, %s6417_s8  ;;  %v353_v30 = vld [vmem:[%s6480_s29 + $0x44] sm:$0xf] }
  0xd7   : > { %v516_v33 = vshrl.u32 %v353_v30, 16  ;;  %v519_v37 = vshll.u32 %v353_v30, 16  ;;  %v513_v45 = vor.u32 %v511_v42, %v510_v41  ;;  %v514_v46 = vrot.slane %v510_v41, 4 }
  0xd8   : > { %1094 = vrot.lane.b32.xlu2 %v869_v22, %s6417_s8  ;;  %v747_v22 = vsel %vm6503_vm6, %v496_v15, %v746_v16  ;;  %v1413_v15 = vunpack.c.l.b16 %v1317_v8  ;;  %v750_v16 = vld [vmem:[#allocation2 + $0x68] sm:$0x1]  ;;  %v1359_v30 = vunpack.c.l.b16 %v1295_v6 }
  0xd9   : > { %748 = vst [vmem:[#allocation2 + $0x60] sm:$0xf] %v747_v22  ;;  %v754_v55 = vsel %vm6503_vm6, %v513_v45, %v753_v50  ;;  %v6075_v22 = vor.u32 %v6074_v5, %v6073_v57  ;;  %v6970_v45 = vld [vmem:[#allocation2 + $0xc] sm:$0xf0] }
  0xda   : > { %755 = vst [vmem:[#allocation2 + $0x6c] sm:$0xf] %v754_v55  ;;  %v1375_v50 = vpack.c.b16 %v1359_v30, %v1359_v30 }
  0xdb   : > { %1527 = vrot.lane.b32.xlu0 %v1507_v44, %s6416_s30  ;;  %v359_v44 = vld [vmem:[%s6480_s29 + $0x5c] sm:$0xf] }
  0xdc   : > { %v567_v48 = vshrl.u32 %v359_v44, 16  ;;  %v570_v4 = vshll.u32 %v359_v44, 16  ;;  %v812_v44 = vld [vmem:[#allocation2 + $0xc] sm:$0xff]  }
  0xde   : > { %2312 = vrot.lane.b32.xlu1 %v6129_v43, %s6416_s30  ;;  %v6935_v43 = vrot.slane %v516_v33, 7  ;;  %v569_v60 = vrot.slane %v567_v48, 7  ;;  %v6959_v33 = vld [vmem:[#allocation2 + $0x54] sm:$0xf0]  ;;  %v1502_v48 = vunpack.c.l.b16 %v1342_v35 }
  0xe0   : > { %1547 = vrot.lane.b32.xlu2 %v1517_v47, %s6416_s30  ;;  %v1518_v57 = vpack.c.b16 %v1502_v48, %v1502_v48 }
  0xe2   : > { %v6897_v63 = vpop.permute.xlu2 %1519 }
  0xe3   : > { %1206 = vrot.lane.b32.xlu0 %v6904_v3, %s6416_s30 }
  0xe6   : > { %1467 = vrot.lane.b32.xlu1 %v1437_v2, %s6417_s8  ;;  %v506_v2 = vrot.slane %v6910_v11, 4 }
  0xe8   : > { %2234 = vrot.lane.b32.xlu2 %v6105_v0, %s6417_s8  ;;  %v574_v0 = vrot.slane %v569_v60, 4  ;;  %v751_v20 = vsel %vm6715_vm7, %v506_v2, %v750_v16  ;;  %v1296_v2 = vld [vmem:[#allocation2 + $0x14] sm:$0x1] }
  0xe9   : > { %752 = vst [vmem:[#allocation2 + $0x68] sm:$0x1] %v751_v20 }
  0xea   : > { %v6922_v24 = vpop.permute.xlu2 %2306  ;;  %v779_v11 = vsel %vm6715_vm7, %v574_v0, %v778_v14 }
  0xeb   : > { %1076 = vrot.lane.b32.xlu0 %v6850_v21, %s6417_s8  ;;  %v521_v21 = vor.u32 %v519_v37, %v6935_v43  ;;  %780 = vst [vmem:[#allocation2 + $0x98] sm:$0x1] %v779_v11  ;;  %v1429_v37 = vpack.c.b16 %v1413_v15, %v1413_v15  ;;  %v1360_v11 = vunpack.c.l.b16 %v1296_v2 }
  0xed   : > { %v522_v61 = vsel %vm6493_vm5, %v514_v46, %v521_v21  ;;  %v1376_v48 = vpack.c.b16 %v1360_v11, %v1360_v11 }
  0xee   : > { %1449 = vrot.lane.b32.xlu1 %v1428_v26, %s6417_s8  ;;  %756 = vst.msk [vmem:[#allocation2 + $0x70] sm:$0xf] %vm280_vm0, %v522_v61 }
  0xf0   : > { %2314 = vrot.lane.b32.xlu2 %v6380_v28, %s6416_s30  ;;  %v774_v28 = vld [vmem:[#allocation2 + $0x90] sm:$0xf] }
  0xf1   : > { %v775_v39 = vsel %vm6503_vm6, %v564_v17, %v774_v28  ;;  %v760_v28 = vld [vmem:[#allocation2 + $0x78] sm:$0xf] }
  0xf2   : > { %v6939_v47 = vpop.permute.xlu2 %2228  ;;  %776 = vst [vmem:[#allocation2 + $0x90] sm:$0xf] %v775_v39 }
  0xf3   : > { %1188 = vrot.lane.b32.xlu0 %v884_v18, %s6416_s30  ;;  %v572_v18 = vor.u32 %v570_v4, %v569_v60  ;;  %v1333_v60 = vld [vmem:[#allocation2 + $0x68] sm:$0x1]  ;;  %v6273_v4 = vld [vmem:[#allocation2 + $0x54] sm:$0xe] }
  0xf5   : > { %v1067_v27 = vpop.permute.xlu0 %1066  ;;  %v573_v42 = vsel %vm6493_vm5, %v565_v19, %v572_v18 }
  0xf6   : > { %1529 = vrot.lane.b32.xlu1 %v1508_v51, %s6416_s30  ;;  %v1213_v29 = vsel %vm1210_vm10, %v5860_v13, %v1067_v27  ;;  %777 = vst.msk [vmem:[#allocation2 + $0x94] sm:$0xf] %vm280_vm0, %v573_v42  ;;  %v354_v51 = vld [vmem:[%s6480_s29 + $0x48] sm:$0xf] }
  0xf7   : > { %v1261_v41 = vsel %vm1259_vm9, %v1213_v29, %v6931_v34  ;;  %v525_v61 = vshrl.u32 %v354_v51, 16  ;;  %v528_v12 = vshll.u32 %v354_v51, 16  ;;  %v757_v29 = vld [vmem:[#allocation2 + $0x74] sm:$0x1]  ;;  %v6274_v51 = vor.u32 %v6273_v4, %v6959_v33 }
  0xf8   : > { %1469 = vrot.lane.b32.xlu2 %v1438_v53, %s6417_s8  ;;  %v2225_v26 = vpop.permute.xlu1 %2224  ;;  %5648 = vmatmul.msk.bf16.vlgmr.msra.gmra.mxu1 %vm1805_vm11, %v1261_v41  ;;  %v1634_v21 = vshll.u32 %v1261_v41, 16  ;;  %v355_v53 = vld [vmem:[%s6480_s29 + $0x4c] sm:$0xf]  ;;  %v1632_v13 = vshrl.u32 %v1261_v41, 16  ;;  %v523_v41 = vrot.slane %v6935_v43, 4 }
  0xf9   : > { %v2338_v46 = vsel %vm1210_vm10, %v6075_v22, %v2225_v26  ;;  %v533_v6 = vshrl.u32 %v355_v53, 16  ;;  %v527_v9 = vrot.slane %v525_v61, 7  ;;  %v1318_v26 = vld [vmem:[#allocation2 + $0x68] sm:$0x1]  ;;  %v536_v18 = vshll.u32 %v355_v53, 16 }
  0xfa   : > { %v6961_v36 = vpop.permute.xlu2 %2308  ;;  %v2385_v34 = vsel %vm1259_vm9, %v2338_v46, %v6857_v25  ;;  %v1636_v62 = vrot.slane %v1634_v21, 1  ;;  %v6270_v25 = vld [vmem:[#allocation2 + $0xc] sm:$0xe]  ;;  %v1414_v35 = vunpack.c.l.b16 %v1318_v26  ;;  %v758_v43 = vsel %vm6715_vm7, %v523_v41, %v757_v29  ;;  %v7034_v29 = vld [vmem:[#allocation2 + $0x6c] sm:$0xf0] }
  0xfb   : > { %1096 = vrot.lane.b32.xlu0 %v6904_v3, %s6417_s8  ;;  %v1493_v3 = vunpack.c.l.b16 %v1333_v60  ;;  %v2449_v0 = vrot.slane %v2385_v34, 1  ;;  %v530_v17 = vor.u32 %v528_v12, %v527_v9  ;;  %v6990_v27 = vrot.slane %v533_v6, 7  ;;  %759 = vst [vmem:[#allocation2 + $0x74] sm:$0x1] %v758_v43  ;;  %v357_v60 = vld [vmem:[%s6480_s29 + $0x54] sm:$0xf] }
  0xfc   : > { %v1637_v19 = vor.u32 %v1636_v62, %v1632_v13  ;;  %v6271_v34 = vor.u32 %v6270_v25, %v6970_v45  ;;  %v1430_v53 = vpack.c.b16 %v1414_v35, %v1414_v35  ;;  %v550_v45 = vshrl.u32 %v357_v60, 16 }
  0xfd   : > { %v1440_v56 = vpop.permute.xlu0 %1439  ;;  %v1509_v16 = vpack.c.b16 %v1493_v3, %v1493_v3  ;;  %v761_v39 = vsel %vm6503_vm6, %v530_v17, %v760_v28  ;;  %v538_v46 = vor.u32 %v536_v18, %v6990_v27  ;;  %v767_v17 = vld [vmem:[#allocation2 + $0x84] sm:$0xf]  ;;  %v888_v28 = vld [vmem:[#allocation2 + $0x6c] sm:$0xff]  }
  0xfe   : > { %1208 = vrot.lane.b32.xlu1 %v904_v58, %s6416_s30  ;;  %v1553_v58 = vsel %vm1210_vm10, %v1375_v50, %v1440_v56  ;;  %762 = vst [vmem:[#allocation2 + $0x78] sm:$0xf] %v761_v39  ;;  %v2341_v2 = vsel %vm1210_vm10, %v6271_v34, %v6877_v40  ;;  %v764_v34 = vld [vmem:[#allocation2 + $0x80] sm:$0x1] }
  0xff   : > { %v1600_v8 = vsel %vm1259_vm9, %v1553_v58, %v6897_v63  ;;  %v531_v63 = vrot.slane %v527_v9, 4  ;;  %v6130_v58 = vld [vmem:[#allocation2 + $0x60] sm:$0xf0] }
 0x100   : > { %1451 = vrot.lane.b32.xlu2 %v1429_v37, %s6417_s8  ;;  %v6982_v55 = vpop.permute.xlu1 %1441  ;;  %v1638_v14 = vshll.u32 %v1600_v8, 16  ;;  %v2450_v15 = vrot.slane %v1600_v8, 1  ;;  %v7025_v8 = vrot.slane %v550_v45, 7 }
 0x101   : > { %v539_v56 = vsel %vm6493_vm5, %v531_v63, %v538_v46  ;;  %v1556_v62 = vsel %vm1210_vm10, %v1376_v48, %v6982_v55  ;;  %v553_v55 = vshll.u32 %v357_v60, 16  ;;  %v540_v46 = vrot.slane %v6990_v27, 4  ;;  %v6076_v48 = vld [vmem:[#allocation2 + $0x18] sm:$0xf0] }
 0x102   : > { %v6985_v5 = vpop.permute.xlu2 %1463  ;;  %v1640_v20 = vrot.slane %v1638_v14, 1  ;;  %v2451_v22 = vsel %vm2448_vm12, %v2449_v0, %v2450_v15  ;;  %763 = vst.msk [vmem:[#allocation2 + $0x7c] sm:$0xf] %vm280_vm0, %v539_v56  ;;  %v6131_v0 = vld [vmem:[#allocation2 + $0x60] sm:$0xe]  ;;  %v2387_v14 = vsel %vm1259_vm9, %v2341_v2, %v6922_v24 }
 0x103   : > { %1549 = vrot.lane.b32.xlu0 %v1518_v57, %s6416_s30  ;;  %5671 = vmatmul.msk.bf16.vlgmr.msra.gmra.mxu2 %vm1805_vm11, %v2451_v22  ;;  %v356_v57 = vld [vmem:[%s6480_s29 + $0x50] sm:$0xf]  ;;  %v555_v11 = vor.u32 %v553_v55, %v7025_v8  ;;  %v6132_v22 = vor.u32 %v6131_v0, %v6130_v58  ;;  %v1334_v26 = vld [vmem:[#allocation2 + $0x74] sm:$0x1]  ;;  %v2452_v35 = vrot.slane %v2387_v14, 1  ;;  %v765_v27 = vsel %vm6715_vm7, %v540_v46, %v764_v34 }
 0x104   : > { %v1641_v30 = vsel %vm1631_vm13, %v1637_v19, %v1640_v20  ;;  %v542_v61 = vshrl.u32 %v356_v57, 16  ;;  %v545_v6 = vshll.u32 %v356_v57, 16  ;;  %v1297_v20 = vld [vmem:[#allocation2 + $0x20] sm:$0x1]  ;;  %766 = vst [vmem:[#allocation2 + $0x80] sm:$0x1] %v765_v27 }
 0x105   : > { %5628 = vmatmul.msk.bf16.vlgmr.msra.gmra.mxu0 %vm1805_vm11, %v1641_v30  ;;  %v1181_v37 = vpop.permute.xlu0 %1180  ;;  %v1494_v30 = vunpack.c.l.b16 %v1334_v26  ;;  %v1361_v41 = vunpack.c.l.b16 %v1297_v20  ;;  %v7062_v14 = vld [vmem:[#allocation2 + $0x90] sm:$0xff]   ;;  %v557_v46 = vrot.slane %v7025_v8, 4  ;;  %v7077_v34 = vld [vmem:[#allocation2 + $0x24] sm:$0xf0] }
 0x106   : > { %1078 = vrot.lane.b32.xlu1 %v853_v32, %s6417_s8  ;;  %v1216_v32 = vsel %vm1210_vm10, %v812_v44, %v6933_v38  ;;  %v6068_v44 = vld [vmem:[#allocation2 + $0x60] sm:$0xff]   ;;  %v544_v3 = vrot.slane %v542_v61, 7 }
 0x107   : > { %v1263_v21 = vsel %vm1259_vm9, %v1216_v32, %v1181_v37  ;;  %v6051_v32 = vld [vmem:[#allocation2 + $0x18] sm:$0xff]   ;;  %v1319_v37 = vld [vmem:[#allocation2 + $0x74] sm:$0x1] }
 0x108   : > { %1531 = vrot.lane.b32.xlu2 %v1509_v16, %s6416_s30  ;;  %v1522_v42 = vpop.permute.xlu1 %1521  ;;  %v1644_v38 = vshll.u32 %v1263_v21, 16  ;;  %5649 = vmatmul.msk.bf16.gmra.mxu1 %vm1805_vm11, %v1263_v21  ;;  %v547_v13 = vor.u32 %v545_v6, %v544_v3  ;;  %v548_v40 = vrot.slane %v544_v3, 4  ;;  %v1642_v4 = vshrl.u32 %v1263_v21, 16  ;;  %v6077_v21 = vld [vmem:[#allocation2 + $0x18] sm:$0xe]  ;;  %v857_v3 = vld [vmem:[#allocation2 + $0x6c] sm:$0xff]  }
 0x109   : > { %v1602_v33 = vsel %vm1259_vm9, %v1556_v62, %v1522_v42  ;;  %v1510_v42 = vpack.c.b16 %v1494_v30, %v1494_v30  ;;  %v1415_v56 = vunpack.c.l.b16 %v1319_v37  ;;  %v6078_v61 = vor.u32 %v6077_v21, %v6076_v48  ;;  %v7054_v6 = vld [vmem:[#allocation2 + $0x6c] sm:$0xf0]  ;;  %v771_v48 = vld [vmem:[#allocation2 + $0x8c] sm:$0x1] }
 0x10a   : > { %v7005_v50 = vpop.permute.xlu2 %1445  ;;  %v1646_v25 = vrot.slane %v1644_v38, 1  ;;  %v1648_v15 = vshll.u32 %v1602_v33, 16  ;;  %v2453_v19 = vrot.slane %v1602_v33, 1  ;;  %v768_v63 = vsel %vm6503_vm6, %v547_v13, %v767_v17  ;;  %v1307_v13 = vld [vmem:[#allocation2 + $0x98] sm:$0x1] }
 0x10b   : > { %2236 = vrot.lane.b32.xlu0 %v6274_v51, %s6417_s8  ;;  %v556_v24 = vsel %vm6493_vm5, %v548_v40, %v555_v11  ;;  %769 = vst [vmem:[#allocation2 + $0x84] sm:$0xf] %v768_v63  ;;  %v6106_v51 = vld [vmem:[#allocation2 + $0x60] sm:$0xf0]  ;;  %v1377_v62 = vpack.c.b16 %v1361_v41, %v1361_v41  ;;  %v1431_v0 = vpack.c.b16 %v1415_v56, %v1415_v56  ;;  %v1371_v11 = vunpack.c.l.b16 %v1307_v13  ;;  %v1298_v17 = vld [vmem:[#allocation2 + $0x2c] sm:$0x1] }
 0x10c   : > { %v1647_v18 = vor.u32 %v1646_v25, %v1642_v4  ;;  %770 = vst.msk [vmem:[#allocation2 + $0x88] sm:$0xf] %vm280_vm0, %v556_v24  ;;  %v1650_v39 = vrot.slane %v1648_v15, 1  ;;  %v2454_v43 = vsel %vm2448_vm12, %v2452_v35, %v2453_v19  ;;  %v6276_v25 = vld [vmem:[#allocation2 + $0x6c] sm:$0xe]  ;;  %v2344_v55 = vsel %vm1210_vm10, %v6078_v61, %v6939_v47 }
 0x10d   : > { %v1071_v12 = vpop.permute.xlu0 %1070  ;;  %v1335_v4 = vld [vmem:[#allocation2 + $0x80] sm:$0x1]  ;;  %v6277_v24 = vor.u32 %v6276_v25, %v7034_v29  ;;  %v6279_v41 = vld [vmem:[#allocation2 + $0x6c] sm:$0xe]  ;;  %v1387_v37 = vpack.c.b16 %v1371_v11, %v1371_v11  ;;  %v6133_v11 = vld [vmem:[#allocation2 + $0x78] sm:$0xf0] }
 0x10e   : > { %1190 = vrot.lane.b32.xlu1 %v6068_v44, %s6416_s30  ;;  %v1651_v38 = vsel %vm1631_vm13, %v1647_v18, %v1650_v39  ;;  %v1219_v57 = vsel %vm1210_vm10, %v6051_v32, %v1071_v12  ;;  %v1495_v47 = vunpack.c.l.b16 %v1335_v4  ;;  %v1362_v39 = vunpack.c.l.b16 %v1298_v17 }
 0x10f   : > { %v1589_v27 = vsel %vm1210_vm10, %v1387_v37, %v6985_v5 }
 0x110   : > { %1453 = vrot.lane.b32.xlu2 %v1430_v53, %s6417_s8  ;;  %v1444_v9 = vpop.permute.xlu1 %1443  ;;  %v6107_v53 = vld [vmem:[#allocation2 + $0x60] sm:$0xe]  ;;  %v1511_v32 = vpack.c.b16 %v1495_v47, %v1495_v47 }
 0x111   : > { %v6108_v33 = vor.u32 %v6107_v53, %v6106_v51  ;;  %v1559_v12 = vsel %vm1210_vm10, %v1377_v62, %v1444_v9  ;;  %v2389_v9 = vsel %vm1259_vm9, %v2344_v55, %v6961_v36  ;;  %v772_v51 = vsel %vm6715_vm7, %v557_v46, %v771_v48  ;;  %v6109_v46 = vld [vmem:[#allocation2 + $0x78] sm:$0xf0]  ;;  %v6110_v48 = vld [vmem:[#allocation2 + $0x78] sm:$0xe] }
 0x112   : > { %v7029_v16 = vpop.permute.xlu2 %1525  ;;  %v1378_v53 = vpack.c.b16 %v1362_v39, %v1362_v39  ;;  %773 = vst [vmem:[#allocation2 + $0x8c] sm:$0x1] %v772_v51  ;;  %v6052_v51 = vld [vmem:[#allocation2 + $0x30] sm:$0xff]  }
 0x113   : > { %2316 = vrot.lane.b32.xlu0 %v6132_v22, %s6416_s30  ;;  %5672 = vmatmul.msk.bf16.gmra.mxu2 %vm1805_vm11, %v2454_v43  ;;  %v815_v43 = vld [vmem:[#allocation2 + $0x24] sm:$0xff]  }
 0x114   : > { %v1562_v5 = vsel %vm1210_vm10, %v1378_v53, %v7005_v50  ;;  %v6134_v50 = vld [vmem:[#allocation2 + $0x78] sm:$0xe] }
 0x115   : > { %v1183_v60 = vpop.permute.xlu0 %1182  ;;  %5629 = vmatmul.msk.bf16.gmra.mxu0 %vm1805_vm11, %v1651_v38  ;;  %v1320_v38 = vld [vmem:[#allocation2 + $0x80] sm:$0x1] }
 0x116   : > { %1080 = vrot.lane.b32.xlu1 %v6068_v44, %s6417_s8  ;;  %v1265_v45 = vsel %vm1259_vm9, %v1219_v57, %v1183_v60  ;;  %v1416_v56 = vunpack.c.l.b16 %v1320_v38 }
 0x117   : > { %v1654_v58 = vshll.u32 %v1265_v45, 16  ;;  %v1652_v26 = vshrl.u32 %v1265_v45, 16 }
 0x118   : > { %1533 = vrot.lane.b32.xlu2 %v1510_v42, %s6416_s30  ;;  %v1524_v44 = vpop.permute.xlu1 %1523  ;;  %5650 = vmatmul.msk.bf16.gmra.mxu1 %vm1805_vm11, %v1265_v45  ;;  %v2455_v42 = vrot.slane %v2389_v9, 1  ;;  %v1432_v25 = vpack.c.b16 %v1416_v56, %v1416_v56 }
 0x119   : > { %v1604_v40 = vsel %vm1259_vm9, %v1559_v12, %v1524_v44  ;;  %v1656_v15 = vrot.slane %v1654_v58, 1  ;;  %v6280_v58 = vor.u32 %v6279_v41, %v7054_v6  ;;  %v6282_v12 = vld [vmem:[#allocation2 + $0x24] sm:$0xe]  ;;  %v1336_v4 = vld [vmem:[#allocation2 + $0x8c] sm:$0x1]  ;;  %v1606_v6 = vsel %vm1259_vm9, %v1562_v5, %v7029_v16 }
 0x11a   : > { %v7051_v2 = vpop.permute.xlu2 %1204  ;;  %v1658_v22 = vshll.u32 %v1604_v40, 16  ;;  %v1496_v17 = vunpack.c.l.b16 %v1336_v4  ;;  %v6135_v16 = vor.u32 %v6134_v50, %v6133_v11  ;;  %v6283_v39 = vor.u32 %v6282_v12, %v7077_v34  ;;  %v1337_v12 = vld [vmem:[#allocation2 + $0x98] sm:$0x1] }
 0x11b   : > { %2238 = vrot.lane.b32.xlu0 %v6108_v33, %s6417_s8  ;;  %v1657_v35 = vor.u32 %v1656_v15, %v1652_v26  ;;  %v7103_v15 = vld [vmem:[#allocation2 + $0x9c] sm:$0xf0]  ;;  %v1668_v26 = vshll.u32 %v1606_v6, 16 }
 0x11c   : > { %v1660_v21 = vrot.slane %v1658_v22, 1 }
 0x11d   : > { %v1091_v20 = vpop.permute.xlu0 %1090 }
 0x11e   : > { %1192 = vrot.lane.b32.xlu1 %v888_v28, %s6416_s30  ;;  %v1249_v63 = vsel %vm1210_vm10, %v7062_v14, %v1091_v20  ;;  %v2456_v28 = vrot.slane %v1604_v40, 1  ;;  %v1661_v8 = vsel %vm1631_vm13, %v1657_v35, %v1660_v21  ;;  %v835_v40 = vld [vmem:[#allocation2 + $0x9c] sm:$0xff]   ;;  %v1512_v35 = vpack.c.b16 %v1496_v17, %v1496_v17 }
 0x120   : > { %1455 = vrot.lane.b32.xlu2 %v1431_v0, %s6417_s8  ;;  %v1203_v19 = vpop.permute.xlu1 %1202  ;;  %v2457_v29 = vsel %vm2448_vm12, %v2455_v42, %v2456_v28  ;;  %v892_v28 = vld [vmem:[#allocation2 + $0x84] sm:$0xff]   ;;  %v1321_v42 = vld [vmem:[#allocation2 + $0x8c] sm:$0x1] }
 0x121   : > { %v7072_v30 = vsel %vm1259_vm9, %v1249_v63, %v1203_v19  ;;  %v1417_v21 = vunpack.c.l.b16 %v1321_v42  ;;  %v6080_v42 = vld [vmem:[#allocation2 + $0x30] sm:$0xe] }
 0x122   : > { %v7069_v18 = vpop.permute.xlu2 %1074  ;;  %v1754_v36 = vshll.u32 %v7072_v30, 16  ;;  %v1752_v45 = vshrl.u32 %v7072_v30, 16 }
 0x123   : > { %2318 = vrot.lane.b32.xlu0 %v6277_v24, %s6416_s30  ;;  %5673 = vmatmul.msk.bf16.gmra.mxu2 %vm1805_vm11, %v2457_v29  ;;  %v6284_v24 = vld [vmem:[#allocation2 + $0x84] sm:$0xf0] }
 0x124   : > { %v1756_v57 = vrot.slane %v1754_v36, 1  ;;  %v1308_v36 = vld [vmem:[#allocation2 + $0xa4] sm:$0x1] }
 0x125   : > { %v1544_v60 = vpop.permute.xlu0 %1543  ;;  %5630 = vmatmul.msk.bf16.gmra.mxu0 %vm1805_vm11, %v1661_v8  ;;  %v1372_v56 = vunpack.c.l.b16 %v1308_v36  ;;  %v6291_v36 = vld [vmem:[#allocation2 + $0x9c] sm:$0xe] }
 0x126   : > { %1082 = vrot.lane.b32.xlu1 %v857_v3, %s6417_s8  ;;  %v7091_v61 = vsel %vm1259_vm9, %v1589_v27, %v1544_v60  ;;  %v6069_v3 = vld [vmem:[#allocation2 + $0x78] sm:$0xff]   ;;  %v1757_v55 = vor.u32 %v1756_v57, %v1752_v45  ;;  %v6111_v60 = vor.u32 %v6110_v48, %v6109_v46  ;;  %v861_v45 = vld [vmem:[#allocation2 + $0x84] sm:$0xff]  }
 0x127   : > { %v1758_v33 = vshll.u32 %v7091_v61, 16 }
 0x128   : > { %1535 = vrot.lane.b32.xlu2 %v1511_v32, %s6416_s30  ;;  %v1073_v44 = vpop.permute.xlu1 %1072 }
 0x129   : > { %v1760_v0 = vrot.slane %v1758_v33, 1  ;;  %v1222_v19 = vsel %vm1210_vm10, %v815_v43, %v1073_v44  ;;  %v6287_v33 = vld [vmem:[#allocation2 + $0x84] sm:$0xf0] }
 0x12a   : > { %v7093_v62 = vpop.permute.xlu2 %1186 }
 0x12b   : > { %2240 = vrot.lane.b32.xlu0 %v6280_v58, %s6417_s8  ;;  %v1761_v13 = vsel %vm1631_vm13, %v1757_v55, %v1760_v0  ;;  %v6285_v58 = vld [vmem:[#allocation2 + $0x84] sm:$0xe]  ;;  %v1388_v55 = vpack.c.b16 %v1372_v56, %v1372_v56 }
 0x12c   : > { %5640 = vmatmul.msk.bf16.vlgmr.msra.gmra.mxu3 %vm1805_vm11, %v1761_v13  ;;  %v1497_v13 = vunpack.c.l.b16 %v1337_v12 }
 0x12d   : > { %v2231_v47 = vpop.permute.xlu0 %2230  ;;  %6243 = vmatpush.bf16.msra.mxu3 %v6890_v54  ;;  %v1670_v54 = vrot.slane %v1668_v26, 1 }
 0x12e   : > { %1194 = vrot.lane.b32.xlu1 %v6069_v3, %s6416_s30  ;;  %v2347_v43 = vsel %vm1210_vm10, %v6283_v39, %v2231_v47  ;;  %v1513_v47 = vpack.c.b16 %v1497_v13, %v1497_v13  ;;  %v6139_v39 = vld [vmem:[#allocation2 + $0xa8] sm:$0xf0]  ;;  %v1322_v13 = vld [vmem:[#allocation2 + $0x98] sm:$0x1] }
 0x130   : > { %1457 = vrot.lane.b32.xlu2 %v1432_v25, %s6417_s8  ;;  %v1185_v20 = vpop.permute.xlu1 %1184  ;;  %v1225_v25 = vsel %vm1210_vm10, %v6052_v51, %v7069_v18 }
 0x131   : > { %v1267_v9 = vsel %vm1259_vm9, %v1222_v19, %v1185_v20  ;;  %6244 = vmatpush.bf16.msra.mxu3 %v6902_v1  ;;  %v2459_v1 = vrot.slane %v1606_v6, 1  ;;  %v6288_v20 = vld [vmem:[#allocation2 + $0x84] sm:$0xe] }
 0x132   : > { %v7112_v22 = vpop.permute.xlu2 %1094  ;;  %v1664_v63 = vshll.u32 %v1267_v9, 16  ;;  %5651 = vmatmul.msk.bf16.gmra.mxu1 %vm1805_vm11, %v1267_v9  ;;  %v1662_v41 = vshrl.u32 %v1267_v9, 16 }
 0x133   : > { %2320 = vrot.lane.b32.xlu0 %v6135_v16, %s6416_s30 }
 0x134   : > { %v1666_v32 = vrot.slane %v1664_v63, 1  ;;  %v1299_v63 = vld [vmem:[#allocation2 + $0x38] sm:$0x1] }
 0x135   : > { %v2311_v38 = vpop.permute.xlu0 %2310 }
 0x136   : > { %v1667_v37 = vor.u32 %v1666_v32, %v1662_v41  ;;  %1084 = vrot.lane.b32.xlu1 %v6069_v3, %s6417_s8  ;;  %v2391_v8 = vsel %vm1259_vm9, %v2347_v43, %v2311_v38  ;;  %v1433_v3 = vpack.c.b16 %v1417_v21, %v1417_v21  ;;  %v6140_v41 = vld [vmem:[#allocation2 + $0xa8] sm:$0xe]  ;;  %v6079_v32 = vld [vmem:[#allocation2 + $0x30] sm:$0xf0] }
 0x137   : > { %v2458_v44 = vrot.slane %v2391_v8, 1  ;;  %v6141_v46 = vor.u32 %v6140_v41, %v6139_v39  ;;  %v6081_v21 = vor.u32 %v6080_v42, %v6079_v32  ;;  %v6136_v38 = vld [vmem:[#allocation2 + $0x90] sm:$0xf0]  ;;  %v820_v39 = vld [vmem:[#allocation2 + $0x3c] sm:$0xff]  }
 0x138   : > { %1537 = vrot.lane.b32.xlu2 %v1512_v35, %s6416_s30  ;;  %v1093_v34 = vpop.permute.xlu1 %1092  ;;  %v1671_v29 = vsel %vm1631_vm13, %v1667_v37, %v1670_v54  ;;  %v1363_v35 = vunpack.c.l.b16 %v1299_v63  ;;  %v6289_v37 = vor.u32 %v6288_v20, %v6287_v33  ;;  %v896_v20 = vld [vmem:[#allocation2 + $0x9c] sm:$0xff]  }
 0x139   : > { %v1252_v53 = vsel %vm1210_vm10, %v835_v40, %v1093_v34  ;;  %5631 = vmatmul.msk.bf16.gmra.mxu0 %vm1805_vm11, %v1671_v29  ;;  %v2460_v5 = vsel %vm2448_vm12, %v2458_v44, %v2459_v1  ;;  %v1309_v34 = vld [vmem:[#allocation2 + $0xb0] sm:$0x1]  ;;  %v6137_v29 = vld [vmem:[#allocation2 + $0x90] sm:$0xe]  ;;  %v6384_v41 = vld [vmem:[#allocation2 + $0x3c] sm:$0xf0] }
 0x13a   : > { %v7125_v27 = vpop.permute.xlu2 %1547  ;;  %v7129_v57 = vsel %vm1259_vm9, %v1252_v53, %v7051_v2  ;;  %5674 = vmatmul.msk.bf16.gmra.mxu2 %vm1805_vm11, %v2460_v5  ;;  %v7140_v2 = vsel %vm1259_vm9, %v1225_v25, %v7093_v62  ;;  %v6286_v62 = vor.u32 %v6285_v58, %v6284_v24  ;;  %v1379_v43 = vpack.c.b16 %v1363_v35, %v1363_v35 }
 0x13b   : > { %v1764_v0 = vshll.u32 %v7129_v57, 16  ;;  %2242 = vrot.lane.b32.xlu0 %v6111_v60, %s6417_s8  ;;  %v1762_v4 = vshrl.u32 %v7129_v57, 16  ;;  %v1674_v48 = vshll.u32 %v7140_v2, 16  ;;  %v1672_v1 = vshrl.u32 %v7140_v2, 16  ;;  %v6112_v60 = vld [vmem:[#allocation2 + $0x90] sm:$0xf0] }
 0x13c   : > { %v1373_v25 = vunpack.c.l.b16 %v1309_v34 }
 0x13d   : > { %v1466_v40 = vpop.permute.xlu0 %1465  ;;  %v1766_v6 = vrot.slane %v1764_v0, 1  ;;  %v1676_v51 = vrot.slane %v1674_v48, 1 }
 0x13e   : > { %1196 = vrot.lane.b32.xlu1 %v892_v28, %s6416_s30  ;;  %v1592_v11 = vsel %vm1210_vm10, %v1388_v55, %v1466_v40 }
 0x13f   : > { %v1767_v26 = vor.u32 %v1766_v6, %v1762_v4  ;;  %v1677_v40 = vor.u32 %v1676_v51, %v1672_v1 }
 0x140   : > { %1459 = vrot.lane.b32.xlu2 %v1433_v3, %s6417_s8  ;;  %v1546_v18 = vpop.permute.xlu1 %1545  ;;  %v6292_v3 = vor.u32 %v6291_v36, %v6798_v52 }
 0x141   : > { %v7148_v17 = vsel %vm1259_vm9, %v1592_v11, %v1546_v18  ;;  %v6057_v11 = vld [vmem:[#allocation2 + $0xa8] sm:$0xff]  }
 0x142   : > { %v7145_v50 = vpop.permute.xlu2 %2234  ;;  %5652 = vmatmul.msk.bf16.gmra.mxu1 %vm1805_vm11, %v7140_v2  ;;  %v1768_v19 = vshll.u32 %v7148_v17, 16  ;;  %v6138_v2 = vor.u32 %v6137_v29, %v6136_v38  ;;  %v1255_v63 = vsel %vm1210_vm10, %v6057_v11, %v7112_v22  ;;  %v1300_v38 = vld [vmem:[#allocation2 + $0x44] sm:$0x1] }
 0x143   : > { %2322 = vrot.lane.b32.xlu0 %v6286_v62, %s6416_s30  ;;  %v1389_v62 = vpack.c.b16 %v1373_v25, %v1373_v25  ;;  %v1364_v51 = vunpack.c.l.b16 %v1300_v38  ;;  %v839_v25 = vld [vmem:[#allocation2 + $0xb4] sm:$0xff]  }
 0x144   : > { %v1770_v9 = vrot.slane %v1768_v19, 1  ;;  %v1418_v19 = vunpack.c.l.b16 %v1322_v13 }
 0x145   : > { %v1448_v24 = vpop.permute.xlu0 %1447 }
 0x146   : > { %1086 = vrot.lane.b32.xlu1 %v861_v45, %s6417_s8  ;;  %v1771_v16 = vsel %vm1631_vm13, %v1767_v26, %v1770_v9  ;;  %v1565_v8 = vsel %vm1210_vm10, %v1379_v43, %v1448_v24  ;;  %v6113_v45 = vld [vmem:[#allocation2 + $0x90] sm:$0xe]  ;;  %v6382_v9 = vld [vmem:[#allocation2 + $0x9c] sm:$0xe] }
 0x147   : > { %5641 = vmatmul.msk.bf16.gmra.mxu3 %vm1805_vm11, %v1771_v16  ;;  %v6114_v18 = vor.u32 %v6113_v45, %v6112_v60  ;;  %v6385_v26 = vld [vmem:[#allocation2 + $0x3c] sm:$0xe] }
 0x148   : > { %1539 = vrot.lane.b32.xlu2 %v1513_v47, %s6416_s30  ;;  %v2233_v28 = vpop.permute.xlu1 %2232  ;;  %v6381_v47 = vld [vmem:[#allocation2 + $0x9c] sm:$0xf0]  ;;  %v6386_v1 = vor.u32 %v6385_v26, %v6384_v41  ;;  %v6142_v41 = vld [vmem:[#allocation2 + $0xc0] sm:$0xf0] }
 0x149   : > { %v2350_v53 = vsel %vm1210_vm10, %v6081_v21, %v2233_v28  ;;  %v6383_v48 = vor.u32 %v6382_v9, %v6381_v47 }
 0x14a   : > { %v7158_v54 = vpop.permute.xlu2 %2314  ;;  %v2353_v60 = vsel %vm1210_vm10, %v6386_v1, %v7145_v50 }
 0x14b   : > { %2244 = vrot.lane.b32.xlu0 %v6289_v37, %s6417_s8  ;;  %v1434_v37 = vpack.c.b16 %v1418_v19, %v1418_v19 }
 0x14d   : > { %v1528_v44 = vpop.permute.xlu0 %1527 }
 0x14e   : > { %1198 = vrot.lane.b32.xlu1 %v7062_v14, %s6416_s30  ;;  %v1608_v58 = vsel %vm1259_vm9, %v1565_v8, %v1528_v44  ;;  %v6297_v44 = vld [vmem:[#allocation2 + $0xb4] sm:$0xe] }
 0x14f   : > { %v1678_v55 = vshll.u32 %v1608_v58, 16  ;;  %v2462_v12 = vrot.slane %v1608_v58, 1  ;;  %v1380_v58 = vpack.c.b16 %v1364_v51, %v1364_v51 }
 0x150   : > { %2328 = vrot.lane.b32.xlu2 %v6141_v46, %s6416_s30  ;;  %v2313_v56 = vpop.permute.xlu1 %2312  ;;  %v1338_v46 = vld [vmem:[#allocation2 + $0xa4] sm:$0x1] }
 0x151   : > { %v2393_v33 = vsel %vm1259_vm9, %v2350_v53, %v2313_v56  ;;  %v1680_v4 = vrot.slane %v1678_v55, 1 }
 0x152   : > { %v7171_v5 = vpop.permute.xlu2 %1469  ;;  %v2461_v0 = vrot.slane %v2393_v33, 1  ;;  %v6294_v33 = vld [vmem:[#allocation2 + $0xb4] sm:$0xe] }
 0x153   : > { %2324 = vrot.lane.b32.xlu0 %v6138_v2, %s6416_s30  ;;  %v1681_v52 = vsel %vm1631_vm13, %v1677_v40, %v1680_v4  ;;  %v6295_v55 = vor.u32 %v6294_v33, %v6852_v23  ;;  %v6116_v2 = vld [vmem:[#allocation2 + $0xa8] sm:$0xe]  ;;  %v6298_v4 = vor.u32 %v6297_v44, %v6820_v31 }
 0x154   : > { %v2463_v6 = vsel %vm2448_vm12, %v2461_v0, %v2462_v12  ;;  %5632 = vmatmul.msk.bf16.gmra.mxu0 %vm1805_vm11, %v1681_v52  ;;  %v7209_v0 = vld [vmem:[#allocation2 + $0xb4] sm:$0xf0]  ;;  %v6115_v12 = vld [vmem:[#allocation2 + $0xa8] sm:$0xf0] }
 0x155   : > { %5675 = vmatmul.msk.bf16.gmra.mxu2 %vm1805_vm11, %v2463_v6  ;;  %v1207_v28 = vpop.permute.xlu0 %1206  ;;  %v6117_v19 = vor.u32 %v6116_v2, %v6115_v12 }
 0x156   : > { %2248 = vrot.lane.b32.xlu1 %v6292_v3, %s6417_s8  ;;  %v7184_v24 = vsel %vm1259_vm9, %v1255_v63, %v1207_v28  ;;  %v6118_v28 = vld [vmem:[#allocation2 + $0xc0] sm:$0xf0] }
 0x157   : > { %v1774_v42 = vshll.u32 %v7184_v24, 16  ;;  %v1772_v21 = vshrl.u32 %v7184_v24, 16 }
 0x158   : > { %2246 = vrot.lane.b32.xlu2 %v6114_v18, %s6417_s8  ;;  %v1468_v16 = vpop.permute.xlu1 %1467 }
 0x159   : > { %v1595_v35 = vsel %vm1210_vm10, %v1389_v62, %v1468_v16  ;;  %v1776_v43 = vrot.slane %v1774_v42, 1  ;;  %v1310_v16 = vld [vmem:[#allocation2 + $0xbc] sm:$0x1]  ;;  %v6143_v42 = vld [vmem:[#allocation2 + $0xc0] sm:$0xe] }
 0x15a   : > { %v7188_v32 = vsel %vm1259_vm9, %v1595_v35, %v7125_v27  ;;  %v7192_v22 = vpop.permute.xlu2 %1451  ;;  %v1498_v27 = vunpack.c.l.b16 %v1338_v46 }
 0x15b   : > { %v1778_v36 = vshll.u32 %v7188_v32, 16  ;;  %v1777_v29 = vor.u32 %v1776_v43, %v1772_v21  ;;  %1088 = vrot.lane.b32.xlu0 %v7062_v14, %s6417_s8  ;;  %v2395_v14 = vsel %vm1259_vm9, %v2353_v60, %v7158_v54  ;;  %v1374_v21 = vunpack.c.l.b16 %v1310_v16 }
 0x15c   : > { %v1514_v45 = vpack.c.b16 %v1498_v27, %v1498_v27  ;;  %v2464_v18 = vrot.slane %v2395_v14, 1 }
 0x15d   : > { %v1780_v34 = vrot.slane %v1778_v36, 1  ;;  %v1077_v8 = vpop.permute.xlu0 %1076  ;;  %v1390_v27 = vpack.c.b16 %v1374_v21, %v1374_v21 }
 0x15e   : > { %1461 = vrot.lane.b32.xlu1 %v1434_v37, %s6417_s8  ;;  %v1228_v13 = vsel %vm1210_vm10, %v820_v39, %v1077_v8  ;;  %v6119_v39 = vld [vmem:[#allocation2 + $0xc0] sm:$0xe] }
 0x15f   : > { %v1781_v56 = vsel %vm1631_vm13, %v1777_v29, %v1780_v34  ;;  %v1301_v34 = vld [vmem:[#allocation2 + $0x50] sm:$0x1]  ;;  %v6144_v29 = vor.u32 %v6143_v42, %v6142_v41 }
 0x160   : > { %2326 = vrot.lane.b32.xlu2 %v6383_v48, %s6416_s30  ;;  %v1450_v53 = vpop.permute.xlu1 %1449  ;;  %5642 = vmatmul.msk.bf16.gmra.mxu3 %vm1805_vm11, %v1781_v56  ;;  %v1365_v1 = vunpack.c.l.b16 %v1301_v34  ;;  %v1598_v56 = vsel %vm1210_vm10, %v1390_v27, %v7171_v5  ;;  %v6303_v27 = vld [vmem:[#allocation2 + $0x54] sm:$0xe] }
 0x161   : > { %v1568_v50 = vsel %vm1210_vm10, %v1380_v58, %v1450_v53 }
 0x162   : > { %v7205_v3 = vpop.permute.xlu2 %1531  ;;  %v1381_v53 = vpack.c.b16 %v1365_v1, %v1365_v1 }
 0x163   : > { %1200 = vrot.lane.b32.xlu0 %v896_v20, %s6416_s30  ;;  %v6300_v20 = vld [vmem:[#allocation2 + $0xcc] sm:$0xe] }
 0x164   : > { %v6301_v35 = vor.u32 %v6300_v20, %v6945_v59  ;;  %v6120_v59 = vor.u32 %v6119_v39, %v6118_v28 }
 0x165   : > { %v1189_v54 = vpop.permute.xlu0 %1188 }
 0x166   : > { %1541 = vrot.lane.b32.xlu1 %v1514_v45, %s6416_s30  ;;  %v1271_v11 = vsel %vm1259_vm9, %v1228_v13, %v1189_v54 }
 0x167   : > { %v1684_v23 = vshll.u32 %v1271_v11, 16  ;;  %5653 = vmatmul.msk.bf16.gmra.mxu1 %vm1805_vm11, %v1271_v11  ;;  %v1682_v47 = vshrl.u32 %v1271_v11, 16 }
 0x168   : > { %v1530_v40 = vpop.permute.xlu1 %1529  ;;  %2252 = vrot.lane.b32.xlu2 %v6295_v55, %s6417_s8  ;;  %v6053_v55 = vld [vmem:[#allocation2 + $0x48] sm:$0xff]  }
 0x169   : > { %v1610_v6 = vsel %vm1259_vm9, %v1568_v50, %v1530_v40  ;;  %v1686_v9 = vrot.slane %v1684_v23, 1 }
 0x16a   : > { %v1688_v62 = vshll.u32 %v1610_v6, 16  ;;  %v2465_v52 = vrot.slane %v1610_v6, 1  ;;  %v7224_v37 = vpop.permute.xlu2 %1453  ;;  %v1302_v6 = vld [vmem:[#allocation2 + $0x5c] sm:$0x1] }
 0x16b   : > { %v1687_v63 = vor.u32 %v1686_v9, %v1682_v47  ;;  %2250 = vrot.lane.b32.xlu0 %v6117_v19, %s6417_s8  ;;  %v1366_v20 = vunpack.c.l.b16 %v1302_v6  ;;  %v5204_v6 = vld [vmem:[%s8241_s5] sm:$0xf] }
 0x16c   : > { %v2466_v26 = vsel %vm2448_vm12, %v2464_v18, %v2465_v52  ;;  %v1690_v31 = vrot.slane %v1688_v62, 1  ;;  %v6083_v62 = vld [vmem:[#allocation2 + $0x48] sm:$0xe] }
 0x16d   : > { %5676 = vmatmul.msk.bf16.gmra.mxu2 %vm1805_vm11, %v2466_v26  ;;  %v1097_v46 = vpop.permute.xlu0 %1096  ;;  %v823_v26 = vld [vmem:[#allocation2 + $0x54] sm:$0xff]  }
 0x16e   : > { %2330 = vrot.lane.b32.xlu1 %v6298_v4, %s6416_s30  ;;  %v1691_v48 = vsel %vm1631_vm13, %v1687_v63, %v1690_v31  ;;  %v1258_v43 = vsel %vm1210_vm10, %v839_v25, %v1097_v46  ;;  %v1571_v25 = vsel %vm1210_vm10, %v1381_v53, %v7192_v22  ;;  %v6082_v22 = vld [vmem:[#allocation2 + $0x48] sm:$0xf0]  ;;  %v7254_v31 = vld [vmem:[#allocation2 + $0x54] sm:$0xf0] }
 0x16f   : > { %5633 = vmatmul.msk.bf16.gmra.mxu0 %vm1805_vm11, %v1691_v48  ;;  %v1612_v5 = vsel %vm1259_vm9, %v1571_v25, %v7205_v3  ;;  %v6084_v47 = vor.u32 %v6083_v62, %v6082_v22  ;;  %v7262_v48 = vld [vmem:[%s8238_s2] ss:$0 sm:$0xff] }
 0x170   : > { %v1209_v36 = vpop.permute.xlu1 %1208  ;;  %2334 = vrot.lane.b32.xlu2 %v6301_v35, %s6416_s30  ;;  %v1698_v11 = vshll.u32 %v1612_v5, 16  ;;  %v1382_v35 = vpack.c.b16 %v1366_v20, %v1366_v20  ;;  %v2468_v34 = vrot.slane %v1612_v5, 1 }
 0x171   : > { %v7231_v38 = vsel %vm1259_vm9, %v1258_v43, %v1209_v36 }
 0x172   : > { %v1784_v51 = vshll.u32 %v7231_v38, 16  ;;  %v1534_v45 = vpop.permute.xlu2 %1533  ;;  %v1782_v58 = vshrl.u32 %v7231_v38, 16  ;;  %v1700_v63 = vrot.slane %v1698_v11, 1  ;;  %v1574_v1 = vsel %vm1210_vm10, %v1382_v35, %v7224_v37 }
 0x173   : > { %2332 = vrot.lane.b32.xlu0 %v6144_v29, %s6416_s30 }
 0x174   : > { %v1786_v44 = vrot.slane %v1784_v51, 1 }
 0x175   : > { %v1550_v60 = vpop.permute.xlu0 %1549  ;;  %v2000_v12 = vpop.f32.mrf.mxu1 }
 0x176   : > { %2254 = vrot.lane.b32.xlu1 %v6120_v59, %s6417_s8  ;;  %v7239_v33 = vsel %vm1259_vm9, %v1598_v56, %v1550_v60  ;;  %v1787_v50 = vor.u32 %v1786_v44, %v1782_v58  ;;  %v7273_v60 = vsel %vm1259_vm9, %v1574_v1, %v1534_v45 }
 0x177   : > { %v1788_v14 = vshll.u32 %v7239_v33, 16  ;;  %v1708_v5 = vshll.u32 %v7273_v60, 16 }
 0x178   : > { %v1079_v8 = vpop.permute.xlu1 %1078 }
 0x179   : > { %v1790_v2 = vrot.slane %v1788_v14, 1  ;;  %v1231_v18 = vsel %vm1210_vm10, %v6053_v55, %v1079_v8  ;;  %v1303_v14 = vld [vmem:[#allocation2 + $0x68] sm:$0x1] }
 0x17a   : > { %v7252_v23 = vpop.permute.xlu2 %1455 }
 0x17b   : > { %v1791_v13 = vsel %vm1631_vm13, %v1787_v50, %v1790_v2 }
 0x17c   : > { %5643 = vmatmul.msk.bf16.gmra.mxu3 %vm1805_vm11, %v1791_v13 }
 0x17d   : > { %v2237_v54 = vpop.permute.xlu0 %2236  ;;  %v2002_v28 = vpop.f32.mrf.mxu1 }
 0x17e   : > { %v2356_v42 = vsel %vm1210_vm10, %v6084_v47, %v2237_v54 }
 0x180   : > { %v1191_v40 = vpop.permute.xlu1 %1190 }
 0x181   : > { %v1273_v4 = vsel %vm1259_vm9, %v1231_v18, %v1191_v40  ;;  %v6304_v40 = vor.u32 %v6303_v27, %v7254_v31  ;;  %v3157_v31 = vld [vmem:[#allocation3 + $0xc] sm:$0xf] }
 0x182   : > { %v1694_v52 = vshll.u32 %v1273_v4, 16  ;;  %5654 = vmatmul.msk.bf16.gmra.mxu1 %vm1805_vm11, %v1273_v4  ;;  %v1692_v3 = vshrl.u32 %v1273_v4, 16  ;;  %v1867_v9 = vpop.f32.mrf.mxu0  ;;  %v7269_v56 = vpop.permute.xlu2 %1535  ;;  %v1367_v4 = vunpack.c.l.b16 %v1303_v14 }
 0x183   : > { %v2001_v36 = vadd.f32 %v2000_v12, %v1867_v9 }
 0x184   : > { %v1696_v19 = vrot.slane %v1694_v52, 1  ;;  %v5334_v52 = vsel %vm1854_vm8, %v5204_v6, 0 }
 0x185   : > { %v2317_v46 = vpop.permute.xlu0 %2316  ;;  %v2005_v25 = vpop.f32.mrf.mxu1  ;;  %5343 = vmatpush.bf16.msrb.mxu2 %v5334_v52 }
 0x186   : > { %v1697_v16 = vor.u32 %v1696_v19, %v1692_v3  ;;  %v2397_v21 = vsel %vm1259_vm9, %v2356_v42, %v2317_v46  ;;  %v2570_v43 = vpop.f32.mrf.mxu2  ;;  %v5732_v3 = vld [vmem:[%s8239_s3 + $0x20] sm:$0xf] }
 0x187   : > { %v2467_v59 = vrot.slane %v2397_v21, 1  ;;  %v2650_v29 = vadd.f32 %v2570_v43, %v2001_v36 }
 0x188   : > { %v1081_v39 = vpop.permute.xlu1 %1080  ;;  %v1701_v41 = vsel %vm1631_vm13, %v1697_v16, %v1700_v63  ;;  %v1710_v63 = vrot.slane %v1708_v5, 1 }
 0x189   : > { %5634 = vmatmul.msk.bf16.gmra.mxu0 %vm1805_vm11, %v1701_v41  ;;  %v2686_v51 = vadd.f32 %v7262_v48, %v2650_v29  ;;  %v2469_v8 = vsel %vm2448_vm12, %v2467_v59, %v2468_v34  ;;  %v1234_v58 = vsel %vm1210_vm10, %v823_v26, %v1081_v39  ;;  %v4960_v26 = vunpack.c.l.b16 %v5732_v3  ;;  %v6085_v3 = vld [vmem:[#allocation2 + $0x60] sm:$0xf0] }
 0x18a   : > { %v1869_v53 = vpop.f32.mrf.mxu0  ;;  %5677 = vmatmul.msk.bf16.gmra.mxu2 %vm1805_vm11, %v2469_v8  ;;  %v1383_v41 = vpack.c.b16 %v1367_v4, %v1367_v4  ;;  %v7293_v42 = vpop.permute.xlu2 %1457 }
 0x18b   : > { %v2718_v44 = vmax.f32 %v2686_v51, 0.0  ;;  %v2003_v12 = vadd.f32 %v2002_v28, %v1869_v53  ;;  %v4962_v36 = vpack.c.b16 %v4960_v26, %v4960_v26  ;;  %v2471_v53 = vrot.slane %v7273_v60, 1  ;;  %v6086_v26 = vld [vmem:[#allocation2 + $0x60] sm:$0xe] }
 0x18c   : > { %5660 = vmatmul.msk.bf16.vlgmr.msrb.gmra.mxu3 %vm1805_vm11, %v7072_v30  ;;  %v3752_v30 = vld [vmem:[%s8239_s3 + $0x8] sm:$0xf]  ;;  %v1577_v14 = vsel %vm1210_vm10, %v1383_v41, %v7252_v23 }
 0x18d   : > { %v2750_v55 = vpack.c.bf16 %v2718_v44, %v2718_v44  ;;  %v2239_v2 = vpop.permute.xlu0 %2238  ;;  %v4407_v62 = vunpack.c.l.b16 %v3752_v30  ;;  %v5013_v51 = vsel %vm1854_vm8, %v4962_v36, 0 }
 0x18e   : > { %v2572_v13 = vpop.f32.mrf.mxu2  ;;  %v2359_v46 = vsel %vm1210_vm10, %v6304_v40, %v2239_v2  ;;  %5021 = vmatpush.bf16.msrb.mxu1 %v5013_v51 }
 0x18f   : > { %v2837_v45 = vshrl.u32 %v2750_v55, 16  ;;  %v2651_v54 = vadd.f32 %v2572_v13, %v2003_v12  ;;  %v2840_v20 = vshll.u32 %v2750_v55, 16  ;;  %v4409_v28 = vpack.c.b16 %v4407_v62, %v4407_v62 }
 0x190   : > { %v1193_v37 = vpop.permute.xlu1 %1192 }
 0x191   : > { %v1275_v50 = vsel %vm1259_vm9, %v1234_v58, %v1193_v37  ;;  %v2839_v19 = vrot.slane %v2837_v45, 7  ;;  %v2687_v47 = vadd.f32 %v7262_v48, %v2651_v54  ;;  %v4444_v34 = vsel %vm1854_vm8, %v4409_v28, 0  ;;  %v2007_v58 = vpop.f32.mrf.mxu1 }
 0x192   : > { %v1704_v18 = vshll.u32 %v1275_v50, 16  ;;  %5655 = vmatmul.msk.bf16.gmra.mxu1 %vm1805_vm11, %v1275_v50  ;;  %v1702_v11 = vshrl.u32 %v1275_v50, 16  ;;  %v1872_v9 = vpop.f32.mrf.mxu0  ;;  %4452 = vmatpush.bf16.msrb.mxu0 %v4444_v34  ;;  %v6054_v50 = vld [vmem:[#allocation2 + $0x60] sm:$0xff]   ;;  %v7310_v45 = vsel %vm1259_vm9, %v1577_v14, %v7269_v56 }
 0x193   : > { %v2842_v35 = vor.u32 %v2840_v20, %v2839_v19  ;;  %v2719_v39 = vmax.f32 %v2687_v47, 0.0  ;;  %v2006_v1 = vadd.f32 %v2005_v25, %v1872_v9  ;;  %v2843_v40 = vrot.slane %v2839_v19, 4  ;;  %v1538_v47 = vpop.permute.xlu2 %1537 }
 0x194   : > { %v1706_v22 = vrot.slane %v1704_v18, 1  ;;  %v3161_v18 = vld [vmem:[#allocation3 + $0x14] sm:$0x1]  ;;  %v1718_v9 = vshll.u32 %v7310_v45, 16 }
 0x195   : > { %v3158_v59 = vsel %vm6503_vm6, %v2842_v35, %v3157_v31  ;;  %v2751_v29 = vpack.c.bf16 %v2719_v39, %v2719_v39  ;;  %v2319_v27 = vpop.permute.xlu0 %2318 }
 0x196   : > { %v1707_v16 = vor.u32 %v1706_v22, %v1702_v11  ;;  %3159 = vst [vmem:[#allocation3 + $0xc] sm:$0xf] %v3158_v59  ;;  %v2399_v8 = vsel %vm1259_vm9, %v2359_v46, %v2319_v27  ;;  %v2575_v44 = vpop.f32.mrf.mxu2  ;;  %v1304_v22 = vld [vmem:[#allocation2 + $0x74] sm:$0x1]  ;;  %v827_v59 = vld [vmem:[#allocation2 + $0x6c] sm:$0xff]   ;;  %v1720_v27 = vrot.slane %v1718_v9, 1 }
 0x197   : > { %v2845_v37 = vshrl.u32 %v2751_v29, 16  ;;  %v2470_v55 = vrot.slane %v2399_v8, 1  ;;  %v2652_v25 = vadd.f32 %v2575_v44, %v2006_v1  ;;  %v2848_v2 = vshll.u32 %v2751_v29, 16  ;;  %v7325_v29 = vld [vmem:[#allocation2 + $0x6c] sm:$0xf0] }
 0x198   : > { %v1083_v21 = vpop.permute.xlu1 %1082  ;;  %v1711_v43 = vsel %vm1631_vm13, %v1707_v16, %v1710_v63  ;;  %v1368_v28 = vunpack.c.l.b16 %v1304_v22  ;;  %v3164_v1 = vld [vmem:[#allocation3 + $0x18] sm:$0xf] }
 0x199   : > { %5635 = vmatmul.msk.bf16.gmra.mxu0 %vm1805_vm11, %v1711_v43  ;;  %v2847_v12 = vrot.slane %v2845_v37, 7  ;;  %v2688_v5 = vadd.f32 %v7262_v48, %v2652_v25  ;;  %v2472_v60 = vsel %vm2448_vm12, %v2470_v55, %v2471_v53  ;;  %v1237_v30 = vsel %vm1210_vm10, %v6054_v50, %v1083_v21  ;;  %v2010_v41 = vpop.f32.mrf.mxu1 }
 0x19a   : > { %v1874_v13 = vpop.f32.mrf.mxu0  ;;  %5678 = vmatmul.msk.bf16.gmra.mxu2 %vm1805_vm11, %v2472_v60  ;;  %v6087_v21 = vor.u32 %v6086_v26, %v6085_v3  ;;  %v1384_v44 = vpack.c.b16 %v1368_v28, %v1368_v28  ;;  %v6306_v3 = vld [vmem:[#allocation2 + $0x6c] sm:$0xe] }
 0x19b   : > { %v2850_v54 = vor.u32 %v2848_v2, %v2847_v12  ;;  %v2852_v23 = vrot.slane %v2847_v12, 4  ;;  %v2720_v4 = vmax.f32 %v2688_v5, 0.0  ;;  %v2008_v6 = vadd.f32 %v2007_v58, %v1874_v13 }
 0x19c   : > { %5661 = vmatmul.msk.bf16.gmra.mxu3 %vm1805_vm11, %v7129_v57  ;;  %v2474_v13 = vrot.slane %v7310_v45, 1 }
 0x19d   : > { %v2851_v62 = vsel %vm6493_vm5, %v2843_v40, %v2850_v54  ;;  %v3162_v56 = vsel %vm6715_vm7, %v2852_v23, %v3161_v18  ;;  %v2752_v52 = vpack.c.bf16 %v2720_v4, %v2720_v4  ;;  %v2241_v19 = vpop.permute.xlu0 %2240  ;;  %v1580_v23 = vsel %vm1210_vm10, %v1384_v44, %v7293_v42 }
 0x19e   : > { %3160 = vst.msk [vmem:[#allocation3 + $0x10] sm:$0xf] %vm280_vm0, %v2851_v62  ;;  %v2577_v57 = vpop.f32.mrf.mxu2  ;;  %v2362_v55 = vsel %vm1210_vm10, %v6087_v21, %v2241_v19  ;;  %v3168_v19 = vld [vmem:[#allocation3 + $0x20] sm:$0x1] }
 0x19f   : > { %3163 = vst [vmem:[#allocation3 + $0x14] sm:$0x1] %v3162_v56  ;;  %v2854_v63 = vshrl.u32 %v2752_v52, 16  ;;  %v2653_v16 = vadd.f32 %v2577_v57, %v2008_v6  ;;  %v2857_v46 = vshll.u32 %v2752_v52, 16  ;;  %v7338_v6 = vpop.permute.xlu2 %1459 }
 0x1a0   : > { %v1195_v11 = vpop.permute.xlu1 %1194 }
 0x1a1   : > { %v1277_v20 = vsel %vm1259_vm9, %v1237_v30, %v1195_v11  ;;  %v2856_v36 = vrot.slane %v2854_v63, 7  ;;  %v2689_v43 = vadd.f32 %v7262_v48, %v2653_v16  ;;  %v2012_v26 = vpop.f32.mrf.mxu1 }
 0x1a2   : > { %v1714_v31 = vshll.u32 %v1277_v20, 16  ;;  %5656 = vmatmul.msk.bf16.gmra.mxu1 %vm1805_vm11, %v1277_v20  ;;  %v1712_v35 = vshrl.u32 %v1277_v20, 16  ;;  %v1877_v34 = vpop.f32.mrf.mxu0  ;;  %v7343_v20 = vsel %vm1259_vm9, %v1580_v23, %v1538_v47 }
 0x1a3   : > { %v2859_v53 = vor.u32 %v2857_v46, %v2856_v36  ;;  %v2721_v8 = vmax.f32 %v2689_v43, 0.0  ;;  %v2011_v12 = vadd.f32 %v2010_v41, %v1877_v34  ;;  %v2860_v42 = vrot.slane %v2856_v36, 4 }
 0x1a4   : > { %v1716_v39 = vrot.slane %v1714_v31, 1  ;;  %v1728_v43 = vshll.u32 %v7343_v20, 16 }
 0x1a5   : > { %v3165_v14 = vsel %vm6503_vm6, %v2859_v53, %v3164_v1  ;;  %v2753_v25 = vpack.c.bf16 %v2721_v8, %v2721_v8  ;;  %v2321_v2 = vpop.permute.xlu0 %2320  ;;  %v3301_v50 = vld [vmem:[#allocation3 + $0xc] sm:$0xff]  }
 0x1a6   : > { %v1717_v51 = vor.u32 %v1716_v39, %v1712_v35  ;;  %v7332_v5 = vld [vmem:[#allocation3 + $0xc] sm:$0xf0]  ;;  %3166 = vst [vmem:[#allocation3 + $0x18] sm:$0xf] %v3165_v14  ;;  %v2401_v60 = vsel %vm1259_vm9, %v2362_v55, %v2321_v2  ;;  %v2580_v18 = vpop.f32.mrf.mxu2  ;;  %v3769_v40 = vld [vmem:[#allocation3 + $0x14] sm:$0x1]  ;;  %3526 = vrot.lane.b32.xlu0 %v3301_v50, %s6417_s8 }
 0x1a7   : > { %v2862_v54 = vshrl.u32 %v2753_v25, 16  ;;  %v2473_v4 = vrot.slane %v2401_v60, 1  ;;  %v2654_v30 = vadd.f32 %v2580_v18, %v2011_v12  ;;  %v3865_v11 = vunpack.c.l.b16 %v3769_v40  ;;  %v1305_v35 = vld [vmem:[#allocation2 + $0x80] sm:$0x1]  ;;  %v1540_v14 = vpop.permute.xlu2 %1539  ;;  %v3171_v55 = vld [vmem:[#allocation3 + $0x24] sm:$0xf] }
 0x1a8   : > { %v1085_v58 = vpop.permute.xlu1 %1084  ;;  %v1721_v37 = vsel %vm1631_vm13, %v1717_v51, %v1720_v27  ;;  %v2865_v62 = vshll.u32 %v2753_v25, 16  ;;  %v1369_v27 = vunpack.c.l.b16 %v1305_v35  ;;  %v1730_v25 = vrot.slane %v1728_v43, 1  ;;  %v3175_v35 = vld [vmem:[#allocation3 + $0x2c] sm:$0x1] }
 0x1a9   : > { %5636 = vmatmul.msk.bf16.gmra.mxu0 %vm1805_vm11, %v1721_v37  ;;  %v2864_v22 = vrot.slane %v2862_v54, 7  ;;  %v2690_v56 = vadd.f32 %v7262_v48, %v2654_v30  ;;  %v2475_v45 = vsel %vm2448_vm12, %v2473_v4, %v2474_v13  ;;  %v3881_v9 = vpack.c.b16 %v3865_v11, %v3865_v11 }
 0x1aa   : > { %v1879_v52 = vpop.f32.mrf.mxu0  ;;  %5679 = vmatmul.msk.bf16.gmra.mxu2 %vm1805_vm11, %v2475_v45  ;;  %v1240_v16 = vsel %vm1210_vm10, %v827_v59, %v1085_v58  ;;  %v6307_v58 = vor.u32 %v6306_v3, %v7325_v29  ;;  %v1385_v13 = vpack.c.b16 %v1369_v27, %v1369_v27 }
 0x1ab   : > { %v2867_v57 = vor.u32 %v2865_v62, %v2864_v22  ;;  %v2869_v31 = vrot.slane %v2864_v22, 4  ;;  %v2722_v63 = vmax.f32 %v2690_v56, 0.0  ;;  %3897 = vrot.lane.b32.xlu2 %v3881_v9, %s6417_s8  ;;  %v2013_v28 = vadd.f32 %v2012_v26, %v1879_v52  ;;  %v6309_v26 = vld [vmem:[#allocation3 + $0xc] sm:$0xe] }
 0x1ac   : > { %5662 = vmatmul.msk.bf16.gmra.mxu3 %vm1805_vm11, %v7184_v24  ;;  %v2477_v22 = vrot.slane %v7343_v20, 1 }
 0x1ad   : > { %v2868_v39 = vsel %vm6493_vm5, %v2860_v42, %v2867_v57  ;;  %v3169_v41 = vsel %vm6715_vm7, %v2869_v31, %v3168_v19  ;;  %v2754_v36 = vpack.c.bf16 %v2722_v63, %v2722_v63  ;;  %v2243_v46 = vpop.permute.xlu0 %2242  ;;  %v6216_v11 = vld [vmem:[#allocation3 + $0x18] sm:$0xe]  ;;  %v1583_v19 = vsel %vm1210_vm10, %v1385_v13, %v7338_v6 }
 0x1ae   : > { %3167 = vst.msk [vmem:[#allocation3 + $0x1c] sm:$0xf] %vm280_vm0, %v2868_v39  ;;  %v2582_v34 = vpop.f32.mrf.mxu2  ;;  %v2365_v54 = vsel %vm1210_vm10, %v6307_v58, %v2243_v46  ;;  %v7377_v39 = vsel %vm1259_vm9, %v1583_v19, %v1540_v14  ;;  %v6091_v14 = vld [vmem:[#allocation2 + $0x90] sm:$0xf0] }
 0x1af   : > { %3170 = vst [vmem:[#allocation3 + $0x20] sm:$0x1] %v3169_v41  ;;  %v2871_v24 = vshrl.u32 %v2754_v36, 16  ;;  %v2655_v1 = vadd.f32 %v2582_v34, %v2013_v28  ;;  %v2874_v44 = vshll.u32 %v2754_v36, 16  ;;  %v2015_v31 = vpop.f32.mrf.mxu1  ;;  %v2329_v43 = vpop.permute.xlu2 %2328 }
 0x1b0   : > { %v1197_v47 = vpop.permute.xlu1 %1196 }
 0x1b1   : > { %v1279_v21 = vsel %vm1259_vm9, %v1240_v16, %v1197_v47  ;;  %v2873_v8 = vrot.slane %v2871_v24, 7  ;;  %v2691_v37 = vadd.f32 %v7262_v48, %v2655_v1  ;;  %v6055_v16 = vld [vmem:[#allocation2 + $0x78] sm:$0xff]   ;;  %v6310_v1 = vor.u32 %v6309_v26, %v7332_v5 }
 0x1b2   : > { %v1724_v59 = vshll.u32 %v1279_v21, 16  ;;  %5657 = vmatmul.msk.bf16.gmra.mxu1 %vm1805_vm11, %v1279_v21  ;;  %v1722_v51 = vshrl.u32 %v1279_v21, 16 }
 0x1b3   : > { %v2876_v2 = vor.u32 %v2874_v44, %v2873_v8  ;;  %v2723_v50 = vmax.f32 %v2691_v37, 0.0  ;;  %v2877_v41 = vrot.slane %v2873_v8, 4  ;;  %v6088_v8 = vld [vmem:[#allocation2 + $0x78] sm:$0xf0]  ;;  %v6089_v44 = vld [vmem:[#allocation2 + $0x78] sm:$0xe] }
 0x1b4   : > { %v1726_v53 = vrot.slane %v1724_v59, 1 }
 0x1b5   : > { %v3172_v40 = vsel %vm6503_vm6, %v2876_v2, %v3171_v55  ;;  %v2755_v23 = vpack.c.bf16 %v2723_v50, %v2723_v50  ;;  %v2323_v4 = vpop.permute.xlu0 %2322  ;;  %v7366_v29 = vld [vmem:[#allocation3 + $0x18] sm:$0xff]   ;;  %v6090_v50 = vor.u32 %v6089_v44, %v6088_v8 }
 0x1b6   : > { %v1727_v12 = vor.u32 %v1726_v53, %v1722_v51  ;;  %v6215_v30 = vld [vmem:[#allocation3 + $0x18] sm:$0xf0]  ;;  %3173 = vst [vmem:[#allocation3 + $0x24] sm:$0xf] %v3172_v40  ;;  %v1882_v62 = vpop.f32.mrf.mxu0  ;;  %v2403_v56 = vsel %vm1259_vm9, %v2365_v54, %v2323_v4  ;;  %3638 = vrot.lane.b32.xlu1 %v7366_v29, %s6416_s30  ;;  %v3785_v45 = vld [vmem:[#allocation3 + $0x20] sm:$0x1] }
 0x1b7   : > { %v6217_v52 = vor.u32 %v6216_v11, %v6215_v30  ;;  %v2879_v3 = vshrl.u32 %v2755_v23, 16  ;;  %v2476_v9 = vrot.slane %v2403_v56, 1  ;;  %v3945_v42 = vunpack.c.l.b16 %v3785_v45  ;;  %v3770_v57 = vld [vmem:[#allocation3 + $0x20] sm:$0x1]  ;;  %v7396_v54 = vld [vmem:[#allocation2 + $0x84] sm:$0xff]   ;;  %v2017_v30 = vpop.f32.mrf.mxu1 }
 0x1b8   : > { %v1087_v60 = vpop.permute.xlu1 %1086  ;;  %v1731_v18 = vsel %vm1631_vm13, %v1727_v12, %v1730_v25  ;;  %v2882_v63 = vshll.u32 %v2755_v23, 16  ;;  %v3866_v6 = vunpack.c.l.b16 %v3770_v57  ;;  %v2016_v21 = vadd.f32 %v2015_v31, %v1882_v62  ;;  %v6092_v25 = vld [vmem:[#allocation2 + $0x90] sm:$0xe]  ;;  %v7398_v23 = vld [vmem:[#allocation2 + $0x84] sm:$0xf0] }
 0x1b9   : > { %5637 = vmatmul.msk.bf16.gmra.mxu0 %vm1805_vm11, %v1731_v18  ;;  %4759 = vrot.lane.b32.xlu2 %v6217_v52, %s6416_s30  ;;  %v2881_v20 = vrot.slane %v2879_v3, 7  ;;  %v2478_v28 = vsel %vm2448_vm12, %v2476_v9, %v2477_v22  ;;  %v3961_v47 = vpack.c.b16 %v3945_v42, %v3945_v42  ;;  %v1243_v34 = vsel %vm1210_vm10, %v6055_v16, %v1087_v60  ;;  %v2247_v16 = vpop.permute.xlu2 %2246 }
 0x1ba   : > { %5680 = vmatmul.msk.bf16.gmra.mxu2 %vm1805_vm11, %v2478_v28  ;;  %v3882_v55 = vpack.c.b16 %v3866_v6, %v3866_v6  ;;  %v6093_v40 = vor.u32 %v6092_v25, %v6091_v14  ;;  %v2486_v62 = vrot.slane %v7091_v61, 1  ;;  %v2480_v56 = vrot.slane %v7377_v39, 1  ;;  %v6391_v61 = vld [vmem:[#allocation2 + $0x84] sm:$0xe] }
 0x1bb   : > { %v2884_v36 = vor.u32 %v2882_v63, %v2881_v20  ;;  %v2886_v46 = vrot.slane %v2881_v20, 4  ;;  %3977 = vrot.lane.b32.xlu0 %v3961_v47, %s6416_s30 }
 0x1bc   : > { %5663 = vmatmul.msk.bf16.gmra.mxu3 %vm1805_vm11, %v7231_v38  ;;  %v1738_v38 = vshll.u32 %v7377_v39, 16 }
 0x1bd   : > { %v2585_v24 = vpop.f32.mrf.mxu2  ;;  %v2885_v27 = vsel %vm6493_vm5, %v2877_v41, %v2884_v36  ;;  %v3176_v51 = vsel %vm6715_vm7, %v2886_v46, %v3175_v35  ;;  %v2245_v58 = vpop.permute.xlu0 %2244  ;;  %v6388_v4 = vld [vmem:[#allocation3 + $0x24] sm:$0xe] }
 0x1be   : > { %v2656_v53 = vadd.f32 %v2585_v24, %v2016_v21  ;;  %3174 = vst.msk [vmem:[#allocation3 + $0x28] sm:$0xf] %vm280_vm0, %v2885_v27  ;;  %4679 = vrot.lane.b32.xlu1 %v6310_v1, %s6417_s8  ;;  %v1884_v2 = vpop.f32.mrf.mxu0  ;;  %v1740_v11 = vrot.slane %v1738_v38, 1  ;;  %v2368_v3 = vsel %vm1210_vm10, %v6090_v50, %v2245_v58  ;;  %v3178_v21 = vld [vmem:[#allocation3 + $0x30] sm:$0xf]  ;;  %v7411_v24 = vpop.f32.mrf.mxu3 }
 0x1bf   : > { %3177 = vst [vmem:[#allocation3 + $0x2c] sm:$0x1] %v3176_v51  ;;  %v2018_v52 = vadd.f32 %v2017_v30, %v1884_v2  ;;  %v3182_v30 = vld [vmem:[#allocation3 + $0x38] sm:$0x1] }
 0x1c0   : > { %v1199_v59 = vpop.permute.xlu1 %1198  ;;  %v2692_v12 = vadd.f32 %v7262_v48, %v2656_v53  ;;  %v1306_v53 = vld [vmem:[#allocation2 + $0x8c] sm:$0x1] }
 0x1c1   : > { %v1281_v37 = vsel %vm1259_vm9, %v1243_v34, %v1199_v59  ;;  %3899 = vrot.lane.b32.xlu2 %v3882_v55, %s6417_s8  ;;  %v1370_v55 = vunpack.c.l.b16 %v1306_v53 }
 0x1c2   : > { %v1734_v5 = vshll.u32 %v1281_v37, 16  ;;  %5658 = vmatmul.msk.bf16.gmra.mxu1 %vm1805_vm11, %v1281_v37  ;;  %v1732_v13 = vshrl.u32 %v1281_v37, 16  ;;  %v2724_v18 = vmax.f32 %v2692_v12, 0.0 }
 0x1c3   : > { %3528 = vrot.lane.b32.xlu0 %v7366_v29, %s6417_s8 }
 0x1c4   : > { %v1736_v60 = vrot.slane %v1734_v5, 1  ;;  %v2756_v45 = vpack.c.bf16 %v2724_v18, %v2724_v18  ;;  %v6392_v5 = vor.u32 %v6391_v61, %v7398_v23 }
 0x1c5   : > { %v2587_v9 = vpop.f32.mrf.mxu2  ;;  %v2325_v63 = vpop.permute.xlu0 %2324  ;;  %v3337_v28 = vld [vmem:[#allocation3 + $0x24] sm:$0xff]  }
 0x1c6   : > { %v1737_v22 = vor.u32 %v1736_v60, %v1732_v13  ;;  %v2888_v26 = vshrl.u32 %v2756_v45, 16  ;;  %v2891_v57 = vshll.u32 %v2756_v45, 16  ;;  %v2657_v20 = vadd.f32 %v2587_v9, %v2018_v52  ;;  %v6387_v47 = vld [vmem:[#allocation3 + $0x24] sm:$0xf0]  ;;  %v3786_v39 = vld [vmem:[#allocation3 + $0x2c] sm:$0x1]  ;;  %3640 = vrot.lane.b32.xlu1 %v3337_v28, %s6416_s30  ;;  %v7427_v9 = vpop.f32.mrf.mxu3 }
 0x1c7   : > { %v2405_v35 = vsel %vm1259_vm9, %v2368_v3, %v2325_v63  ;;  %v3946_v34 = vunpack.c.l.b16 %v3786_v39  ;;  %v6389_v59 = vor.u32 %v6388_v4, %v6387_v47  ;;  %v3771_v8 = vld [vmem:[#allocation3 + $0x2c] sm:$0x1]  ;;  %v3305_v14 = vld [vmem:[#allocation3 + $0x24] sm:$0xff]   ;;  %v6191_v13 = vld [vmem:[#allocation3 + $0x18] sm:$0xf0]  ;;  %v2020_v4 = vpop.f32.mrf.mxu1 }
 0x1c8   : > { %v2249_v19 = vpop.permute.xlu1 %2248  ;;  %v1741_v42 = vsel %vm1631_vm13, %v1737_v22, %v1740_v11  ;;  %v2890_v6 = vrot.slane %v2888_v26, 7  ;;  %v2693_v36 = vadd.f32 %v7262_v48, %v2657_v20  ;;  %v2479_v46 = vrot.slane %v2405_v35, 1  ;;  %v7420_v38 = vld [vmem:[#allocation3 + $0x24] sm:$0xf0]  ;;  %v6312_v20 = vld [vmem:[#allocation2 + $0x9c] sm:$0xe] }
 0x1c9   : > { %v2374_v31 = vsel %vm1210_vm10, %v6093_v40, %v2249_v19  ;;  %5638 = vmatmul.msk.bf16.gmra.mxu0 %vm1805_vm11, %v1741_v42  ;;  %4761 = vrot.lane.b32.xlu2 %v6389_v59, %s6416_s30  ;;  %v3867_v12 = vunpack.c.l.b16 %v3771_v8  ;;  %v2327_v40 = vpop.permute.xlu2 %2326  ;;  %v2371_v11 = vsel %vm1210_vm10, %v6392_v5, %v2247_v16  ;;  %v1386_v22 = vpack.c.b16 %v1370_v55, %v1370_v55 }
 0x1ca   : > { %v2409_v29 = vsel %vm1259_vm9, %v2374_v31, %v2329_v43  ;;  %v2893_v1 = vor.u32 %v2891_v57, %v2890_v6  ;;  %v2725_v27 = vmax.f32 %v2693_v36, 0.0  ;;  %v2481_v51 = vsel %vm2448_vm12, %v2479_v46, %v2480_v56  ;;  %v6192_v56 = vld [vmem:[#allocation3 + $0x18] sm:$0xe] }
 0x1cb   : > { %v2485_v41 = vrot.slane %v2409_v29, 1  ;;  %5681 = vmatmul.msk.bf16.gmra.mxu2 %vm1805_vm11, %v2481_v51  ;;  %v3962_v43 = vpack.c.b16 %v3946_v34, %v3946_v34  ;;  %v3883_v23 = vpack.c.b16 %v3867_v12, %v3867_v12  ;;  %v2894_v52 = vrot.slane %v2890_v6, 4 }
 0x1cc   : > { %v3179_v58 = vsel %vm6503_vm6, %v2893_v1, %v3178_v21  ;;  %v2757_v37 = vpack.c.bf16 %v2725_v27, %v2725_v27  ;;  %v6193_v19 = vor.u32 %v6192_v56, %v6191_v13  ;;  %v2407_v57 = vsel %vm1259_vm9, %v2371_v11, %v2327_v40  ;;  %v6315_v40 = vld [vmem:[#allocation3 + $0x24] sm:$0xe] }
 0x1cd   : > { %v2487_v44 = vsel %vm2448_vm12, %v2485_v41, %v2486_v62  ;;  %3180 = vst [vmem:[#allocation3 + $0x30] sm:$0xf] %v3179_v58  ;;  %3979 = vrot.lane.b32.xlu0 %v3962_v43, %s6416_s30  ;;  %v1089_v50 = vpop.permute.xlu0 %1088  ;;  %v2482_v39 = vrot.slane %v2407_v57, 1  ;;  %v6313_v53 = vor.u32 %v6312_v20, %v7103_v15 }
 0x1ce   : > { %5683 = vmatmul.msk.bf16.vlgmr.msra.gmra.mxu3 %vm1805_vm11, %v2487_v44  ;;  %v2896_v2 = vshrl.u32 %v2757_v37, 16  ;;  %v2899_v18 = vshll.u32 %v2757_v37, 16  ;;  %4681 = vrot.lane.b32.xlu1 %v6193_v19, %s6417_s8  ;;  %v1246_v28 = vsel %vm1210_vm10, %v7396_v54, %v1089_v50  ;;  %v7447_v8 = vpop.f32.mrf.mxu3 }
 0x1cf   : > { %v2022_v51 = vpop.f32.mrf.mxu1 }
 0x1d0   : > { %v1462_v25 = vpop.permute.xlu1 %1461  ;;  %v2898_v60 = vrot.slane %v2896_v2, 7 }
 0x1d1   : > { %v1887_v62 = vpop.f32.mrf.mxu0  ;;  %3901 = vrot.lane.b32.xlu2 %v3883_v23, %s6417_s8  ;;  %v1586_v63 = vsel %vm1210_vm10, %v1386_v22, %v1462_v25 }
 0x1d2   : > { %v2901_v45 = vor.u32 %v2899_v18, %v2898_v60  ;;  %v2903_v3 = vrot.slane %v2898_v60, 4  ;;  %v2021_v31 = vadd.f32 %v2020_v4, %v1887_v62 }
 0x1d4   : > { %v2902_v42 = vsel %vm6493_vm5, %v2894_v52, %v2901_v45  ;;  %v3183_v26 = vsel %vm6715_vm7, %v2903_v3, %v3182_v30  ;;  %v6219_v55 = vld [vmem:[#allocation3 + $0x30] sm:$0xe]  ;;  %v2489_v30 = vrot.slane %v7148_v17, 1  ;;  %v3185_v45 = vld [vmem:[#allocation3 + $0x3c] sm:$0xf] }
 0x1d5   : > { %3181 = vst.msk [vmem:[#allocation3 + $0x34] sm:$0xf] %vm280_vm0, %v2902_v42  ;;  %3530 = vrot.lane.b32.xlu0 %v3305_v14, %s6417_s8  ;;  %v1201_v35 = vpop.permute.xlu0 %1200  ;;  %v6094_v17 = vld [vmem:[#allocation2 + $0xa8] sm:$0xf0] }
 0x1d6   : > { %3184 = vst [vmem:[#allocation3 + $0x38] sm:$0x1] %v3183_v26  ;;  %v1283_v41 = vsel %vm1259_vm9, %v1246_v28, %v1201_v35 }
 0x1d7   : > { %v1744_v21 = vshll.u32 %v1283_v41, 16  ;;  %5659 = vmatmul.msk.bf16.gmra.mxu1 %vm1805_vm11, %v1283_v41  ;;  %v1742_v27 = vshrl.u32 %v1283_v41, 16 }
 0x1d8   : > { %v1542_v61 = vpop.permute.xlu1 %1541  ;;  %v2590_v16 = vpop.f32.mrf.mxu2 }
 0x1d9   : > { %v1622_v47 = vsel %vm1259_vm9, %v1586_v63, %v1542_v61  ;;  %v2658_v29 = vadd.f32 %v2590_v16, %v2021_v31  ;;  %v1889_v34 = vpop.f32.mrf.mxu0  ;;  %v1746_v54 = vrot.slane %v1744_v21, 1  ;;  %v6095_v31 = vld [vmem:[#allocation2 + $0xa8] sm:$0xe]  ;;  %v6316_v63 = vor.u32 %v6315_v40, %v7420_v38  ;;  %v5842_v38 = vld [vmem:[%s8239_s3 + $0x18] sm:$0xff] }
 0x1da   : > { %v2483_v6 = vrot.slane %v1622_v47, 1  ;;  %v1748_v36 = vshll.u32 %v1622_v47, 16  ;;  %v2023_v37 = vadd.f32 %v2022_v51, %v1889_v34  ;;  %v6096_v28 = vor.u32 %v6095_v31, %v6094_v17  ;;  %5022 = vmatpush.bf16.msrb.mxu1 %v5842_v38 }
 0x1db   : > { %v2694_v46 = vadd.f32 %v7262_v48, %v2658_v29  ;;  %v1747_v58 = vor.u32 %v1746_v54, %v1742_v27  ;;  %v7464_v29 = vpop.f32.mrf.mxu3 }
 0x1dc   : > { %v2484_v59 = vsel %vm2448_vm12, %v2482_v39, %v2483_v6  ;;  %v1750_v43 = vrot.slane %v1748_v36, 1  ;;  %v6160_v14 = vld [vmem:[#allocation3 + $0x30] sm:$0xff]   ;;  %v5840_v39 = vld [vmem:[%s8239_s3] sm:$0xff]  ;;  %v2253_v36 = vpop.permute.xlu2 %2252 }
 0x1dd   : > { %v2726_v1 = vmax.f32 %v2694_v46, 0.0  ;;  %5682 = vmatmul.msk.bf16.gmra.mxu2 %vm1805_vm11, %v2484_v59  ;;  %v6218_v5 = vld [vmem:[#allocation3 + $0x30] sm:$0xf0]  ;;  %3642 = vrot.lane.b32.xlu1 %v6160_v14, %s6416_s30  ;;  %v3787_v50 = vld [vmem:[#allocation3 + $0x38] sm:$0x1]  ;;  %v2251_v18 = vpop.permute.xlu0 %2250  ;;  %v2380_v21 = vsel %vm1210_vm10, %v6096_v28, %v2253_v36 }
 0x1de   : > { %v6220_v2 = vor.u32 %v6219_v55, %v6218_v5  ;;  %v1751_v15 = vsel %vm1631_vm13, %v1747_v58, %v1750_v43  ;;  %v3772_v4 = vld [vmem:[#allocation3 + $0x38] sm:$0x1]  ;;  %v2377_v11 = vsel %vm1210_vm10, %v6313_v53, %v2251_v18  ;;  %v3947_v22 = vunpack.c.l.b16 %v3787_v50  ;;  %4453 = vmatpush.bf16.msrb.mxu0 %v5840_v39  ;;  %v3189_v46 = vld [vmem:[#allocation3 + $0x44] sm:$0x1] }
 0x1df   : > { %v2758_v44 = vpack.c.bf16 %v2726_v1, %v2726_v1  ;;  %5639 = vmatmul.msk.bf16.gmra.mxu0 %vm1805_vm11, %v1751_v15  ;;  %v3868_v42 = vunpack.c.l.b16 %v3772_v4 }
 0x1e0   : > { %v2331_v25 = vpop.permute.xlu1 %2330  ;;  %v2592_v12 = vpop.f32.mrf.mxu2  ;;  %4763 = vrot.lane.b32.xlu2 %v6220_v2, %s6416_s30  ;;  %v3963_v19 = vpack.c.b16 %v3947_v22, %v3947_v22  ;;  %v2492_v2 = vrot.slane %v7188_v32, 1 }
 0x1e1   : > { %v2905_v13 = vshrl.u32 %v2758_v44, 16  ;;  %v2659_v60 = vadd.f32 %v2592_v12, %v2023_v37  ;;  %v2908_v23 = vshll.u32 %v2758_v44, 16  ;;  %v2411_v52 = vsel %vm1259_vm9, %v2377_v11, %v2331_v25  ;;  %v6318_v44 = vld [vmem:[#allocation2 + $0xb4] sm:$0xe] }
 0x1e2   : > { %v2488_v3 = vrot.slane %v2411_v52, 1  ;;  %3981 = vrot.lane.b32.xlu0 %v3963_v19, %s6416_s30  ;;  %v3884_v47 = vpack.c.b16 %v3868_v42, %v3868_v42 }
 0x1e3   : > { %v2907_v62 = vrot.slane %v2905_v13, 7  ;;  %v2695_v56 = vadd.f32 %v7262_v48, %v2659_v60  ;;  %v7481_v55 = vpop.f32.mrf.mxu3  ;;  %v6319_v60 = vor.u32 %v6318_v44, %v7209_v0 }
 0x1e4   : > { %v2490_v20 = vsel %vm2448_vm12, %v2488_v3, %v2489_v30  ;;  %v2025_v34 = vpop.f32.mrf.mxu1  ;;  %v2335_v0 = vpop.permute.xlu2 %2334 }
 0x1e5   : > { %v2910_v26 = vor.u32 %v2908_v23, %v2907_v62  ;;  %v2727_v57 = vmax.f32 %v2695_v56, 0.0  ;;  %5684 = vmatmul.msk.bf16.gmra.mxu3 %vm1805_vm11, %v2490_v20  ;;  %4683 = vrot.lane.b32.xlu1 %v6316_v63, %s6417_s8  ;;  %v2333_v59 = vpop.permute.xlu0 %2332  ;;  %v2911_v1 = vrot.slane %v2907_v62, 4  ;;  %v3192_v63 = vld [vmem:[#allocation3 + $0x48] sm:$0xf] }
 0x1e6   : > { %v2413_v58 = vsel %vm1259_vm9, %v2380_v21, %v2333_v59 }
 0x1e7   : > { %v3186_v61 = vsel %vm6503_vm6, %v2910_v26, %v3185_v45  ;;  %v2759_v16 = vpack.c.bf16 %v2727_v57, %v2727_v57  ;;  %v2491_v12 = vrot.slane %v2413_v58, 1 }
 0x1e8   : > { %3187 = vst [vmem:[#allocation3 + $0x3c] sm:$0xf] %v3186_v61  ;;  %3903 = vrot.lane.b32.xlu2 %v3884_v47, %s6417_s8  ;;  %v2255_v4 = vpop.permute.xlu1 %2254 }
 0x1e9   : > { %v2913_v35 = vshrl.u32 %v2759_v16, 16  ;;  %v2916_v41 = vshll.u32 %v2759_v16, 16  ;;  %v2493_v40 = vsel %vm2448_vm12, %v2491_v12, %v2492_v2  ;;  %v2383_v3 = vsel %vm1210_vm10, %v6319_v60, %v2255_v4 }
 0x1ea   : > { %3532 = vrot.lane.b32.xlu0 %v6160_v14, %s6417_s8 }
 0x1eb   : > { %v2915_v6 = vrot.slane %v2913_v35, 7  ;;  %v7489_v42 = vpop.f32.mrf.mxu3  ;;  %v2415_v35 = vsel %vm1259_vm9, %v2383_v3, %v2335_v0  ;;  %v7526_v0 = vld [vmem:[%s8238_s2] ss:$0 sm:$0xff] }
 0x1ec   : > { %v1892_v51 = vpop.f32.mrf.mxu0  ;;  %v2027_v18 = vpop.f32.mrf.mxu1  ;;  %v2494_v21 = vrot.slane %v2415_v35, 1  ;;  %v5841_v35 = vld [vmem:[%s8239_s3 + $0xc] sm:$0xff] }
 0x1ed   : > { %v2918_v27 = vor.u32 %v2916_v41, %v2915_v6  ;;  %v2920_v54 = vrot.slane %v2915_v6, 4  ;;  %v2026_v37 = vadd.f32 %v2025_v34, %v1892_v51  ;;  %v6194_v41 = vld [vmem:[#allocation3 + $0x30] sm:$0xf0]  ;;  %v2495_v51 = vrot.slane %v7239_v33, 1 }
 0x1ef   : > { %v2919_v53 = vsel %vm6493_vm5, %v2911_v1, %v2918_v27  ;;  %v3190_v43 = vsel %vm6715_vm7, %v2920_v54, %v3189_v46  ;;  %v6394_v13 = vld [vmem:[#allocation3 + $0x3c] sm:$0xe]  ;;  %v6195_v46 = vld [vmem:[#allocation3 + $0x30] sm:$0xe] }
 0x1f0   : > { %3188 = vst.msk [vmem:[#allocation3 + $0x40] sm:$0xf] %vm280_vm0, %v2919_v53  ;;  %v2595_v5 = vpop.f32.mrf.mxu2  ;;  %v6196_v59 = vor.u32 %v6195_v46, %v6194_v41  ;;  %v3196_v53 = vld [vmem:[#allocation3 + $0x50] sm:$0x1]  ;;  %v3199_v46 = vld [vmem:[#allocation3 + $0x54] sm:$0xf] }
 0x1f1   : > { %3191 = vst [vmem:[#allocation3 + $0x44] sm:$0x1] %v3190_v43  ;;  %v2660_v25 = vadd.f32 %v2595_v5, %v2026_v37  ;;  %v2496_v5 = vsel %vm2448_vm12, %v2494_v21, %v2495_v51 }
 0x1f3   : > { %v2696_v14 = vadd.f32 %v7262_v48, %v2660_v25 }
 0x1f4   : > { %v1894_v15 = vpop.f32.mrf.mxu0 }
 0x1f5   : > { %v2728_v50 = vmax.f32 %v2696_v14, 0.0  ;;  %v2028_v11 = vadd.f32 %v2027_v18, %v1894_v15  ;;  %5685 = vmatmul.msk.bf16.gmra.mxu3 %vm1805_vm11, %v2493_v40  ;;  %v5689_v14 = vld [vmem:[%s8239_s3 + $0x14] sm:$0xf] }
 0x1f7   : > { %v2760_v30 = vpack.c.bf16 %v2728_v50, %v2728_v50  ;;  %v3341_v22 = vld [vmem:[#allocation3 + $0x3c] sm:$0xff]   ;;  %v4258_v50 = vunpack.c.l.b16 %v5689_v14 }
 0x1f8   : > { %v6393_v62 = vld [vmem:[#allocation3 + $0x3c] sm:$0xf0]  ;;  %v2597_v23 = vpop.f32.mrf.mxu2  ;;  %v3788_v56 = vld [vmem:[#allocation3 + $0x44] sm:$0x1]  ;;  %3644 = vrot.lane.b32.xlu1 %v3341_v22, %s6416_s30 }
 0x1f9   : > { %v2922_v52 = vshrl.u32 %v2760_v30, 16  ;;  %v2661_v45 = vadd.f32 %v2597_v23, %v2028_v11  ;;  %v3948_v32 = vunpack.c.l.b16 %v3788_v56  ;;  %v6395_v19 = vor.u32 %v6394_v13, %v6393_v62  ;;  %v3773_v20 = vld [vmem:[#allocation3 + $0x44] sm:$0x1]  ;;  %v3309_v61 = vld [vmem:[#allocation3 + $0x3c] sm:$0xff]  }
 0x1fa   : > { %v2925_v57 = vshll.u32 %v2760_v30, 16  ;;  %v7494_v16 = vld [vmem:[#allocation3 + $0x3c] sm:$0xf0]  ;;  %v3869_v39 = vunpack.c.l.b16 %v3773_v20  ;;  %v4260_v13 = vpack.c.b16 %v4258_v50, %v4258_v50  ;;  %v3203_v50 = vld [vmem:[#allocation3 + $0x5c] sm:$0x1] }
 0x1fb   : > { %v2924_v26 = vrot.slane %v2922_v52, 7  ;;  %v2697_v17 = vadd.f32 %v7262_v48, %v2661_v45  ;;  %v3964_v31 = vpack.c.b16 %v3948_v32, %v3948_v32  ;;  %4765 = vrot.lane.b32.xlu2 %v6395_v19, %s6416_s30  ;;  %v6321_v52 = vld [vmem:[#allocation3 + $0x3c] sm:$0xe] }
 0x1fc   : > { %v3885_v34 = vpack.c.b16 %v3869_v39, %v3869_v39  ;;  %v4311_v30 = vsel %vm1854_vm8, %v4260_v13, 0  ;;  %v6322_v20 = vor.u32 %v6321_v52, %v7494_v16 }
 0x1fd   : > { %v2927_v28 = vor.u32 %v2925_v57, %v2924_v26  ;;  %v2729_v47 = vmax.f32 %v2697_v17, 0.0  ;;  %3983 = vrot.lane.b32.xlu0 %v3964_v31, %s6416_s30  ;;  %v2928_v43 = vrot.slane %v2924_v26, 4  ;;  %4319 = vmatpush.bf16.msrb.mxu3 %v4311_v30 }
 0x1ff   : > { %v3193_v48 = vsel %vm6503_vm6, %v2927_v28, %v3192_v63  ;;  %v2761_v38 = vpack.c.bf16 %v2729_v47, %v2729_v47  ;;  %v2030_v6 = vpop.f32.mrf.mxu1  ;;  %v7500_v54 = vpop.f32.mrf.mxu3 }
 0x200   : > { %3194 = vst [vmem:[#allocation3 + $0x48] sm:$0xf] %v3193_v48  ;;  %4685 = vrot.lane.b32.xlu1 %v6196_v59, %s6417_s8 }
 0x201   : > { %v2930_v36 = vshrl.u32 %v2761_v38, 16  ;;  %v2933_v27 = vshll.u32 %v2761_v38, 16  ;;  %4320 = vmatpush.bf16.msrb.mxu3 %v5841_v35 }
 0x203   : > { %v2932_v1 = vrot.slane %v2930_v36, 7  ;;  %3905 = vrot.lane.b32.xlu2 %v3885_v34, %s6417_s8 }
 0x205   : > { %v2935_v44 = vor.u32 %v2933_v27, %v2932_v1  ;;  %v2937_v58 = vrot.slane %v2932_v1, 4  ;;  %3534 = vrot.lane.b32.xlu0 %v3309_v61, %s6417_s8  ;;  %5686 = vmatmul.msk.bf16.gmra.mxu3 %vm1805_vm11, %v2496_v5 }
 0x206   : > { %v1897_v37 = vpop.f32.mrf.mxu0 }
 0x207   : > { %v2936_v25 = vsel %vm6493_vm5, %v2928_v43, %v2935_v44  ;;  %v3197_v12 = vsel %vm6715_vm7, %v2937_v58, %v3196_v53  ;;  %v2032_v33 = vpop.f32.mrf.mxu1  ;;  %v7516_v2 = vpop.f32.mrf.mxu3  ;;  %v6222_v4 = vld [vmem:[#allocation3 + $0x48] sm:$0xe]  ;;  %v2031_v11 = vadd.f32 %v2030_v6, %v1897_v37 }
 0x208   : > { %3195 = vst.msk [vmem:[#allocation3 + $0x4c] sm:$0xf] %vm280_vm0, %v2936_v25  ;;  %v5843_v43 = vld [vmem:[%s6480_s29] sm:$0xff] }
 0x209   : > { %3198 = vst [vmem:[#allocation3 + $0x50] sm:$0x1] %v3197_v12  ;;  %5817 = vmatmul.msk.bf16.vlgmr.msrb.gmra.mxu2 %vm1210_vm10, %v5843_v43  ;;  %v3753_v25 = vld [vmem:[#allocation3 + $0x8] sm:$0x1] }
 0x20d   : > { %v2600_v23 = vpop.f32.mrf.mxu2 }
 0x20e   : > { %v1899_v60 = vpop.f32.mrf.mxu0  ;;  %v2662_v32 = vadd.f32 %v2600_v23, %v2031_v11  ;;  %v5956_v23 = vld [vmem:[#allocation3] sm:$0xff]  }
 0x20f   : > { %v2035_v18 = vpop.f32.mrf.mxu1  ;;  %v6161_v15 = vld [vmem:[#allocation3 + $0x48] sm:$0xff]   ;;  %v7521_v3 = vpop.f32.mrf.mxu3  ;;  %v2033_v63 = vadd.f32 %v2032_v33, %v1899_v60 }
 0x210   : > { %v6221_v40 = vld [vmem:[#allocation3 + $0x48] sm:$0xf0]  ;;  %3646 = vrot.lane.b32.xlu1 %v6161_v15, %s6416_s30  ;;  %v3789_v62 = vld [vmem:[#allocation3 + $0x50] sm:$0x1]  ;;  %v2698_v26 = vadd.f32 %v7526_v0, %v2662_v32 }
 0x211   : > { %v6223_v22 = vor.u32 %v6222_v4, %v6221_v40  ;;  %v3949_v56 = vunpack.c.l.b16 %v3789_v62  ;;  %v3774_v45 = vld [vmem:[#allocation3 + $0x50] sm:$0x1]  ;;  %v3817_v4 = vunpack.c.l.b16 %v3753_v25 }
 0x212   : > { %v3870_v57 = vunpack.c.l.b16 %v3774_v45  ;;  %v2730_v17 = vmax.f32 %v2698_v26, 0.0  ;;  %v3898_v26 = vpop.permute.xlu2 %3897 }
 0x213   : > { %4767 = vrot.lane.b32.xlu2 %v6223_v22, %s6416_s30  ;;  %v3965_v19 = vpack.c.b16 %v3949_v56, %v3949_v56 }
 0x214   : > { %v2762_v61 = vpack.c.bf16 %v2730_v17, %v2730_v17  ;;  %v3886_v47 = vpack.c.b16 %v3870_v57, %v3870_v57 }
 0x215   : > { %3985 = vrot.lane.b32.xlu0 %v3965_v19, %s6416_s30  ;;  %v2602_v39 = vpop.f32.mrf.mxu2  ;;  %v3833_v19 = vpack.c.b16 %v3817_v4, %v3817_v4 }
 0x216   : > { %v1902_v31 = vpop.f32.mrf.mxu0  ;;  %v2939_v48 = vshrl.u32 %v2762_v61, 16  ;;  %v2663_v38 = vadd.f32 %v2602_v39, %v2033_v63  ;;  %v2942_v41 = vshll.u32 %v2762_v61, 16  ;;  %v6167_v39 = vld [vmem:[#allocation3] sm:$0xf0] }
 0x217   : > { %v2037_v28 = vpop.f32.mrf.mxu1  ;;  %v7536_v6 = vpop.f32.mrf.mxu3  ;;  %v2036_v27 = vadd.f32 %v2035_v18, %v1902_v31 }
 0x218   : > { %4687 = vrot.lane.b32.xlu1 %v6322_v20, %s6417_s8  ;;  %v2941_v16 = vrot.slane %v2939_v48, 7  ;;  %v2699_v36 = vadd.f32 %v7526_v0, %v2663_v38  ;;  %v3527_v56 = vpop.permute.xlu0 %3526  ;;  %v6168_v48 = vld [vmem:[#allocation3] sm:$0xe] }
 0x219   : > { %v3672_v17 = vsel %vm1210_vm10, %v5956_v23, %v3527_v56  ;;  %v3210_v23 = vld [vmem:[#allocation3 + $0x68] sm:$0x1] }
 0x21a   : > { %v2944_v21 = vor.u32 %v2942_v41, %v2941_v16  ;;  %v2731_v34 = vmax.f32 %v2699_v36, 0.0  ;;  %v2945_v13 = vrot.slane %v2941_v16, 4 }
 0x21b   : > { %3907 = vrot.lane.b32.xlu2 %v3886_v47, %s6417_s8  ;;  %v3206_v47 = vld [vmem:[#allocation3 + $0x60] sm:$0xf] }
 0x21c   : > { %v3200_v1 = vsel %vm6503_vm6, %v2944_v21, %v3199_v46  ;;  %v2763_v51 = vpack.c.bf16 %v2731_v34, %v2731_v34  ;;  %v4011_v46 = vsel %vm1210_vm10, %v3833_v19, %v3898_v26  ;;  %v5844_v19 = vld [vmem:[%s6480_s29 + $0x8] sm:$0xff] }
 0x21d   : > { %3536 = vrot.lane.b32.xlu0 %v6161_v15, %s6417_s8  ;;  %3201 = vst [vmem:[#allocation3 + $0x54] sm:$0xf] %v3200_v1  ;;  %v2605_v53 = vpop.f32.mrf.mxu2  ;;  %5818 = vmatmul.msk.bf16.gmra.mxu2 %vm1210_vm10, %v5844_v19 }
 0x21e   : > { %v1904_v59 = vpop.f32.mrf.mxu0  ;;  %v2947_v44 = vshrl.u32 %v2763_v51, 16  ;;  %v2664_v37 = vadd.f32 %v2605_v53, %v2036_v27  ;;  %v2950_v33 = vshll.u32 %v2763_v51, 16  ;;  %v6169_v27 = vor.u32 %v6168_v48, %v6167_v39 }
 0x21f   : > { %v2040_v58 = vpop.f32.mrf.mxu1  ;;  %v7543_v5 = vpop.f32.mrf.mxu3  ;;  %v2038_v22 = vadd.f32 %v2037_v28, %v1904_v59 }
 0x220   : > { %v2949_v12 = vrot.slane %v2947_v44, 7  ;;  %v2700_v14 = vadd.f32 %v7526_v0, %v2664_v37 }
 0x222   : > { %v2952_v60 = vor.u32 %v2950_v33, %v2949_v12  ;;  %v2954_v18 = vrot.slane %v2949_v12, 4  ;;  %v2732_v15 = vmax.f32 %v2700_v14, 0.0 }
 0x224   : > { %v2953_v30 = vsel %vm6493_vm5, %v2945_v13, %v2952_v60  ;;  %v3204_v11 = vsel %vm6715_vm7, %v2954_v18, %v3203_v50  ;;  %v2764_v62 = vpack.c.bf16 %v2732_v15, %v2732_v15  ;;  %v6397_v36 = vld [vmem:[#allocation3 + $0x54] sm:$0xe] }
 0x225   : > { %3202 = vst.msk [vmem:[#allocation3 + $0x58] sm:$0xf] %vm280_vm0, %v2953_v30  ;;  %v2607_v52 = vpop.f32.mrf.mxu2 }
 0x226   : > { %v1907_v40 = vpop.f32.mrf.mxu0  ;;  %3205 = vst [vmem:[#allocation3 + $0x5c] sm:$0x1] %v3204_v11  ;;  %v2956_v45 = vshrl.u32 %v2764_v62, 16  ;;  %v2665_v32 = vadd.f32 %v2607_v52, %v2038_v22  ;;  %v2959_v20 = vshll.u32 %v2764_v62, 16  ;;  %v4760_v62 = vpop.permute.xlu2 %4759 }
 0x227   : > { %v7552_v57 = vpop.f32.mrf.mxu3  ;;  %v2042_v63 = vpop.f32.mrf.mxu1  ;;  %v2041_v59 = vadd.f32 %v2040_v58, %v1907_v40 }
 0x228   : > { %v7555_v31 = vrot.slane %v2956_v45, 7  ;;  %v2701_v61 = vadd.f32 %v7526_v0, %v2665_v32  ;;  %v3639_v28 = vpop.permute.xlu1 %3638 }
 0x229   : > { %v3719_v35 = vsel %vm1259_vm9, %v3672_v17, %v3639_v28 }
 0x22a   : > { %v2961_v38 = vor.u32 %v2959_v20, %v7555_v31  ;;  %v2733_v16 = vmax.f32 %v2701_v61, 0.0  ;;  %5714 = vmatmul.msk.bf16.vlgmr.msrb.gmra.mxu0 %vm1805_vm11, %v3719_v35  ;;  %v4091_v21 = vshll.u32 %v3719_v35, 16  ;;  %v4089_v33 = vshrl.u32 %v3719_v35, 16 }
 0x22b   : > { %v2962_v13 = vrot.slane %v7555_v31, 4 }
 0x22c   : > { %v3207_v34 = vsel %vm6503_vm6, %v2961_v38, %v3206_v47  ;;  %v2765_v1 = vpack.c.bf16 %v2733_v16, %v2733_v16  ;;  %v3345_v51 = vld [vmem:[#allocation3 + $0x54] sm:$0xff]   ;;  %v4093_v43 = vrot.slane %v4091_v21, 1 }
 0x22d   : > { %v6396_v53 = vld [vmem:[#allocation3 + $0x54] sm:$0xf0]  ;;  %3208 = vst [vmem:[#allocation3 + $0x60] sm:$0xf] %v3207_v34  ;;  %v3978_v44 = vpop.permute.xlu0 %3977  ;;  %v2610_v37 = vpop.f32.mrf.mxu2  ;;  %v3790_v25 = vld [vmem:[#allocation3 + $0x5c] sm:$0x1]  ;;  %3648 = vrot.lane.b32.xlu1 %v3345_v51, %s6416_s30 }
 0x22e   : > { %v1909_v41 = vpop.f32.mrf.mxu0  ;;  %v2964_v12 = vshrl.u32 %v2765_v1, 16  ;;  %v4058_v14 = vsel %vm1259_vm9, %v4011_v46, %v3978_v44  ;;  %v2666_v50 = vadd.f32 %v2610_v37, %v2041_v59  ;;  %v2967_v60 = vshll.u32 %v2765_v1, 16  ;;  %v3775_v32 = vld [vmem:[#allocation3 + $0x5c] sm:$0x1]  ;;  %v3313_v28 = vld [vmem:[#allocation3 + $0x54] sm:$0xff]  }
 0x22f   : > { %v4095_v18 = vshll.u32 %v4058_v14, 16  ;;  %v7566_v58 = vpop.f32.mrf.mxu3  ;;  %v3950_v15 = vunpack.c.l.b16 %v3790_v25  ;;  %v4094_v4 = vor.u32 %v4093_v43, %v4089_v33  ;;  %v6398_v22 = vor.u32 %v6397_v36, %v6396_v53  ;;  %v2045_v31 = vpop.f32.mrf.mxu1  ;;  %v7573_v47 = vld [vmem:[#allocation3 + $0x54] sm:$0xf0]  ;;  %v3754_v16 = vld [vmem:[#allocation3 + $0x14] sm:$0x1] }
 0x230   : > { %v2966_v40 = vrot.slane %v2964_v12, 7  ;;  %v2702_v30 = vadd.f32 %v7526_v0, %v2666_v50  ;;  %v4680_v11 = vpop.permute.xlu1 %4679  ;;  %v2043_v35 = vadd.f32 %v2042_v63, %v1909_v41  ;;  %v4904_v48 = vrot.slane %v4058_v14, 1  ;;  %v3271_v63 = vld [vmem:[#allocation3 + $0xc] sm:$0xff]  }
 0x231   : > { %v4097_v56 = vrot.slane %v4095_v18, 1  ;;  %v4793_v52 = vsel %vm1210_vm10, %v6169_v27, %v4680_v11  ;;  %v3966_v45 = vpack.c.b16 %v3950_v15, %v3950_v15  ;;  %4769 = vrot.lane.b32.xlu2 %v6398_v22, %s6416_s30  ;;  %v7583_v41 = vld [vmem:[#allocation3 + $0xc] sm:$0xf0]  ;;  %v3871_v59 = vunpack.c.l.b16 %v3775_v32  ;;  %v6197_v44 = vld [vmem:[#allocation3 + $0x48] sm:$0xf0] }
 0x232   : > { %v2969_v26 = vor.u32 %v2967_v60, %v2966_v40  ;;  %v2971_v17 = vrot.slane %v2966_v40, 4  ;;  %v2734_v20 = vmax.f32 %v2702_v30, 0.0  ;;  %v4840_v61 = vsel %vm1259_vm9, %v4793_v52, %v4760_v62  ;;  %v3213_v60 = vld [vmem:[#allocation3 + $0x6c] sm:$0xf]  ;;  %v3900_v30 = vpop.permute.xlu2 %3899 }
 0x233   : > { %v4098_v39 = vsel %vm1631_vm13, %v4094_v4, %v4097_v56  ;;  %v4903_v38 = vrot.slane %v4840_v61, 1  ;;  %3987 = vrot.lane.b32.xlu0 %v3966_v45, %s6416_s30  ;;  %v3818_v37 = vunpack.c.l.b16 %v3754_v16  ;;  %v3887_v50 = vpack.c.b16 %v3871_v59, %v3871_v59  ;;  %v7596_v4 = vld [vmem:[#allocation3 + $0xc] sm:$0xe] }
 0x234   : > { %v2970_v36 = vsel %vm6493_vm5, %v2962_v13, %v2969_v26  ;;  %v3211_v46 = vsel %vm6715_vm7, %v2971_v17, %v3210_v23  ;;  %v2766_v21 = vpack.c.bf16 %v2734_v20, %v2734_v20  ;;  %5694 = vmatmul.msk.bf16.vlgmr.msrb.gmra.mxu3 %vm1805_vm11, %v4098_v39  ;;  %v6198_v13 = vld [vmem:[#allocation3 + $0x48] sm:$0xe] }
 0x235   : > { %3209 = vst.msk [vmem:[#allocation3 + $0x64] sm:$0xf] %vm280_vm0, %v2970_v36  ;;  %v3529_v1 = vpop.permute.xlu0 %3528  ;;  %v2612_v27 = vpop.f32.mrf.mxu2  ;;  %v4905_v51 = vsel %vm2448_vm12, %v4903_v38, %v4904_v48  ;;  %v6199_v18 = vor.u32 %v6198_v13, %v6197_v44  ;;  %v3834_v11 = vpack.c.b16 %v3818_v37, %v3818_v37  ;;  %v6225_v48 = vld [vmem:[#allocation3 + $0x60] sm:$0xe] }
 0x236   : > { %v1912_v34 = vpop.f32.mrf.mxu0  ;;  %3212 = vst [vmem:[#allocation3 + $0x68] sm:$0x1] %v3211_v46  ;;  %v2973_v53 = vshrl.u32 %v2766_v21, 16  ;;  %v2667_v43 = vadd.f32 %v2612_v27, %v2043_v35  ;;  %5737 = vmatmul.msk.bf16.vlgmr.msrb.gmra.mxu1 %vm1805_vm11, %v4905_v51  ;;  %v2976_v33 = vshll.u32 %v2766_v21, 16  ;;  %v3675_v45 = vsel %vm1210_vm10, %v3271_v63, %v3529_v1  ;;  %v3217_v27 = vld [vmem:[#allocation3 + $0x74] sm:$0x1] }
 0x237   : > { %v7589_v25 = vpop.f32.mrf.mxu3  ;;  %4689 = vrot.lane.b32.xlu1 %v6199_v18, %s6417_s8  ;;  %v2046_v62 = vadd.f32 %v2045_v31, %v1912_v34  ;;  %v2047_v23 = vpop.f32.mrf.mxu1  ;;  %v4014_v17 = vsel %vm1210_vm10, %v3834_v11, %v3900_v30 }
 0x238   : > { %v7591_v12 = vrot.slane %v2973_v53, 7  ;;  %v2703_v14 = vadd.f32 %v7526_v0, %v2667_v43  ;;  %v3641_v32 = vpop.permute.xlu1 %3640 }
 0x239   : > { %3909 = vrot.lane.b32.xlu2 %v3887_v50, %s6417_s8 }
 0x23a   : > { %v2978_v15 = vor.u32 %v2976_v33, %v7591_v12  ;;  %v2735_v40 = vmax.f32 %v2703_v14, 0.0  ;;  %v2979_v37 = vrot.slane %v7591_v12, 4 }
 0x23b   : > { %3538 = vrot.lane.b32.xlu0 %v3313_v28, %s6417_s8  ;;  %v3721_v28 = vsel %vm1259_vm9, %v3675_v45, %v3641_v32 }
 0x23c   : > { %v3214_v22 = vsel %vm6503_vm6, %v2978_v15, %v3213_v60  ;;  %v2767_v56 = vpack.c.bf16 %v2735_v40, %v2735_v40  ;;  %v6224_v52 = vld [vmem:[#allocation3 + $0x60] sm:$0xf0]  ;;  %v4101_v38 = vshll.u32 %v3721_v28, 16  ;;  %5715 = vmatmul.msk.bf16.gmra.mxu0 %vm1805_vm11, %v3721_v28  ;;  %v4099_v51 = vshrl.u32 %v3721_v28, 16  ;;  %v4762_v40 = vpop.permute.xlu2 %4761 }
 0x23d   : > { %3215 = vst [vmem:[#allocation3 + $0x6c] sm:$0xf] %v3214_v22  ;;  %v2615_v19 = vpop.f32.mrf.mxu2  ;;  %v3791_v26 = vld [vmem:[#allocation3 + $0x68] sm:$0x1]  ;;  %v6226_v46 = vor.u32 %v6225_v48, %v6224_v52  ;;  %v6162_v13 = vld [vmem:[#allocation3 + $0x60] sm:$0xff]   ;;  %v6325_v15 = vor.u32 %v7596_v4, %v7583_v41 }
 0x23e   : > { %v2981_v20 = vshrl.u32 %v2767_v56, 16  ;;  %v1914_v61 = vpop.f32.mrf.mxu0  ;;  %v2668_v39 = vadd.f32 %v2615_v19, %v2046_v62  ;;  %v3951_v36 = vunpack.c.l.b16 %v3791_v26  ;;  %v2984_v34 = vshll.u32 %v2767_v56, 16  ;;  %v3776_v1 = vld [vmem:[#allocation3 + $0x68] sm:$0x1]  ;;  %v6327_v62 = vld [vmem:[#allocation3 + $0x54] sm:$0xe] }
 0x23f   : > { %v3980_v35 = vpop.permute.xlu0 %3979  ;;  %v2075_v16 = vpop.f32.mrf.mxu3  ;;  %v4103_v53 = vrot.slane %v4101_v38, 1  ;;  %3650 = vrot.lane.b32.xlu1 %v6162_v13, %s6416_s30  ;;  %v2048_v11 = vadd.f32 %v2047_v23, %v1914_v61  ;;  %v5845_v61 = vld [vmem:[%s6480_s29 + $0x10] sm:$0xff] }
 0x240   : > { %v7606_v31 = vsel %vm1259_vm9, %v4014_v17, %v3980_v35  ;;  %v2983_v21 = vrot.slane %v2981_v20, 7  ;;  %v2704_v59 = vadd.f32 %v7526_v0, %v2668_v39  ;;  %v7612_v43 = vadd.f32 %v2075_v16, %v7500_v54  ;;  %v4682_v56 = vpop.permute.xlu1 %4681  ;;  %v2050_v19 = vpop.f32.mrf.mxu1  ;;  %v3755_v35 = vld [vmem:[#allocation3 + $0x20] sm:$0x1]  ;;  %5819 = vmatmul.msk.bf16.gmra.mxu2 %vm1210_vm10, %v5845_v61 }
 0x241   : > { %v4105_v63 = vshll.u32 %v7606_v31, 16  ;;  %v3967_v44 = vpack.c.b16 %v3951_v36, %v3951_v36  ;;  %4771 = vrot.lane.b32.xlu2 %v6226_v46, %s6416_s30  ;;  %v4104_v18 = vor.u32 %v4103_v53, %v4099_v51  ;;  %v3872_v54 = vunpack.c.l.b16 %v3776_v1  ;;  %v3220_v36 = vld [vmem:[#allocation3 + $0x78] sm:$0xf]  ;;  %v3224_v61 = vld [vmem:[#allocation3 + $0x80] sm:$0x1] }
 0x242   : > { %v2986_v33 = vor.u32 %v2984_v34, %v2983_v21  ;;  %v2988_v14 = vrot.slane %v2983_v21, 4  ;;  %v2736_v50 = vmax.f32 %v2704_v59, 0.0  ;;  %v4796_v4 = vsel %vm1210_vm10, %v6325_v15, %v4682_v56  ;;  %v7637_v21 = vld [vmem:[#allocation3 + $0x18] sm:$0xf0]  ;;  %v7645_v51 = vld [vmem:[#allocation3 + $0x18] sm:$0xe] }
 0x243   : > { %v4107_v60 = vrot.slane %v4105_v63, 1  ;;  %3989 = vrot.lane.b32.xlu0 %v3967_v44, %s6416_s30  ;;  %v4907_v26 = vrot.slane %v7606_v31, 1  ;;  %v4842_v23 = vsel %vm1259_vm9, %v4796_v4, %v4762_v40  ;;  %v3888_v20 = vpack.c.b16 %v3872_v54, %v3872_v54 }
 0x244   : > { %v2987_v12 = vsel %vm6493_vm5, %v2979_v37, %v2986_v33  ;;  %v3218_v30 = vsel %vm6715_vm7, %v2988_v14, %v3217_v27  ;;  %v2768_v22 = vpack.c.bf16 %v2736_v50, %v2736_v50  ;;  %v4906_v38 = vrot.slane %v4842_v23, 1  ;;  %v6400_v59 = vld [vmem:[#allocation3 + $0x6c] sm:$0xe]  ;;  %v3902_v15 = vpop.permute.xlu2 %3901 }
 0x245   : > { %3216 = vst.msk [vmem:[#allocation3 + $0x70] sm:$0xf] %vm280_vm0, %v2987_v12  ;;  %v2617_v52 = vpop.f32.mrf.mxu2  ;;  %v4108_v45 = vsel %vm1631_vm13, %v4104_v18, %v4107_v60  ;;  %v6328_v46 = vor.u32 %v6327_v62, %v7573_v47  ;;  %v3819_v1 = vunpack.c.l.b16 %v3755_v35  ;;  %v6172_v14 = vor.u32 %v7645_v51, %v7637_v21  ;;  %v6145_v60 = vld [vmem:[#allocation3 + $0x18] sm:$0xff]  }
 0x246   : > { %3219 = vst [vmem:[#allocation3 + $0x74] sm:$0x1] %v3218_v30  ;;  %v2990_v41 = vshrl.u32 %v2768_v22, 16  ;;  %v2669_v32 = vadd.f32 %v2617_v52, %v2048_v11  ;;  %5695 = vmatmul.msk.bf16.gmra.mxu3 %vm1805_vm11, %v4108_v45  ;;  %v2993_v39 = vshll.u32 %v2768_v22, 16  ;;  %v1917_v48 = vpop.f32.mrf.mxu0  ;;  %v4908_v63 = vsel %vm2448_vm12, %v4906_v38, %v4907_v26 }
 0x247   : > { %v7630_v17 = vpop.f32.mrf.mxu3  ;;  %v3531_v27 = vpop.permute.xlu0 %3530  ;;  %4691 = vrot.lane.b32.xlu1 %v6328_v46, %s6417_s8  ;;  %v2051_v53 = vadd.f32 %v2050_v19, %v1917_v48  ;;  %5738 = vmatmul.msk.bf16.gmra.mxu1 %vm1805_vm11, %v4908_v63  ;;  %v2061_v50 = vadd.f32 %v7521_v3, %v7411_v24  ;;  %v3835_v22 = vpack.c.b16 %v3819_v1, %v3819_v1 }
 0x248   : > { %v7633_v28 = vrot.slane %v2990_v41, 7  ;;  %v2705_v16 = vadd.f32 %v7526_v0, %v2669_v32  ;;  %v3678_v54 = vsel %vm1210_vm10, %v6145_v60, %v3531_v27  ;;  %v2063_v26 = vadd.f32 %v7536_v6, %v7427_v9  ;;  %v6201_v27 = vld [vmem:[#allocation3 + $0x60] sm:$0xe] }
 0x249   : > { %3911 = vrot.lane.b32.xlu2 %v3888_v20, %s6417_s8  ;;  %v2052_v20 = vpop.f32.mrf.mxu1 }
 0x24a   : > { %v2995_v31 = vor.u32 %v2993_v39, %v7633_v28  ;;  %v2737_v34 = vmax.f32 %v2705_v16, 0.0  ;;  %v2996_v23 = vrot.slane %v7633_v28, 4 }
 0x24b   : > { %3540 = vrot.lane.b32.xlu0 %v6162_v13, %s6417_s8 }
 0x24c   : > { %v3221_v47 = vsel %vm6503_vm6, %v2995_v31, %v3220_v36  ;;  %v2769_v44 = vpack.c.bf16 %v2737_v34, %v2737_v34  ;;  %v3349_v37 = vld [vmem:[#allocation3 + $0x6c] sm:$0xff]   ;;  %v6200_v31 = vld [vmem:[#allocation3 + $0x60] sm:$0xf0]  ;;  %v4017_v34 = vsel %vm1210_vm10, %v3835_v22, %v3902_v15 }
 0x24d   : > { %v6399_v33 = vld [vmem:[#allocation3 + $0x6c] sm:$0xf0]  ;;  %3222 = vst [vmem:[#allocation3 + $0x78] sm:$0xf] %v3221_v47  ;;  %v3792_v18 = vld [vmem:[#allocation3 + $0x74] sm:$0x1] }
 0x24e   : > { %v2620_v13 = vpop.f32.mrf.mxu2  ;;  %v2998_v40 = vshrl.u32 %v2769_v44, 16  ;;  %v3952_v11 = vunpack.c.l.b16 %v3792_v18  ;;  %v6401_v52 = vor.u32 %v6400_v59, %v6399_v33  ;;  %v3001_v41 = vshll.u32 %v2769_v44, 16  ;;  %v3777_v4 = vld [vmem:[#allocation3 + $0x74] sm:$0x1]  ;;  %v3317_v32 = vld [vmem:[#allocation3 + $0x6c] sm:$0xff]   ;;  %v1919_v16 = vpop.f32.mrf.mxu0 }
 0x24f   : > { %v2670_v12 = vadd.f32 %v2620_v13, %v2051_v53  ;;  %v3643_v30 = vpop.permute.xlu1 %3642  ;;  %v7658_v19 = vld [vmem:[#allocation3 + $0x6c] sm:$0xf0]  ;;  %3652 = vrot.lane.b32.xlu1 %v3349_v37, %s6416_s30  ;;  %v3873_v9 = vunpack.c.l.b16 %v3777_v4  ;;  %v2053_v47 = vadd.f32 %v2052_v20, %v1919_v16  ;;  %v4764_v37 = vpop.permute.xlu2 %4763  ;;  %v7690_v16 = vld [vmem:[#allocation3 + $0x2c] sm:$0x1] }
 0x250   : > { %v3723_v56 = vsel %vm1259_vm9, %v3678_v54, %v3643_v30  ;;  %v3000_v45 = vrot.slane %v2998_v40, 7  ;;  %v3968_v39 = vpack.c.b16 %v3952_v11, %v3952_v11 }
 0x251   : > { %v2630_v62 = vpop.f32.mrf.mxu3  ;;  %v2706_v24 = vadd.f32 %v7526_v0, %v2670_v12  ;;  %5716 = vmatmul.msk.bf16.gmra.mxu0 %vm1805_vm11, %v3723_v56  ;;  %v4111_v35 = vshll.u32 %v3723_v56, 16  ;;  %4773 = vrot.lane.b32.xlu2 %v6401_v52, %s6416_s30  ;;  %v4109_v18 = vshrl.u32 %v3723_v56, 16  ;;  %v3889_v11 = vpack.c.b16 %v3873_v9, %v3873_v9 }
 0x252   : > { %v2674_v3 = vadd.f32 %v2630_v62, %v2061_v50  ;;  %v3003_v48 = vor.u32 %v3001_v41, %v3000_v45  ;;  %v3005_v38 = vrot.slane %v3000_v45, 4  ;;  %v6202_v50 = vor.u32 %v6201_v27, %v6200_v31  ;;  %v3227_v41 = vld [vmem:[#allocation3 + $0x84] sm:$0xf]  ;;  %v7701_v27 = vld [vmem:[#allocation3 + $0x24] sm:$0xf0] }
 0x253   : > { %v2738_v36 = vmax.f32 %v2706_v24, 0.0  ;;  %3991 = vrot.lane.b32.xlu0 %v3968_v39, %s6416_s30  ;;  %v4113_v53 = vrot.slane %v4111_v35, 1 }
 0x254   : > { %v2710_v46 = vadd.f32 %v7526_v0, %v2674_v3  ;;  %v3004_v6 = vsel %vm6493_vm5, %v2996_v23, %v3003_v48  ;;  %v3225_v28 = vsel %vm6715_vm7, %v3005_v38, %v3224_v61  ;;  %v3982_v1 = vpop.permute.xlu0 %3981  ;;  %v2055_v3 = vpop.f32.mrf.mxu1 }
 0x255   : > { %v2770_v63 = vpack.c.bf16 %v2738_v36, %v2738_v36  ;;  %3223 = vst.msk [vmem:[#allocation3 + $0x7c] sm:$0xf] %vm280_vm0, %v3004_v6  ;;  %v4062_v44 = vsel %vm1259_vm9, %v4017_v34, %v3982_v1  ;;  %v4114_v24 = vor.u32 %v4113_v53, %v4109_v18  ;;  %v7699_v1 = vld [vmem:[#allocation3 + $0x24] sm:$0xff]  }
 0x256   : > { %v2742_v59 = vmax.f32 %v2710_v46, 0.0  ;;  %v2622_v33 = vpop.f32.mrf.mxu2  ;;  %3226 = vst [vmem:[#allocation3 + $0x80] sm:$0x1] %v3225_v28  ;;  %v4115_v15 = vshll.u32 %v4062_v44, 16  ;;  %v4910_v35 = vrot.slane %v4062_v44, 1 }
 0x257   : > { %v3007_v60 = vshrl.u32 %v2770_v63, 16  ;;  %v4684_v54 = vpop.permute.xlu1 %4683  ;;  %v2671_v40 = vadd.f32 %v2622_v33, %v2053_v47  ;;  %v3010_v62 = vshll.u32 %v2770_v63, 16  ;;  %4693 = vrot.lane.b32.xlu1 %v6202_v50, %s6417_s8  ;;  %v6228_v50 = vld [vmem:[#allocation3 + $0x78] sm:$0xe] }
 0x258   : > { %v2774_v13 = vpack.c.bf16 %v2742_v59, %v2742_v59  ;;  %v4799_v30 = vsel %vm1210_vm10, %v6172_v14, %v4684_v54  ;;  %v4117_v45 = vrot.slane %v4115_v15, 1  ;;  %v3241_v14 = vld [vmem:[#allocation3 + $0x9c] sm:$0xf] }
 0x259   : > { %v2632_v12 = vpop.f32.mrf.mxu3  ;;  %v7678_v22 = vrot.slane %v3007_v60, 7  ;;  %v2707_v56 = vadd.f32 %v7526_v0, %v2671_v40  ;;  %v4844_v23 = vsel %vm1259_vm9, %v4799_v30, %v4764_v37  ;;  %3913 = vrot.lane.b32.xlu2 %v3889_v11, %s6417_s8  ;;  %v3820_v37 = vunpack.c.l.b16 %v7690_v16  ;;  %v7705_v60 = vpop.permute.xlu2 %3903  ;;  %v5846_v11 = vld [vmem:[%s6480_s29 + $0x18] sm:$0xff] }
 0x25a   : > { %v3041_v52 = vshrl.u32 %v2774_v13, 16  ;;  %v2675_v4 = vadd.f32 %v2632_v12, %v2063_v26  ;;  %v3044_v21 = vshll.u32 %v2774_v13, 16  ;;  %v4909_v51 = vrot.slane %v4844_v23, 1  ;;  %5820 = vmatmul.msk.bf16.gmra.mxu2 %vm1210_vm10, %v5846_v11 }
 0x25b   : > { %v3012_v20 = vor.u32 %v3010_v62, %v7678_v22  ;;  %v2739_v39 = vmax.f32 %v2707_v56, 0.0  ;;  %3542 = vrot.lane.b32.xlu0 %v3317_v32, %s6417_s8  ;;  %v4118_v26 = vsel %vm1631_vm13, %v4114_v24, %v4117_v45  ;;  %v2066_v62 = vadd.f32 %v7543_v5, %v7447_v8  ;;  %v3231_v45 = vld [vmem:[#allocation3 + $0x8c] sm:$0x1]  ;;  %v3245_v5 = vld [vmem:[#allocation3 + $0xa4] sm:$0x1] }
 0x25c   : > { %v7683_v61 = vrot.slane %v3041_v52, 7  ;;  %v2711_v48 = vadd.f32 %v7526_v0, %v2675_v4  ;;  %v1922_v38 = vpop.f32.mrf.mxu0  ;;  %5696 = vmatmul.msk.bf16.gmra.mxu3 %vm1805_vm11, %v4118_v26  ;;  %v6227_v34 = vld [vmem:[#allocation3 + $0x78] sm:$0xf0]  ;;  %v4911_v32 = vsel %vm2448_vm12, %v4909_v51, %v4910_v35  ;;  %v3013_v52 = vrot.slane %v7678_v22, 4 }
 0x25d   : > { %v3228_v36 = vsel %vm6503_vm6, %v3012_v20, %v3227_v41  ;;  %v2056_v31 = vadd.f32 %v2055_v3, %v1922_v38  ;;  %v2771_v9 = vpack.c.bf16 %v2739_v39, %v2739_v39  ;;  %v3793_v63 = vld [vmem:[#allocation3 + $0x80] sm:$0x1]  ;;  %5739 = vmatmul.msk.bf16.gmra.mxu1 %vm1805_vm11, %v4911_v32  ;;  %v6229_v15 = vor.u32 %v6228_v50, %v6227_v34  ;;  %v3533_v41 = vpop.permute.xlu0 %3532  ;;  %v6163_v3 = vld [vmem:[#allocation3 + $0x78] sm:$0xff]  }
 0x25e   : > { %v3046_v46 = vor.u32 %v3044_v21, %v7683_v61  ;;  %3229 = vst [vmem:[#allocation3 + $0x84] sm:$0xf] %v3228_v36  ;;  %v2743_v6 = vmax.f32 %v2711_v48, 0.0  ;;  %v3953_v53 = vunpack.c.l.b16 %v3793_v63  ;;  %v3778_v30 = vld [vmem:[#allocation3 + $0x80] sm:$0x1]  ;;  %v2057_v21 = vpop.f32.mrf.mxu1  ;;  %v3047_v8 = vrot.slane %v7683_v61, 4 }
 0x25f   : > { %v3015_v44 = vshrl.u32 %v2771_v9, 16  ;;  %v3018_v40 = vshll.u32 %v2771_v9, 16  ;;  %3654 = vrot.lane.b32.xlu1 %v6163_v3, %s6416_s30  ;;  %v3874_v39 = vunpack.c.l.b16 %v3778_v30  ;;  %v6330_v48 = vld [vmem:[#allocation3 + $0x6c] sm:$0xe] }
 0x260   : > { %v2625_v28 = vpop.f32.mrf.mxu2  ;;  %v3242_v59 = vsel %vm6503_vm6, %v3046_v46, %v3241_v14  ;;  %v2775_v33 = vpack.c.bf16 %v2743_v6, %v2743_v6  ;;  %v3969_v18 = vpack.c.b16 %v3953_v53, %v3953_v53  ;;  %v7715_v14 = vld [vmem:[#allocation3 + $0x24] sm:$0xe] }
 0x261   : > { %v2672_v47 = vadd.f32 %v2625_v28, %v2056_v31  ;;  %3243 = vst [vmem:[#allocation3 + $0x9c] sm:$0xf] %v3242_v59  ;;  %v3017_v54 = vrot.slane %v3015_v44, 7  ;;  %4775 = vrot.lane.b32.xlu2 %v6229_v15, %s6416_s30  ;;  %v7728_v32 = vpop.permute.xlu2 %4765  ;;  %v3890_v53 = vpack.c.b16 %v3874_v39, %v3874_v39  ;;  %v3836_v44 = vpack.c.b16 %v3820_v37, %v3820_v37 }
 0x262   : > { %v3049_v12 = vshrl.u32 %v2775_v33, 16  ;;  %v3052_v20 = vshll.u32 %v2775_v33, 16  ;;  %v3234_v33 = vld [vmem:[#allocation3 + $0x90] sm:$0xf]  ;;  %v3681_v15 = vsel %vm1210_vm10, %v7699_v1, %v3533_v41  ;;  %v6334_v30 = vor.u32 %v7715_v14, %v7701_v27 }
 0x263   : > { %v2708_v13 = vadd.f32 %v7526_v0, %v2672_v47  ;;  %v3020_v56 = vor.u32 %v3018_v40, %v3017_v54  ;;  %v3022_v4 = vrot.slane %v3017_v54, 4  ;;  %3993 = vrot.lane.b32.xlu0 %v3969_v18, %s6416_s30  ;;  %v2068_v37 = vadd.f32 %v7552_v57, %v7464_v29 }
 0x264   : > { %v3051_v23 = vrot.slane %v3049_v12, 7  ;;  %v1924_v51 = vpop.f32.mrf.mxu0  ;;  %v4020_v11 = vsel %vm1210_vm10, %v3836_v44, %v7705_v60 }
 0x265   : > { %v2740_v24 = vmax.f32 %v2708_v13, 0.0  ;;  %v2058_v35 = vadd.f32 %v2057_v21, %v1924_v51  ;;  %v3021_v26 = vsel %vm6493_vm5, %v3013_v52, %v3020_v56  ;;  %v3232_v38 = vsel %vm6715_vm7, %v3022_v4, %v3231_v45  ;;  %v6403_v18 = vld [vmem:[#allocation3 + $0x84] sm:$0xe] }
 0x266   : > { %v3054_v16 = vor.u32 %v3052_v20, %v3051_v23  ;;  %v3056_v36 = vrot.slane %v3051_v23, 4  ;;  %3230 = vst.msk [vmem:[#allocation3 + $0x88] sm:$0xf] %vm280_vm0, %v3021_v26  ;;  %v6331_v13 = vor.u32 %v6330_v48, %v7658_v19  ;;  %v3238_v48 = vld [vmem:[#allocation3 + $0x98] sm:$0x1] }
 0x267   : > { %v2772_v22 = vpack.c.bf16 %v2740_v24, %v2740_v24  ;;  %3233 = vst [vmem:[#allocation3 + $0x8c] sm:$0x1] %v3232_v38 }
 0x268   : > { %v2627_v46 = vpop.f32.mrf.mxu2  ;;  %v2635_v34 = vpop.f32.mrf.mxu3  ;;  %v3055_v9 = vsel %vm6493_vm5, %v3047_v8, %v3054_v16  ;;  %v3246_v6 = vsel %vm6715_vm7, %v3056_v36, %v3245_v5  ;;  %4695 = vrot.lane.b32.xlu1 %v6331_v13, %s6417_s8 }
 0x269   : > { %v3024_v31 = vshrl.u32 %v2772_v22, 16  ;;  %v2673_v61 = vadd.f32 %v2627_v46, %v2058_v35  ;;  %v2676_v28 = vadd.f32 %v2635_v34, %v2066_v62  ;;  %3244 = vst.msk [vmem:[#allocation3 + $0xa0] sm:$0xf] %vm280_vm0, %v3055_v9  ;;  %v3027_v59 = vshll.u32 %v2772_v22, 16  ;;  %3915 = vrot.lane.b32.xlu2 %v3890_v53, %s6417_s8  ;;  %v7756_v36 = vpop.permute.xlu2 %3905 }
 0x26a   : > { %3247 = vst [vmem:[#allocation3 + $0xa4] sm:$0x1] %v3246_v6  ;;  %v3645_v12 = vpop.permute.xlu1 %3644 }
 0x26b   : > { %v7731_v63 = vrot.slane %v3024_v31, 7  ;;  %v2709_v47 = vadd.f32 %v7526_v0, %v2673_v61  ;;  %v2712_v50 = vadd.f32 %v7526_v0, %v2676_v28  ;;  %3544 = vrot.lane.b32.xlu0 %v6163_v3, %s6417_s8  ;;  %v3725_v62 = vsel %vm1259_vm9, %v3681_v15, %v3645_v12  ;;  %v3248_v61 = vld [vmem:[#allocation3 + $0xa8] sm:$0xf] }
 0x26c   : > { %5717 = vmatmul.msk.bf16.gmra.mxu0 %vm1805_vm11, %v3725_v62  ;;  %v4121_v41 = vshll.u32 %v3725_v62, 16  ;;  %v4119_v4 = vshrl.u32 %v3725_v62, 16  ;;  %v6204_v62 = vld [vmem:[#allocation3 + $0x78] sm:$0xe] }
 0x26d   : > { %v3029_v54 = vor.u32 %v3027_v59, %v7731_v63  ;;  %v2741_v40 = vmax.f32 %v2709_v47, 0.0  ;;  %v2744_v19 = vmax.f32 %v2712_v50, 0.0  ;;  %v3030_v29 = vrot.slane %v7731_v63, 4  ;;  %v3353_v24 = vld [vmem:[#allocation3 + $0x84] sm:$0xff]  }
 0x26e   : > { %v6402_v56 = vld [vmem:[#allocation3 + $0x84] sm:$0xf0]  ;;  %v3794_v20 = vld [vmem:[#allocation3 + $0x8c] sm:$0x1]  ;;  %v4123_v8 = vrot.slane %v4121_v41, 1  ;;  %v2071_v63 = vadd.f32 %v7566_v58, %v7481_v55 }
 0x26f   : > { %v3984_v1 = vpop.permute.xlu0 %3983  ;;  %v3235_v52 = vsel %vm6503_vm6, %v3029_v54, %v3234_v33  ;;  %v2773_v45 = vpack.c.bf16 %v2741_v40, %v2741_v40  ;;  %v2776_v57 = vpack.c.bf16 %v2744_v19, %v2744_v19  ;;  %v3954_v35 = vunpack.c.l.b16 %v3794_v20  ;;  %v3779_v28 = vld [vmem:[#allocation3 + $0x8c] sm:$0x1]  ;;  %v3321_v44 = vld [vmem:[#allocation3 + $0x84] sm:$0xff]  }
 0x270   : > { %v4064_v27 = vsel %vm1259_vm9, %v4020_v11, %v3984_v1  ;;  %3236 = vst [vmem:[#allocation3 + $0x90] sm:$0xf] %v3235_v52  ;;  %v2637_v23 = vpop.f32.mrf.mxu3  ;;  %v6404_v39 = vor.u32 %v6403_v18, %v6402_v56  ;;  %v4124_v16 = vor.u32 %v4123_v8, %v4119_v4  ;;  %3656 = vrot.lane.b32.xlu1 %v3353_v24, %s6416_s30  ;;  %v7766_v33 = vld [vmem:[#allocation3 + $0x84] sm:$0xf0]  ;;  %v3875_v54 = vunpack.c.l.b16 %v3779_v28  ;;  %v3252_v24 = vld [vmem:[#allocation3 + $0xb0] sm:$0x1] }
 0x271   : > { %v4125_v60 = vshll.u32 %v4064_v27, 16  ;;  %v3032_v3 = vshrl.u32 %v2773_v45, 16  ;;  %v3035_v21 = vshll.u32 %v2773_v45, 16  ;;  %v3058_v51 = vshrl.u32 %v2776_v57, 16  ;;  %v5847_v19 = vld [vmem:[%s6480_s29 + $0x20] sm:$0xff] }
 0x272   : > { %v3061_v14 = vshll.u32 %v2776_v57, 16  ;;  %v2677_v22 = vadd.f32 %v2637_v23, %v2068_v37  ;;  %v3970_v9 = vpack.c.b16 %v3954_v35, %v3954_v35  ;;  %4777 = vrot.lane.b32.xlu2 %v6404_v39, %s6416_s30  ;;  %v4686_v6 = vpop.permute.xlu1 %4685  ;;  %v4913_v18 = vrot.slane %v4064_v27, 1  ;;  %v7785_v52 = vld [vmem:[%s8238_s2] ss:$0 sm:$0xff]  ;;  %5821 = vmatmul.msk.bf16.gmra.mxu2 %vm1210_vm10, %v5847_v19  ;;  %v7789_v57 = vpop.permute.xlu2 %4767  ;;  %v6174_v19 = vld [vmem:[#allocation3 + $0x30] sm:$0xe] }
 0x273   : > { %v3034_v5 = vrot.slane %v3032_v3, 7  ;;  %v7754_v26 = vrot.slane %v3058_v51, 7  ;;  %v4127_v38 = vrot.slane %v4125_v60, 1  ;;  %v4802_v47 = vsel %vm1210_vm10, %v6334_v30, %v4686_v6  ;;  %v6203_v30 = vld [vmem:[#allocation3 + $0x78] sm:$0xf0] }
 0x274   : > { %v2713_v34 = vadd.f32 %v7526_v0, %v2677_v22  ;;  %3995 = vrot.lane.b32.xlu0 %v3970_v9, %s6416_s30  ;;  %v4846_v55 = vsel %vm1259_vm9, %v4802_v47, %v7728_v32  ;;  %v3891_v1 = vpack.c.b16 %v3875_v54, %v3875_v54  ;;  %v6205_v27 = vor.u32 %v6204_v62, %v6203_v30 }
 0x275   : > { %v3037_v46 = vor.u32 %v3035_v21, %v3034_v5  ;;  %v3039_v31 = vrot.slane %v3034_v5, 4  ;;  %v3063_v59 = vor.u32 %v3061_v14, %v7754_v26  ;;  %v4128_v53 = vsel %vm1631_vm13, %v4124_v16, %v4127_v38  ;;  %v6146_v14 = vld [vmem:[#allocation3 + $0x30] sm:$0xff]  }
 0x276   : > { %v2745_v13 = vmax.f32 %v2713_v34, 0.0  ;;  %5697 = vmatmul.msk.bf16.gmra.mxu3 %vm1805_vm11, %v4128_v53  ;;  %v4912_v15 = vrot.slane %v4846_v55, 1  ;;  %v3064_v4 = vrot.slane %v7754_v26, 4  ;;  %v2073_v21 = vadd.f32 %v7589_v25, %v7489_v42  ;;  %v3255_v53 = vld [vmem:[#allocation3 + $0xb4] sm:$0xf] }
 0x277   : > { %v3038_v0 = vsel %vm6493_vm5, %v3030_v29, %v3037_v46  ;;  %v3239_v50 = vsel %vm6715_vm7, %v3039_v31, %v3238_v48  ;;  %v3249_v58 = vsel %vm6503_vm6, %v3063_v59, %v3248_v61  ;;  %v3757_v29 = vld [vmem:[#allocation3 + $0x38] sm:$0x1]  ;;  %v3535_v56 = vpop.permute.xlu0 %3534  ;;  %v6231_v31 = vld [vmem:[#allocation3 + $0x90] sm:$0xe] }
 0x278   : > { %3237 = vst.msk [vmem:[#allocation3 + $0x94] sm:$0xf] %vm280_vm0, %v3038_v0  ;;  %v2777_v40 = vpack.c.bf16 %v2745_v13, %v2745_v13  ;;  %v2640_v12 = vpop.f32.mrf.mxu3  ;;  %v4914_v11 = vsel %vm2448_vm12, %v4912_v15, %v4913_v18  ;;  %4697 = vrot.lane.b32.xlu1 %v6205_v27, %s6417_s8  ;;  %v3821_v51 = vunpack.c.l.b16 %v3757_v29  ;;  %v3684_v48 = vsel %vm1210_vm10, %v6146_v14, %v3535_v56  ;;  %v6173_v18 = vld [vmem:[#allocation3 + $0x30] sm:$0xf0]  ;;  %v6336_v15 = vld [vmem:[#allocation3 + $0x84] sm:$0xe] }
 0x279   : > { %3240 = vst [vmem:[#allocation3 + $0x98] sm:$0x1] %v3239_v50  ;;  %v2678_v37 = vadd.f32 %v2640_v12, %v2071_v63  ;;  %5740 = vmatmul.msk.bf16.gmra.mxu1 %vm1805_vm11, %v4914_v11  ;;  %v6405_v14 = vld [vmem:[#allocation3 + $0x9c] sm:$0xf0] }
 0x27a   : > { %3250 = vst [vmem:[#allocation3 + $0xa8] sm:$0xf] %v3249_v58  ;;  %v3066_v32 = vshrl.u32 %v2777_v40, 16  ;;  %v3069_v41 = vshll.u32 %v2777_v40, 16  ;;  %3917 = vrot.lane.b32.xlu2 %v3891_v1, %s6417_s8  ;;  %v3837_v6 = vpack.c.b16 %v3821_v51, %v3821_v51  ;;  %v7810_v54 = vpop.permute.xlu2 %3907  ;;  %v6175_v1 = vor.u32 %v6174_v19, %v6173_v18  ;;  %v3357_v51 = vld [vmem:[#allocation3 + $0x9c] sm:$0xff]  }
 0x27b   : > { %v2714_v45 = vadd.f32 %v7785_v52, %v2678_v37  ;;  %v3266_v19 = vld [vmem:[#allocation3 + $0xc8] sm:$0x1] }
 0x27c   : > { %v3068_v60 = vrot.slane %v3066_v32, 7  ;;  %3546 = vrot.lane.b32.xlu0 %v3321_v44, %s6417_s8  ;;  %v4023_v0 = vsel %vm1210_vm10, %v3837_v6, %v7756_v36 }
 0x27d   : > { %v2746_v3 = vmax.f32 %v2714_v45, 0.0 }
 0x27e   : > { %v3071_v23 = vor.u32 %v3069_v41, %v3068_v60  ;;  %v3073_v20 = vrot.slane %v3068_v60, 4 }
 0x27f   : > { %v2778_v8 = vpack.c.bf16 %v2746_v3, %v2746_v3  ;;  %v6230_v22 = vld [vmem:[#allocation3 + $0x90] sm:$0xf0]  ;;  %v6337_v3 = vor.u32 %v6336_v15, %v7766_v33 }
 0x280   : > { %v3795_v5 = vld [vmem:[#allocation3 + $0x98] sm:$0x1]  ;;  %v3072_v35 = vsel %vm6493_vm5, %v3064_v4, %v3071_v23  ;;  %v3253_v39 = vsel %vm6715_vm7, %v3073_v20, %v3252_v24  ;;  %v2642_v26 = vpop.f32.mrf.mxu3  ;;  %v6232_v9 = vor.u32 %v6231_v31, %v6230_v22  ;;  %v6164_v44 = vld [vmem:[#allocation3 + $0x90] sm:$0xff]   ;;  %v6406_v22 = vld [vmem:[#allocation3 + $0x9c] sm:$0xe] }
 0x281   : > { %v3955_v16 = vunpack.c.l.b16 %v3795_v5  ;;  %3251 = vst.msk [vmem:[#allocation3 + $0xac] sm:$0xf] %vm280_vm0, %v3072_v35  ;;  %v3075_v46 = vshrl.u32 %v2778_v8, 16  ;;  %v2679_v42 = vadd.f32 %v2642_v26, %v2073_v21  ;;  %v3078_v63 = vshll.u32 %v2778_v8, 16  ;;  %v3780_v47 = vld [vmem:[#allocation3 + $0x98] sm:$0x1]  ;;  %3658 = vrot.lane.b32.xlu1 %v6164_v44, %s6416_s30 }
 0x282   : > { %v3647_v38 = vpop.permute.xlu1 %3646  ;;  %3254 = vst [vmem:[#allocation3 + $0xb0] sm:$0x1] %v3253_v39  ;;  %4779 = vrot.lane.b32.xlu2 %v6232_v9, %s6416_s30  ;;  %v3876_v12 = vunpack.c.l.b16 %v3780_v47  ;;  %v3259_v8 = vld [vmem:[#allocation3 + $0xbc] sm:$0x1]  ;;  %v2078_v26 = vadd.f32 %v7630_v17, %v7516_v2  ;;  %v6407_v9 = vor.u32 %v6406_v22, %v6405_v14  ;;  %v3262_v47 = vld [vmem:[#allocation3 + $0xc0] sm:$0xf] }
 0x283   : > { %v3727_v25 = vsel %vm1259_vm9, %v3684_v48, %v3647_v38  ;;  %v3971_v34 = vpack.c.b16 %v3955_v16, %v3955_v16  ;;  %v3077_v28 = vrot.slane %v3075_v46, 7  ;;  %v2715_v59 = vadd.f32 %v7785_v52, %v2679_v42  ;;  %v5848_v46 = vld [vmem:[%s6480_s29 + $0x28] sm:$0xff]  ;;  %v6339_v22 = vld [vmem:[#allocation3 + $0x9c] sm:$0xe] }
 0x284   : > { %v4131_v61 = vshll.u32 %v3727_v25, 16  ;;  %5718 = vmatmul.msk.bf16.gmra.mxu0 %vm1805_vm11, %v3727_v25  ;;  %v4129_v36 = vshrl.u32 %v3727_v25, 16  ;;  %v3892_v56 = vpack.c.b16 %v3876_v12, %v3876_v12  ;;  %5822 = vmatmul.msk.bf16.gmra.mxu2 %vm1210_vm10, %v5848_v46  ;;  %v6206_v15 = vld [vmem:[#allocation3 + $0x90] sm:$0xf0] }
 0x285   : > { %v3080_v50 = vor.u32 %v3078_v63, %v3077_v28  ;;  %v2747_v13 = vmax.f32 %v2715_v59, 0.0  ;;  %3997 = vrot.lane.b32.xlu0 %v3971_v34, %s6416_s30  ;;  %v3081_v33 = vrot.slane %v3077_v28, 4  ;;  %v3781_v59 = vld [vmem:[#allocation3 + $0xa4] sm:$0x1] }
 0x286   : > { %v4133_v55 = vrot.slane %v4131_v61, 1 }
 0x287   : > { %v3986_v58 = vpop.permute.xlu0 %3985  ;;  %v3256_v30 = vsel %vm6503_vm6, %v3080_v50, %v3255_v53  ;;  %v2779_v37 = vpack.c.bf16 %v2747_v13, %v2747_v13  ;;  %v3325_v50 = vld [vmem:[#allocation3 + $0x9c] sm:$0xff]  }
 0x288   : > { %v4066_v40 = vsel %vm1259_vm9, %v4023_v0, %v3986_v58  ;;  %3257 = vst [vmem:[#allocation3 + $0xb4] sm:$0xf] %v3256_v30  ;;  %v2645_v32 = vpop.f32.mrf.mxu3  ;;  %v4134_v27 = vor.u32 %v4133_v55, %v4129_v36  ;;  %v7843_v13 = vld [vmem:[#allocation3 + $0x9c] sm:$0xf0]  ;;  %v3877_v58 = vunpack.c.l.b16 %v3781_v59  ;;  %v6207_v30 = vld [vmem:[#allocation3 + $0x90] sm:$0xe] }
 0x289   : > { %v4135_v11 = vshll.u32 %v4066_v40, 16  ;;  %v3083_v45 = vshrl.u32 %v2779_v37, 16  ;;  %v2680_v60 = vadd.f32 %v2645_v32, %v7612_v43  ;;  %v3086_v41 = vshll.u32 %v2779_v37, 16  ;;  %4699 = vrot.lane.b32.xlu1 %v6337_v3, %s6417_s8  ;;  %v3797_v10 = vld [vmem:[#allocation3 + $0xb0] sm:$0x1] }
 0x28a   : > { %v4688_v62 = vpop.permute.xlu1 %4687  ;;  %v4916_v5 = vrot.slane %v4066_v40, 1  ;;  %3919 = vrot.lane.b32.xlu2 %v3892_v56, %s6417_s8  ;;  %v3893_v12 = vpack.c.b16 %v3877_v58, %v3877_v58  ;;  %v3782_v14 = vld [vmem:[#allocation3 + $0xb0] sm:$0x1] }
 0x28b   : > { %v4137_v29 = vrot.slane %v4135_v11, 1  ;;  %v4805_v24 = vsel %vm1210_vm10, %v6175_v1, %v4688_v62  ;;  %v3085_v4 = vrot.slane %v3083_v45, 7  ;;  %v2716_v23 = vadd.f32 %v7785_v52, %v2680_v60  ;;  %v7829_v38 = vpop.permute.xlu2 %4769  ;;  %v3758_v45 = vld [vmem:[#allocation3 + $0x44] sm:$0x1] }
 0x28c   : > { %v4848_v20 = vsel %vm1259_vm9, %v4805_v24, %v7789_v57  ;;  %v3796_v57 = vld [vmem:[#allocation3 + $0xa4] sm:$0x1]  ;;  %v6208_v11 = vor.u32 %v6207_v30, %v6206_v15 }
 0x28d   : > { %v4138_v21 = vsel %vm1631_vm13, %v4134_v27, %v4137_v29  ;;  %v4915_v43 = vrot.slane %v4848_v20, 1  ;;  %v3088_v35 = vor.u32 %v3086_v41, %v3085_v4  ;;  %v3090_v39 = vrot.slane %v3085_v4, 4  ;;  %3548 = vrot.lane.b32.xlu0 %v6164_v44, %s6417_s8  ;;  %v3279_v27 = vld [vmem:[#allocation3 + $0x3c] sm:$0xff]   ;;  %v6233_v4 = vld [vmem:[#allocation3 + $0xa8] sm:$0xf0] }
 0x28e   : > { %5698 = vmatmul.msk.bf16.gmra.mxu3 %vm1805_vm11, %v4138_v21  ;;  %v2748_v48 = vmax.f32 %v2716_v23, 0.0  ;;  %v3956_v2 = vunpack.c.l.b16 %v3796_v57  ;;  %v6341_v29 = vld [vmem:[#allocation3 + $0x3c] sm:$0xf0]  ;;  %v5849_v41 = vld [vmem:[%s6480_s29 + $0x30] sm:$0xff]  ;;  %v3957_v23 = vunpack.c.l.b16 %v3797_v10  ;;  %v3822_v20 = vunpack.c.l.b16 %v3758_v45  ;;  %v6234_v21 = vld [vmem:[#allocation3 + $0xa8] sm:$0xe] }
 0x28f   : > { %v4917_v16 = vsel %vm2448_vm12, %v4915_v43, %v4916_v5  ;;  %v3089_v42 = vsel %vm6493_vm5, %v3081_v33, %v3088_v35  ;;  %v3260_v25 = vsel %vm6715_vm7, %v3090_v39, %v3259_v8  ;;  %v3537_v24 = vpop.permute.xlu0 %3536  ;;  %v6165_v8 = vld [vmem:[#allocation3 + $0xa8] sm:$0xff]   ;;  %v3878_v43 = vunpack.c.l.b16 %v3782_v14 }
 0x290   : > { %v2780_v31 = vpack.c.bf16 %v2748_v48, %v2748_v48  ;;  %5741 = vmatmul.msk.bf16.gmra.mxu1 %vm1805_vm11, %v4917_v16  ;;  %3258 = vst.msk [vmem:[#allocation3 + $0xb8] sm:$0xf] %vm280_vm0, %v3089_v42  ;;  %v2647_v61 = vpop.f32.mrf.mxu3  ;;  %v3972_v53 = vpack.c.b16 %v3956_v2, %v3956_v2  ;;  %v3973_v5 = vpack.c.b16 %v3957_v23, %v3957_v23  ;;  %v6342_v42 = vld [vmem:[#allocation3 + $0x3c] sm:$0xe] }
 0x291   : > { %3261 = vst [vmem:[#allocation3 + $0xbc] sm:$0x1] %v3260_v25  ;;  %v2681_v34 = vadd.f32 %v2647_v61, %v2078_v26  ;;  %3660 = vrot.lane.b32.xlu1 %v3357_v51, %s6416_s30  ;;  %v6235_v51 = vor.u32 %v6234_v21, %v6233_v4  ;;  %v3838_v7 = vpack.c.b16 %v3822_v20, %v3822_v20 }
 0x292   : > { %v3092_v17 = vshrl.u32 %v2780_v31, 16  ;;  %v3095_v28 = vshll.u32 %v2780_v31, 16  ;;  %4781 = vrot.lane.b32.xlu2 %v6407_v9, %s6416_s30  ;;  %v3687_v35 = vsel %vm1210_vm10, %v3279_v27, %v3537_v24  ;;  %v3894_v25 = vpack.c.b16 %v3878_v43, %v3878_v43 }
 0x293   : > { %v2717_v63 = vadd.f32 %v7785_v52, %v2681_v34  ;;  %v7846_v55 = vpop.permute.xlu2 %3909  ;;  %v4026_v33 = vsel %vm1210_vm10, %v3838_v7, %v7810_v54  ;;  %v6340_v2 = vor.u32 %v6339_v22, %v7843_v13  ;;  %v6343_v59 = vor.u32 %v6342_v42, %v6341_v29  ;;  %v3283_v42 = vld [vmem:[#allocation3 + $0x54] sm:$0xff]  }
 0x294   : > { %v3094_v6 = vrot.slane %v3092_v17, 7  ;;  %5823 = vmatmul.msk.bf16.gmra.mxu2 %vm1210_vm10, %v5849_v41 }
 0x295   : > { %v2749_v0 = vmax.f32 %v2717_v63, 0.0  ;;  %3999 = vrot.lane.b32.xlu0 %v3972_v53, %s6416_s30  ;;  %v3759_v63 = vld [vmem:[#allocation3 + $0x50] sm:$0x1]  ;;  %v5850_v53 = vld [vmem:[%s6480_s29 + $0x38] sm:$0xff] }
 0x296   : > { %v3097_v44 = vor.u32 %v3095_v28, %v3094_v6  ;;  %v3098_v32 = vrot.slane %v3094_v6, 4  ;;  %v6409_v6 = vld [vmem:[#allocation3 + $0xb4] sm:$0xe] }
 0x297   : > { %v2781_v18 = vpack.c.bf16 %v2749_v0, %v2749_v0  ;;  %v3361_v54 = vld [vmem:[#allocation3 + $0xb4] sm:$0xff]  }
 0x298   : > { %v3263_v52 = vsel %vm6503_vm6, %v3097_v44, %v3262_v47  ;;  %v6408_v17 = vld [vmem:[#allocation3 + $0xb4] sm:$0xf0]  ;;  %v3798_v28 = vld [vmem:[#allocation3 + $0xbc] sm:$0x1] }
 0x299   : > { %3264 = vst [vmem:[#allocation3 + $0xc0] sm:$0xf] %v3263_v52  ;;  %v3100_v40 = vshrl.u32 %v2781_v18, 16  ;;  %v3103_v36 = vshll.u32 %v2781_v18, 16  ;;  %4701 = vrot.lane.b32.xlu1 %v6208_v11, %s6417_s8  ;;  %v3958_v58 = vunpack.c.l.b16 %v3798_v28  ;;  %v3823_v52 = vunpack.c.l.b16 %v3759_v63  ;;  %v3783_v30 = vld [vmem:[#allocation3 + $0xbc] sm:$0x1] }
 0x29a   : > { %3921 = vrot.lane.b32.xlu2 %v3893_v12, %s6417_s8  ;;  %v6410_v12 = vor.u32 %v6409_v6, %v6408_v17 }
 0x29b   : > { %v3102_v37 = vrot.slane %v3100_v40, 7  ;;  %v7853_v60 = vpop.permute.xlu2 %4771  ;;  %v3839_v11 = vpack.c.b16 %v3823_v52, %v3823_v52 }
 0x29d   : > { %v3105_v1 = vor.u32 %v3103_v36, %v3102_v37  ;;  %v3107_v62 = vrot.slane %v3102_v37, 4  ;;  %3550 = vrot.lane.b32.xlu0 %v3325_v50, %s6417_s8  ;;  %v3974_v36 = vpack.c.b16 %v3958_v58, %v3958_v58  ;;  %v4029_v10 = vsel %vm1210_vm10, %v3839_v11, %v7846_v55  ;;  %v6210_v55 = vld [vmem:[#allocation3 + $0xa8] sm:$0xe] }
 0x29f   : > { %v3106_v56 = vsel %vm6493_vm5, %v3098_v32, %v3105_v1  ;;  %v3267_v3 = vsel %vm6715_vm7, %v3107_v62, %v3266_v19  ;;  %v3649_v48 = vpop.permute.xlu1 %3648  ;;  %v3329_v19 = vld [vmem:[#allocation3 + $0xb4] sm:$0xff]   ;;  %v6147_v62 = vld [vmem:[#allocation3 + $0x48] sm:$0xff]  }
 0x2a0   : > { %3265 = vst.msk [vmem:[#allocation3 + $0xc4] sm:$0xf] %vm280_vm0, %v3106_v56  ;;  %v3729_v26 = vsel %vm1259_vm9, %v3687_v35, %v3649_v48  ;;  %v7890_v32 = vld [vmem:[#allocation3 + $0xb4] sm:$0xf0]  ;;  %v3760_v48 = vld [vmem:[#allocation3 + $0x5c] sm:$0x1] }
 0x2a1   : > { %3268 = vst [vmem:[#allocation3 + $0xc8] sm:$0x1] %v3267_v3  ;;  %3662 = vrot.lane.b32.xlu1 %v6165_v8, %s6416_s30  ;;  %v4141_v46 = vshll.u32 %v3729_v26, 16  ;;  %5719 = vmatmul.msk.bf16.gmra.mxu0 %vm1805_vm11, %v3729_v26  ;;  %v4139_v31 = vshrl.u32 %v3729_v26, 16  ;;  %v6209_v3 = vld [vmem:[#allocation3 + $0xa8] sm:$0xf0] }
 0x2a2   : > { %4783 = vrot.lane.b32.xlu2 %v6235_v51, %s6416_s30  ;;  %v6211_v22 = vor.u32 %v6210_v55, %v6209_v3  ;;  %v6237_v63 = vld [vmem:[#allocation3 + $0xc0] sm:$0xe] }
 0x2a3   : > { %v7865_v49 = vpop.permute.xlu2 %3911  ;;  %v4143_v61 = vrot.slane %v4141_v46, 1 }
 0x2a4   : > { %5824 = vmatmul.msk.bf16.gmra.mxu2 %vm1210_vm10, %v5850_v53  ;;  %v5851_v53 = vld [vmem:[%s6480_s29 + $0x40] sm:$0xff] }
 0x2a5   : > { %4001 = vrot.lane.b32.xlu0 %v3973_v5, %s6416_s30  ;;  %v3988_v39 = vpop.permute.xlu0 %3987  ;;  %v4144_v9 = vor.u32 %v4143_v61, %v4139_v31  ;;  %v5345_v5 = vpop.f32.mrf.mxu2  ;;  %v7915_v61 = vld [vmem:[%s8242_s6] ss:$0 sm:$0xff] }
 0x2a6   : > { %v4068_v57 = vsel %vm1259_vm9, %v4026_v33, %v3988_v39  ;;  %v6176_v33 = vld [vmem:[#allocation3 + $0x48] sm:$0xf0]  ;;  %v6177_v39 = vld [vmem:[#allocation3 + $0x48] sm:$0xe] }
 0x2a7   : > { %v4145_v16 = vshll.u32 %v4068_v57, 16  ;;  %v4919_v15 = vrot.slane %v4068_v57, 1  ;;  %v4455_v1 = vpop.f32.mrf.mxu0  ;;  %v6178_v46 = vor.u32 %v6177_v39, %v6176_v33  ;;  %v6166_v11 = vld [vmem:[#allocation3 + $0xc0] sm:$0xff]  }
 0x2a9   : > { %v4147_v34 = vrot.slane %v4145_v16, 1  ;;  %4703 = vrot.lane.b32.xlu1 %v6340_v2, %s6417_s8  ;;  %v4690_v44 = vpop.permute.xlu1 %4689  ;;  %v3799_v16 = vld [vmem:[#allocation3 + $0xc8] sm:$0x1]  ;;  %v6236_v2 = vld [vmem:[#allocation3 + $0xc0] sm:$0xf0] }
 0x2aa   : > { %3923 = vrot.lane.b32.xlu2 %v3894_v25, %s6417_s8  ;;  %v4808_v13 = vsel %vm1210_vm10, %v6343_v59, %v4690_v44  ;;  %v7909_v25 = vld [vmem:[#allocation3 + $0x54] sm:$0xf0]  ;;  %v3959_v59 = vunpack.c.l.b16 %v3799_v16 }
 0x2ab   : > { %v7877_v47 = vpop.permute.xlu2 %4773  ;;  %v4148_v50 = vsel %vm1631_vm13, %v4144_v9, %v4147_v34  ;;  %v4850_v18 = vsel %vm1259_vm9, %v4808_v13, %v7829_v38  ;;  %v3879_v38 = vunpack.c.l.b16 %v3783_v30  ;;  %v3824_v9 = vunpack.c.l.b16 %v3760_v48  ;;  %v3784_v30 = vld [vmem:[#allocation3 + $0xc8] sm:$0x1]  ;;  %v3800_v48 = vld [vmem:[#allocation3 + $0xd4] sm:$0x1] }
 0x2ac   : > { %5699 = vmatmul.msk.bf16.gmra.mxu3 %vm1805_vm11, %v4148_v50  ;;  %v4918_v40 = vrot.slane %v4850_v18, 1  ;;  %v6238_v13 = vor.u32 %v6237_v63, %v6236_v2  ;;  %v3761_v2 = vld [vmem:[#allocation3 + $0x68] sm:$0x1] }
 0x2ad   : > { %3552 = vrot.lane.b32.xlu0 %v6165_v8, %s6417_s8  ;;  %v3539_v0 = vpop.permute.xlu0 %3538  ;;  %v3895_v14 = vpack.c.b16 %v3879_v38, %v3879_v38  ;;  %v7904_v8 = vld [vmem:[%s8240_s4] ss:$0 sm:$0xff] }
 0x2ae   : > { %v4920_v37 = vsel %vm2448_vm12, %v4918_v40, %v4919_v15  ;;  %v3690_v45 = vsel %vm1210_vm10, %v6147_v62, %v3539_v0  ;;  %v3840_v62 = vpack.c.b16 %v3824_v9, %v3824_v9 }
 0x2af   : > { %5742 = vmatmul.msk.bf16.gmra.mxu1 %vm1805_vm11, %v4920_v37  ;;  %v4457_v44 = vpop.f32.mrf.mxu0 }
 0x2b1   : > { %3664 = vrot.lane.b32.xlu1 %v3361_v54, %s6416_s30  ;;  %v3651_v29 = vpop.permute.xlu1 %3650 }
 0x2b2   : > { %4785 = vrot.lane.b32.xlu2 %v6410_v12, %s6416_s30  ;;  %v3731_v24 = vsel %vm1259_vm9, %v3690_v45, %v3651_v29  ;;  %v6345_v45 = vld [vmem:[#allocation3 + $0xb4] sm:$0xe] }
 0x2b3   : > { %v7898_v56 = vpop.permute.xlu2 %3913  ;;  %v5024_v4 = vpop.f32.mrf.mxu1  ;;  %v4151_v20 = vshll.u32 %v3731_v24, 16  ;;  %5720 = vmatmul.msk.bf16.gmra.mxu0 %vm1805_vm11, %v3731_v24  ;;  %v4149_v7 = vshrl.u32 %v3731_v24, 16  ;;  %v6346_v39 = vor.u32 %v6345_v45, %v7890_v32 }
 0x2b4   : > { %5825 = vmatmul.msk.bf16.gmra.mxu2 %vm1210_vm10, %v5851_v53  ;;  %v3825_v53 = vunpack.c.l.b16 %v3761_v2 }
 0x2b5   : > { %4003 = vrot.lane.b32.xlu0 %v3974_v36, %s6416_s30  ;;  %v3990_v27 = vpop.permute.xlu0 %3989  ;;  %v4153_v43 = vrot.slane %v4151_v20, 1 }
 0x2b6   : > { %v4070_v41 = vsel %vm1259_vm9, %v4029_v10, %v3990_v27  ;;  %v3880_v10 = vunpack.c.l.b16 %v3784_v30  ;;  %v4032_v27 = vsel %vm1210_vm10, %v3840_v62, %v7865_v49  ;;  %v7948_v49 = vld [vmem:[#allocation3 + $0xcc] sm:$0xf0]  ;;  %v3841_v30 = vpack.c.b16 %v3825_v53, %v3825_v53 }
 0x2b7   : > { %v4155_v23 = vshll.u32 %v4070_v41, 16  ;;  %v4322_v21 = vpop.f32.mrf.mxu3  ;;  %v4154_v26 = vor.u32 %v4153_v43, %v4149_v7  ;;  %v4922_v58 = vrot.slane %v4070_v41, 1  ;;  %v3364_v7 = vld [vmem:[#allocation3 + $0xcc] sm:$0xff]  }
 0x2b8   : > { %v4456_v51 = vadd.f32 %v4455_v1, %v4322_v21  ;;  %v5347_v1 = vpop.f32.mrf.mxu2  ;;  %v4035_v62 = vsel %vm1210_vm10, %v3841_v30, %v7898_v56 }
 0x2b9   : > { %v4157_v57 = vrot.slane %v4155_v23, 1  ;;  %4705 = vrot.lane.b32.xlu1 %v6211_v22, %s6417_s8  ;;  %v4692_v54 = vpop.permute.xlu1 %4691  ;;  %v4460_v20 = vpop.f32.mrf.mxu0 }
 0x2ba   : > { %v5104_v35 = vadd.f32 %v5024_v4, %v4456_v51  ;;  %3925 = vrot.lane.b32.xlu2 %v3895_v14, %s6417_s8  ;;  %v4811_v6 = vsel %vm1210_vm10, %v6178_v46, %v4692_v54  ;;  %v6348_v14 = vld [vmem:[#allocation3 + $0x54] sm:$0xe] }
 0x2bb   : > { %v4158_v34 = vsel %vm1631_vm13, %v4154_v26, %v4157_v57  ;;  %v4852_v0 = vsel %vm1259_vm9, %v4811_v6, %v7853_v60  ;;  %v7924_v18 = vpop.permute.xlu2 %4775  ;;  %v5026_v12 = vpop.f32.mrf.mxu1  ;;  %v6349_v32 = vor.u32 %v6348_v14, %v7909_v25 }
 0x2bc   : > { %v5140_v31 = vadd.f32 %v7904_v8, %v5104_v35  ;;  %5700 = vmatmul.msk.bf16.gmra.mxu3 %vm1805_vm11, %v4158_v34  ;;  %v4921_v52 = vrot.slane %v4852_v0, 1  ;;  %v5852_v34 = vld [vmem:[%s6480_s29 + $0x48] sm:$0xff] }
 0x2bd   : > { %3554 = vrot.lane.b32.xlu0 %v3329_v19, %s6417_s8  ;;  %v3541_v17 = vpop.permute.xlu0 %3540  ;;  %v3975_v19 = vpack.c.b16 %v3959_v59, %v3959_v59 }
 0x2be   : > { %v5425_v28 = vadd.f32 %v5345_v5, %v5140_v31  ;;  %v4923_v36 = vsel %vm2448_vm12, %v4921_v52, %v4922_v58  ;;  %v3693_v29 = vsel %vm1210_vm10, %v3283_v42, %v3541_v17  ;;  %v3896_v5 = vpack.c.b16 %v3880_v10, %v3880_v10 }
 0x2bf   : > { %v4324_v50 = vpop.f32.mrf.mxu3  ;;  %5743 = vmatmul.msk.bf16.gmra.mxu1 %vm1805_vm11, %v4923_v36  ;;  %v3960_v17 = vunpack.c.l.b16 %v3800_v48  ;;  %v3287_v48 = vld [vmem:[#allocation3 + $0x6c] sm:$0xff]  }
 0x2c0   : > { %v5461_v15 = vadd.f32 %v7915_v61, %v5425_v28  ;;  %v4458_v40 = vadd.f32 %v4457_v44, %v4324_v50  ;;  %v5350_v46 = vpop.f32.mrf.mxu2 }
 0x2c1   : > { %3666 = vrot.lane.b32.xlu1 %v6166_v11, %s6416_s30  ;;  %v3653_v24 = vpop.permute.xlu1 %3652  ;;  %v3976_v25 = vpack.c.b16 %v3960_v17, %v3960_v17  ;;  %v4462_v58 = vpop.f32.mrf.mxu0 }
 0x2c2   : > { %v5493_v60 = vmax.f32 %v5461_v15, 0.0  ;;  %v5105_v37 = vadd.f32 %v5026_v12, %v4458_v40  ;;  %4787 = vrot.lane.b32.xlu2 %v6238_v13, %s6416_s30  ;;  %v3733_v4 = vsel %vm1259_vm9, %v3693_v29, %v3653_v24  ;;  %v6212_v24 = vld [vmem:[#allocation3 + $0xc0] sm:$0xf0] }
 0x2c3   : > { %v4161_v51 = vshll.u32 %v3733_v4, 16  ;;  %5721 = vmatmul.msk.bf16.gmra.mxu0 %vm1805_vm11, %v3733_v4  ;;  %v4159_v43 = vshrl.u32 %v3733_v4, 16  ;;  %v7951_v57 = vpop.permute.xlu2 %3915 }
 0x2c4   : > { %5525 = vst.msk [vmem:[%s7931_s11] sm:$0xff] %vm1210_vm10, %v5493_v60  ;;  %v5141_v38 = vadd.f32 %v7904_v8, %v5105_v37  ;;  %v5029_v33 = vpop.f32.mrf.mxu1  ;;  %5826 = vmatmul.msk.bf16.gmra.mxu2 %vm1210_vm10, %v5852_v34 }
 0x2c5   : > { %4005 = vrot.lane.b32.xlu0 %v3975_v19, %s6416_s30  ;;  %v3992_v41 = vpop.permute.xlu0 %3991  ;;  %v4163_v22 = vrot.slane %v4161_v51, 1 }
 0x2c6   : > { %v4072_v3 = vsel %vm1259_vm9, %v4032_v27, %v3992_v41  ;;  %v5426_v23 = vadd.f32 %v5347_v1, %v5141_v38  ;;  %v6351_v1 = vld [vmem:[#allocation3 + $0xcc] sm:$0xe] }
 0x2c7   : > { %v4165_v21 = vshll.u32 %v4072_v3, 16  ;;  %v4164_v31 = vor.u32 %v4163_v22, %v4159_v43  ;;  %v4925_v0 = vrot.slane %v4072_v3, 1  ;;  %v6352_v56 = vor.u32 %v6351_v1, %v7948_v49  ;;  %v6180_v22 = vld [vmem:[#allocation3 + $0x60] sm:$0xe]  ;;  %v6353_v49 = vld [vmem:[#allocation3 + $0x6c] sm:$0xf0] }
 0x2c8   : > { %v5462_v55 = vadd.f32 %v7915_v61, %v5426_v23  ;;  %v5352_v19 = vpop.f32.mrf.mxu2 }
 0x2c9   : > { %v4327_v35 = vpop.f32.mrf.mxu3  ;;  %v4167_v42 = vrot.slane %v4165_v21, 1  ;;  %4707 = vrot.lane.b32.xlu1 %v6346_v39, %s6417_s8  ;;  %v4694_v9 = vpop.permute.xlu1 %4693 }
 0x2ca   : > { %v5494_v26 = vmax.f32 %v5462_v55, 0.0  ;;  %v4461_v16 = vadd.f32 %v4460_v20, %v4327_v35  ;;  %3927 = vrot.lane.b32.xlu2 %v3896_v5, %s6417_s8  ;;  %v4814_v63 = vsel %vm1210_vm10, %v6349_v32, %v4694_v9  ;;  %v6213_v20 = vld [vmem:[#allocation3 + $0xc0] sm:$0xe]  ;;  %v6179_v55 = vld [vmem:[#allocation3 + $0x60] sm:$0xf0] }
 0x2cb   : > { %v4168_v28 = vsel %vm1631_vm13, %v4164_v31, %v4167_v42  ;;  %v4854_v44 = vsel %vm1259_vm9, %v4814_v63, %v7877_v47  ;;  %v6148_v47 = vld [vmem:[#allocation3 + $0x60] sm:$0xff]   ;;  %v6214_v14 = vor.u32 %v6213_v20, %v6212_v24  ;;  %v6181_v39 = vor.u32 %v6180_v22, %v6179_v55 }
 0x2cc   : > { %5526 = vst.msk [vmem:[%s7931_s11 + $0x8] sm:$0xff] %vm1210_vm10, %v5494_v26  ;;  %v5106_v54 = vadd.f32 %v5029_v33, %v4461_v16  ;;  %5701 = vmatmul.msk.bf16.gmra.mxu3 %vm1805_vm11, %v4168_v28  ;;  %v4924_v50 = vrot.slane %v4854_v44, 1  ;;  %v5031_v60 = vpop.f32.mrf.mxu1  ;;  %v7971_v37 = vpop.permute.xlu2 %4777  ;;  %v5853_v26 = vld [vmem:[%s6480_s29 + $0x50] sm:$0xff]  ;;  %v3762_v16 = vld [vmem:[#allocation3 + $0x74] sm:$0x1] }
 0x2cd   : > { %3556 = vrot.lane.b32.xlu0 %v6166_v11, %s6417_s8  ;;  %v3543_v6 = vpop.permute.xlu0 %3542 }
 0x2ce   : > { %v5142_v59 = vadd.f32 %v7904_v8, %v5106_v54  ;;  %v4926_v12 = vsel %vm2448_vm12, %v4924_v50, %v4925_v0  ;;  %v3696_v38 = vsel %vm1210_vm10, %v6148_v47, %v3543_v6  ;;  %v4465_v33 = vpop.f32.mrf.mxu0  ;;  %v3826_v6 = vunpack.c.l.b16 %v3762_v16  ;;  %v6354_v47 = vld [vmem:[#allocation3 + $0x6c] sm:$0xe] }
 0x2cf   : > { %5744 = vmatmul.msk.bf16.gmra.mxu1 %vm1805_vm11, %v4926_v12 }
 0x2d0   : > { %v5427_v13 = vadd.f32 %v5350_v46, %v5142_v59  ;;  %v5355_v32 = vpop.f32.mrf.mxu2  ;;  %v3842_v0 = vpack.c.b16 %v3826_v6, %v3826_v6 }
 0x2d1   : > { %v4329_v52 = vpop.f32.mrf.mxu3  ;;  %3668 = vrot.lane.b32.xlu1 %v3364_v7, %s6416_s30  ;;  %v3655_v45 = vpop.permute.xlu1 %3654 }
 0x2d2   : > { %v5463_v15 = vadd.f32 %v7915_v61, %v5427_v13  ;;  %v4463_v40 = vadd.f32 %v4462_v58, %v4329_v52  ;;  %v3735_v29 = vsel %vm1259_vm9, %v3696_v38, %v3655_v45  ;;  %4789 = vrot.lane.b32.xlu2 %v6352_v56, %s6416_s30 }
 0x2d3   : > { %v4171_v4 = vshll.u32 %v3735_v29, 16  ;;  %5722 = vmatmul.msk.bf16.gmra.mxu0 %vm1805_vm11, %v3735_v29  ;;  %v4169_v21 = vshrl.u32 %v3735_v29, 16 }
 0x2d4   : > { %v5495_v36 = vmax.f32 %v5463_v15, 0.0  ;;  %v5107_v11 = vadd.f32 %v5031_v60, %v4463_v40  ;;  %v7989_v2 = vpop.permute.xlu2 %3917  ;;  %5827 = vmatmul.msk.bf16.gmra.mxu2 %vm1210_vm10, %v5853_v26  ;;  %v6149_v26 = vld [vmem:[#allocation3 + $0x78] sm:$0xff]  }
 0x2d5   : > { %4007 = vrot.lane.b32.xlu0 %v3976_v25, %s6416_s30  ;;  %v3994_v10 = vpop.permute.xlu0 %3993  ;;  %v4173_v51 = vrot.slane %v4171_v4, 1  ;;  %v5854_v4 = vld [vmem:[%s6480_s29 + $0x58] sm:$0xff] }
 0x2d6   : > { %5527 = vst.msk [vmem:[%s7931_s11 + $0x10] sm:$0xff] %vm1210_vm10, %v5495_v36  ;;  %v4074_v27 = vsel %vm1259_vm9, %v4035_v62, %v3994_v10  ;;  %v5143_v41 = vadd.f32 %v7904_v8, %v5107_v11  ;;  %v4467_v40 = vpop.f32.mrf.mxu0 }
 0x2d7   : > { %v4175_v3 = vshll.u32 %v4074_v27, 16  ;;  %v4174_v43 = vor.u32 %v4173_v51, %v4169_v21  ;;  %v4928_v28 = vrot.slane %v4074_v27, 1 }
 0x2d8   : > { %v5428_v23 = vadd.f32 %v5352_v19, %v5143_v41  ;;  %v5357_v1 = vpop.f32.mrf.mxu2 }
 0x2d9   : > { %v4177_v7 = vrot.slane %v4175_v3, 1  ;;  %4709 = vrot.lane.b32.xlu1 %v6214_v14, %s6417_s8  ;;  %v6355_v3 = vor.u32 %v6354_v47, %v6353_v49 }
 0x2da   : > { %v5464_v5 = vadd.f32 %v7915_v61, %v5428_v23  ;;  %v4696_v46 = vpop.permute.xlu1 %4695  ;;  %v5034_v17 = vpop.f32.mrf.mxu1  ;;  %v3763_v23 = vld [vmem:[#allocation3 + $0x80] sm:$0x1] }
 0x2db   : > { %v4178_v31 = vsel %vm1631_vm13, %v4174_v43, %v4177_v7  ;;  %v4817_v54 = vsel %vm1210_vm10, %v6181_v39, %v4696_v46 }
 0x2dc   : > { %v5496_v35 = vmax.f32 %v5464_v5, 0.0  ;;  %5702 = vmatmul.msk.bf16.gmra.mxu3 %vm1805_vm11, %v4178_v31  ;;  %v4856_v34 = vsel %vm1259_vm9, %v4817_v54, %v7924_v18  ;;  %v4038_v18 = vsel %vm1210_vm10, %v3842_v0, %v7951_v57  ;;  %v8008_v57 = vpop.permute.xlu2 %4779  ;;  %v3827_v5 = vunpack.c.l.b16 %v3763_v23 }
 0x2dd   : > { %v3545_v42 = vpop.permute.xlu0 %3544  ;;  %v4927_v63 = vrot.slane %v4856_v34, 1 }
 0x2de   : > { %5528 = vst.msk [vmem:[%s7931_s11 + $0x18] sm:$0xff] %vm1210_vm10, %v5496_v35  ;;  %v3699_v13 = vsel %vm1210_vm10, %v3287_v48, %v3545_v42  ;;  %v3843_v49 = vpack.c.b16 %v3827_v5, %v3827_v5 }
 0x2df   : > { %v4332_v9 = vpop.f32.mrf.mxu3  ;;  %v4929_v44 = vsel %vm2448_vm12, %v4927_v63, %v4928_v28 }
 0x2e0   : > { %v4466_v59 = vadd.f32 %v4465_v33, %v4332_v9  ;;  %5745 = vmatmul.msk.bf16.gmra.mxu1 %vm1805_vm11, %v4929_v44  ;;  %v5360_v33 = vpop.f32.mrf.mxu2  ;;  %v4041_v42 = vsel %vm1210_vm10, %v3843_v49, %v7989_v2 }
 0x2e2   : > { %v5108_v53 = vadd.f32 %v5034_v17, %v4466_v59  ;;  %v3657_v25 = vpop.permute.xlu1 %3656  ;;  %v5036_v62 = vpop.f32.mrf.mxu1 }
 0x2e3   : > { %v3737_v15 = vsel %vm1259_vm9, %v3699_v13, %v3657_v25  ;;  %v6183_v13 = vld [vmem:[#allocation3 + $0x78] sm:$0xe]  ;;  %v3764_v25 = vld [vmem:[#allocation3 + $0x8c] sm:$0x1] }
 0x2e4   : > { %v5144_v50 = vadd.f32 %v7904_v8, %v5108_v53  ;;  %v4181_v30 = vshll.u32 %v3737_v15, 16  ;;  %5723 = vmatmul.msk.bf16.gmra.mxu0 %vm1805_vm11, %v3737_v15  ;;  %v4179_v38 = vshrl.u32 %v3737_v15, 16  ;;  %5828 = vmatmul.msk.bf16.gmra.mxu2 %vm1210_vm10, %v5854_v4  ;;  %v3920_v48 = vpop.permute.xlu2 %3919  ;;  %v6182_v53 = vld [vmem:[#allocation3 + $0x78] sm:$0xf0] }
 0x2e6   : > { %v5429_v58 = vadd.f32 %v5355_v32, %v5144_v50  ;;  %v3996_v52 = vpop.permute.xlu0 %3995  ;;  %v4183_v10 = vrot.slane %v4181_v30, 1 }
 0x2e7   : > { %v4076_v12 = vsel %vm1259_vm9, %v4038_v18, %v3996_v52  ;;  %v4334_v60 = vpop.f32.mrf.mxu3  ;;  %v6184_v18 = vor.u32 %v6183_v13, %v6182_v53  ;;  %v6356_v52 = vld [vmem:[#allocation3 + $0x84] sm:$0xf0] }
 0x2e8   : > { %v5465_v36 = vadd.f32 %v7915_v61, %v5429_v58  ;;  %v4185_v11 = vshll.u32 %v4076_v12, 16  ;;  %v4468_v19 = vadd.f32 %v4467_v40, %v4334_v60  ;;  %v4184_v41 = vor.u32 %v4183_v10, %v4179_v38  ;;  %v5362_v0 = vpop.f32.mrf.mxu2  ;;  %v3291_v58 = vld [vmem:[#allocation3 + $0x84] sm:$0xff]  }
 0x2e9   : > { %v4931_v7 = vrot.slane %v4076_v12, 1  ;;  %v4470_v16 = vpop.f32.mrf.mxu0  ;;  %v5855_v40 = vld [vmem:[%s6480_s29 + $0x60] sm:$0xff] }
 0x2ea   : > { %v5497_v45 = vmax.f32 %v5465_v36, 0.0  ;;  %v5109_v27 = vadd.f32 %v5036_v62, %v4468_v19  ;;  %v4187_v29 = vrot.slane %v4185_v11, 1  ;;  %v4698_v20 = vpop.permute.xlu1 %4697  ;;  %v3828_v19 = vunpack.c.l.b16 %v3764_v25 }
 0x2eb   : > { %v4820_v51 = vsel %vm1210_vm10, %v6355_v3, %v4698_v20 }
 0x2ec   : > { %5529 = vst.msk [vmem:[%s7931_s11 + $0x20] sm:$0xff] %vm1210_vm10, %v5497_v45  ;;  %v5145_v24 = vadd.f32 %v7904_v8, %v5109_v27  ;;  %v4188_v56 = vsel %vm1631_vm13, %v4184_v41, %v4187_v29  ;;  %v4858_v55 = vsel %vm1259_vm9, %v4820_v51, %v7971_v37  ;;  %v4782_v12 = vpop.permute.xlu2 %4781  ;;  %v3844_v20 = vpack.c.b16 %v3828_v19, %v3828_v19 }
 0x2ed   : > { %5703 = vmatmul.msk.bf16.gmra.mxu3 %vm1805_vm11, %v4188_v56  ;;  %v4930_v22 = vrot.slane %v4858_v55, 1 }
 0x2ee   : > { %v5430_v21 = vadd.f32 %v5357_v1, %v5145_v24  ;;  %v3547_v14 = vpop.permute.xlu0 %3546  ;;  %v4044_v51 = vsel %vm1210_vm10, %v3844_v20, %v3920_v48 }
 0x2ef   : > { %v4932_v39 = vsel %vm2448_vm12, %v4930_v22, %v4931_v7  ;;  %v3702_v37 = vsel %vm1210_vm10, %v6149_v26, %v3547_v14 }
 0x2f0   : > { %v5466_v43 = vadd.f32 %v7915_v61, %v5430_v21  ;;  %5746 = vmatmul.msk.bf16.gmra.mxu1 %vm1805_vm11, %v4932_v39 }
 0x2f1   : > { %v4472_v1 = vpop.f32.mrf.mxu0 }
 0x2f2   : > { %v5498_v35 = vmax.f32 %v5466_v43, 0.0 }
 0x2f3   : > { %v3659_v46 = vpop.permute.xlu1 %3658 }
 0x2f4   : > { %5530 = vst.msk [vmem:[%s7931_s11 + $0x28] sm:$0xff] %vm1210_vm10, %v5498_v35  ;;  %v3739_v54 = vsel %vm1259_vm9, %v3702_v37, %v3659_v46  ;;  %5829 = vmatmul.msk.bf16.gmra.mxu2 %vm1210_vm10, %v5855_v40  ;;  %v3922_v7 = vpop.permute.xlu2 %3921 }
 0x2f5   : > { %v4191_v17 = vshll.u32 %v3739_v54, 16  ;;  %5724 = vmatmul.msk.bf16.gmra.mxu0 %vm1805_vm11, %v3739_v54  ;;  %v4189_v63 = vshrl.u32 %v3739_v54, 16  ;;  %v5365_v23 = vpop.f32.mrf.mxu2 }
 0x2f6   : > { %v5039_v34 = vpop.f32.mrf.mxu1 }
 0x2f7   : > { %v3998_v31 = vpop.permute.xlu0 %3997  ;;  %v4193_v59 = vrot.slane %v4191_v17, 1  ;;  %v3765_v17 = vld [vmem:[#allocation3 + $0x98] sm:$0x1] }
 0x2f8   : > { %v4078_v32 = vsel %vm1259_vm9, %v4041_v42, %v3998_v31 }
 0x2f9   : > { %v4337_v9 = vpop.f32.mrf.mxu3  ;;  %v4195_v6 = vshll.u32 %v4078_v32, 16  ;;  %v4194_v2 = vor.u32 %v4193_v59, %v4189_v63  ;;  %v4934_v10 = vrot.slane %v4078_v32, 1  ;;  %v5856_v32 = vld [vmem:[%s6480_s29 + $0x68] sm:$0xff] }
 0x2fa   : > { %v4471_v28 = vadd.f32 %v4470_v16, %v4337_v9 }
 0x2fb   : > { %v4197_v50 = vrot.slane %v4195_v6, 1  ;;  %v4700_v30 = vpop.permute.xlu1 %4699 }
 0x2fc   : > { %v5110_v44 = vadd.f32 %v5039_v34, %v4471_v28  ;;  %v4823_v47 = vsel %vm1210_vm10, %v6184_v18, %v4700_v30  ;;  %v4784_v13 = vpop.permute.xlu2 %4783 }
 0x2fd   : > { %v4198_v60 = vsel %vm1631_vm13, %v4194_v2, %v4197_v50  ;;  %v4860_v62 = vsel %vm1259_vm9, %v4823_v47, %v8008_v57  ;;  %v5367_v54 = vpop.f32.mrf.mxu2 }
 0x2fe   : > { %v5146_v15 = vadd.f32 %v7904_v8, %v5110_v44  ;;  %5704 = vmatmul.msk.bf16.gmra.mxu3 %vm1805_vm11, %v4198_v60  ;;  %v4933_v45 = vrot.slane %v4860_v62, 1  ;;  %v5041_v41 = vpop.f32.mrf.mxu1  ;;  %v3829_v44 = vunpack.c.l.b16 %v3765_v17 }
 0x2ff   : > { %v3549_v36 = vpop.permute.xlu0 %3548 }
 0x300   : > { %v5431_v11 = vadd.f32 %v5360_v33, %v5146_v15  ;;  %v4935_v4 = vsel %vm2448_vm12, %v4933_v45, %v4934_v10  ;;  %v3705_v56 = vsel %vm1210_vm10, %v3291_v58, %v3549_v36  ;;  %v6357_v33 = vld [vmem:[#allocation3 + $0x84] sm:$0xe]  ;;  %v3845_v58 = vpack.c.b16 %v3829_v44, %v3829_v44  ;;  %v6150_v15 = vld [vmem:[#allocation3 + $0x90] sm:$0xff]  }
 0x301   : > { %v4339_v38 = vpop.f32.mrf.mxu3  ;;  %5747 = vmatmul.msk.bf16.gmra.mxu1 %vm1805_vm11, %v4935_v4  ;;  %v4475_v16 = vpop.f32.mrf.mxu0  ;;  %v6358_v31 = vor.u32 %v6357_v33, %v6356_v52  ;;  %v6185_v4 = vld [vmem:[#allocation3 + $0x90] sm:$0xf0] }
 0x302   : > { %v5467_v27 = vadd.f32 %v7915_v61, %v5431_v11  ;;  %v4473_v29 = vadd.f32 %v4472_v1, %v4339_v38  ;;  %v4047_v36 = vsel %vm1210_vm10, %v3845_v58, %v3922_v7  ;;  %v3766_v7 = vld [vmem:[#allocation3 + $0xa4] sm:$0x1] }
 0x303   : > { %v3661_v21 = vpop.permute.xlu1 %3660 }
 0x304   : > { %v5499_v24 = vmax.f32 %v5467_v27, 0.0  ;;  %v5111_v3 = vadd.f32 %v5041_v41, %v4473_v29  ;;  %v3741_v14 = vsel %vm1259_vm9, %v3705_v56, %v3661_v21  ;;  %5830 = vmatmul.msk.bf16.gmra.mxu2 %vm1210_vm10, %v5856_v32  ;;  %v3924_v20 = vpop.permute.xlu2 %3923  ;;  %v6186_v21 = vld [vmem:[#allocation3 + $0x90] sm:$0xe] }
 0x305   : > { %v4201_v43 = vshll.u32 %v3741_v14, 16  ;;  %5725 = vmatmul.msk.bf16.gmra.mxu0 %vm1805_vm11, %v3741_v14  ;;  %v4199_v49 = vshrl.u32 %v3741_v14, 16  ;;  %v6187_v14 = vor.u32 %v6186_v21, %v6185_v4 }
 0x306   : > { %5531 = vst.msk [vmem:[%s7931_s11 + $0x30] sm:$0xff] %vm1210_vm10, %v5499_v24  ;;  %v5147_v57 = vadd.f32 %v7904_v8, %v5111_v3 }
 0x307   : > { %v4000_v55 = vpop.permute.xlu0 %3999  ;;  %v4203_v26 = vrot.slane %v4201_v43, 1  ;;  %v8062_v30 = vpop.f32.mrf.mxu2 }
 0x308   : > { %v5432_v5 = vadd.f32 %v5362_v0, %v5147_v57  ;;  %v4080_v22 = vsel %vm1259_vm9, %v4044_v51, %v4000_v55  ;;  %v3295_v55 = vld [vmem:[#allocation3 + $0x9c] sm:$0xff]  }
 0x309   : > { %v4205_v35 = vshll.u32 %v4080_v22, 16  ;;  %v4204_v37 = vor.u32 %v4203_v26, %v4199_v49  ;;  %v4937_v0 = vrot.slane %v4080_v22, 1  ;;  %v4477_v52 = vpop.f32.mrf.mxu0 }
 0x30a   : > { %v5468_v39 = vadd.f32 %v7915_v61, %v5432_v5  ;;  %v6359_v5 = vld [vmem:[#allocation3 + $0x9c] sm:$0xf0] }
 0x30b   : > { %v4207_v46 = vrot.slane %v4205_v35, 1  ;;  %v4702_v34 = vpop.permute.xlu1 %4701 }
 0x30c   : > { %v5500_v48 = vmax.f32 %v5468_v39, 0.0  ;;  %v4826_v28 = vsel %vm1210_vm10, %v6358_v31, %v4702_v34  ;;  %v4786_v32 = vpop.permute.xlu2 %4785 }
 0x30d   : > { %v5044_v42 = vpop.f32.mrf.mxu1  ;;  %v4208_v9 = vsel %vm1631_vm13, %v4204_v37, %v4207_v46  ;;  %v4862_v53 = vsel %vm1259_vm9, %v4826_v28, %v4782_v12 }
 0x30e   : > { %5532 = vst.msk [vmem:[%s7931_s11 + $0x38] sm:$0xff] %vm1210_vm10, %v5500_v48  ;;  %5705 = vmatmul.msk.bf16.gmra.mxu3 %vm1805_vm11, %v4208_v9  ;;  %v4936_v50 = vrot.slane %v4862_v53, 1 }
 0x30f   : > { %v3551_v63 = vpop.permute.xlu0 %3550  ;;  %v8077_v49 = vpop.f32.mrf.mxu2 }
 0x310   : > { %v4938_v25 = vsel %vm2448_vm12, %v4936_v50, %v4937_v0  ;;  %v3708_v12 = vsel %vm1210_vm10, %v6150_v15, %v3551_v63  ;;  %v5857_v63 = vld [vmem:[%s6480_s29 + $0x70] sm:$0xff]  ;;  %v3767_v15 = vld [vmem:[#allocation3 + $0xb0] sm:$0x1] }
 0x311   : > { %v4342_v6 = vpop.f32.mrf.mxu3  ;;  %5748 = vmatmul.msk.bf16.gmra.mxu1 %vm1805_vm11, %v4938_v25  ;;  %v6360_v0 = vld [vmem:[#allocation3 + $0x9c] sm:$0xe] }
 0x312   : > { %v4476_v59 = vadd.f32 %v4475_v16, %v4342_v6  ;;  %v3830_v16 = vunpack.c.l.b16 %v3766_v7 }
 0x313   : > { %v3663_v60 = vpop.permute.xlu1 %3662 }
 0x314   : > { %v5112_v2 = vadd.f32 %v5044_v42, %v4476_v59  ;;  %v3743_v19 = vsel %vm1259_vm9, %v3708_v12, %v3663_v60  ;;  %v3846_v31 = vpack.c.b16 %v3830_v16, %v3830_v16  ;;  %5831 = vmatmul.msk.bf16.gmra.mxu2 %vm1210_vm10, %v5857_v63 }
 0x315   : > { %v5046_v38 = vpop.f32.mrf.mxu1  ;;  %v4211_v10 = vshll.u32 %v3743_v19, 16  ;;  %5726 = vmatmul.msk.bf16.gmra.mxu0 %vm1805_vm11, %v3743_v19  ;;  %v4209_v24 = vshrl.u32 %v3743_v19, 16 }
 0x316   : > { %v5148_v18 = vadd.f32 %v7904_v8, %v5112_v2  ;;  %v4050_v9 = vsel %vm1210_vm10, %v3846_v31, %v3924_v20 }
 0x317   : > { %v4002_v1 = vpop.permute.xlu0 %4001  ;;  %v4213_v3 = vrot.slane %v4211_v10, 1  ;;  %v8088_v59 = vpop.f32.mrf.mxu2 }
 0x318   : > { %v5433_v40 = vadd.f32 %v5365_v23, %v5148_v18  ;;  %v4082_v45 = vsel %vm1259_vm9, %v4047_v36, %v4002_v1  ;;  %v3831_v1 = vunpack.c.l.b16 %v3767_v15 }
 0x319   : > { %v4344_v47 = vpop.f32.mrf.mxu3  ;;  %v4215_v29 = vshll.u32 %v4082_v45, 16  ;;  %v4214_v57 = vor.u32 %v4213_v3, %v4209_v24  ;;  %v4940_v48 = vrot.slane %v4082_v45, 1  ;;  %v6151_v24 = vld [vmem:[#allocation3 + $0xa8] sm:$0xff]  }
 0x31a   : > { %v5469_v11 = vadd.f32 %v7915_v61, %v5433_v40  ;;  %v4478_v62 = vadd.f32 %v4477_v52, %v4344_v47  ;;  %v6361_v52 = vor.u32 %v6360_v0, %v6359_v5 }
 0x31b   : > { %v4217_v56 = vrot.slane %v4215_v29, 1  ;;  %v4704_v43 = vpop.permute.xlu1 %4703 }
 0x31c   : > { %v5501_v27 = vmax.f32 %v5469_v11, 0.0  ;;  %v5113_v41 = vadd.f32 %v5046_v38, %v4478_v62  ;;  %v4829_v35 = vsel %vm1210_vm10, %v6187_v14, %v4704_v43  ;;  %v3926_v11 = vpop.permute.xlu2 %3925  ;;  %v5858_v14 = vld [vmem:[%s6480_s29 + $0x78] sm:$0xff] }
 0x31d   : > { %v4218_v22 = vsel %vm1631_vm13, %v4214_v57, %v4217_v56  ;;  %v4864_v26 = vsel %vm1259_vm9, %v4829_v35, %v4784_v13 }
 0x31e   : > { %5533 = vst.msk [vmem:[%s7931_s11 + $0x40] sm:$0xff] %vm1210_vm10, %v5501_v27  ;;  %v5149_v23 = vadd.f32 %v7904_v8, %v5113_v41  ;;  %5706 = vmatmul.msk.bf16.gmra.mxu3 %vm1805_vm11, %v4218_v22  ;;  %v4939_v46 = vrot.slane %v4864_v26, 1  ;;  %v3847_v41 = vpack.c.b16 %v3831_v1, %v3831_v1 }
 0x31f   : > { %v3553_v39 = vpop.permute.xlu0 %3552  ;;  %v8096_v36 = vpop.f32.mrf.mxu2 }
 0x320   : > { %v5434_v51 = vadd.f32 %v5367_v54, %v5149_v23  ;;  %v4941_v42 = vsel %vm2448_vm12, %v4939_v46, %v4940_v48  ;;  %v4480_v54 = vpop.f32.mrf.mxu0  ;;  %v3711_v17 = vsel %vm1210_vm10, %v3295_v55, %v3553_v39  ;;  %v4053_v57 = vsel %vm1210_vm10, %v3847_v41, %v3926_v11  ;;  %v6188_v48 = vld [vmem:[#allocation3 + $0xa8] sm:$0xf0] }
 0x321   : > { %5749 = vmatmul.msk.bf16.gmra.mxu1 %vm1805_vm11, %v4941_v42 }
 0x322   : > { %v5470_v33 = vadd.f32 %v7915_v61, %v5434_v51 }
 0x323   : > { %v3665_v34 = vpop.permute.xlu1 %3664 }
 0x324   : > { %v5502_v37 = vmax.f32 %v5470_v33, 0.0  ;;  %v3745_v6 = vsel %vm1259_vm9, %v3711_v17, %v3665_v34  ;;  %5832 = vmatmul.msk.bf16.gmra.mxu2 %vm1210_vm10, %v5858_v14  ;;  %v4788_v35 = vpop.permute.xlu2 %4787 }
 0x325   : > { %v4221_v53 = vshll.u32 %v3745_v6, 16  ;;  %5727 = vmatmul.msk.bf16.gmra.mxu0 %vm1805_vm11, %v3745_v6  ;;  %v4219_v2 = vshrl.u32 %v3745_v6, 16  ;;  %v6362_v6 = vld [vmem:[#allocation3 + $0xb4] sm:$0xf0] }
 0x326   : > { %5534 = vst.msk [vmem:[%s7931_s11 + $0x48] sm:$0xff] %vm1210_vm10, %v5502_v37 }
 0x327   : > { %v4004_v28 = vpop.permute.xlu0 %4003  ;;  %v4223_v13 = vrot.slane %v4221_v53, 1  ;;  %v8108_v7 = vpop.f32.mrf.mxu2 }
 0x328   : > { %v4084_v44 = vsel %vm1259_vm9, %v4050_v9, %v4004_v28  ;;  %v4482_v58 = vpop.f32.mrf.mxu0  ;;  %v3299_v9 = vld [vmem:[#allocation3 + $0xb4] sm:$0xff]   ;;  %v3768_v28 = vld [vmem:[#allocation3 + $0xbc] sm:$0x1] }
 0x329   : > { %v4225_v50 = vshll.u32 %v4084_v44, 16  ;;  %v4224_v25 = vor.u32 %v4223_v13, %v4219_v2  ;;  %v4943_v62 = vrot.slane %v4084_v44, 1 }
 0x32b   : > { %v4227_v18 = vrot.slane %v4225_v50, 1  ;;  %v4706_v40 = vpop.permute.xlu1 %4705 }
 0x32c   : > { %v4832_v60 = vsel %vm1210_vm10, %v6361_v52, %v4706_v40  ;;  %v5049_v10 = vpop.f32.mrf.mxu1  ;;  %v3928_v11 = vpop.permute.xlu2 %3927 }
 0x32d   : > { %v4228_v12 = vsel %vm1631_vm13, %v4224_v25, %v4227_v18  ;;  %v4866_v19 = vsel %vm1259_vm9, %v4832_v60, %v4786_v32  ;;  %v3832_v25 = vunpack.c.l.b16 %v3768_v28 }
 0x32e   : > { %5707 = vmatmul.msk.bf16.gmra.mxu3 %vm1805_vm11, %v4228_v12  ;;  %v4942_v38 = vrot.slane %v4866_v19, 1 }
 0x32f   : > { %v3555_v47 = vpop.permute.xlu0 %3554  ;;  %v4347_v45 = vpop.f32.mrf.mxu3  ;;  %v3848_v19 = vpack.c.b16 %v3832_v25, %v3832_v25 }
 0x330   : > { %v4481_v27 = vadd.f32 %v4480_v54, %v4347_v45  ;;  %v4944_v29 = vsel %vm2448_vm12, %v4942_v38, %v4943_v62  ;;  %v4485_v4 = vpop.f32.mrf.mxu0  ;;  %v3714_v23 = vsel %vm1210_vm10, %v6151_v24, %v3555_v47  ;;  %v6189_v54 = vld [vmem:[#allocation3 + $0xa8] sm:$0xe]  ;;  %v8120_v13 = vpop.f32.mrf.mxu2 }
 0x331   : > { %5750 = vmatmul.msk.bf16.gmra.mxu1 %vm1805_vm11, %v4944_v29 }
 0x332   : > { %v5114_v3 = vadd.f32 %v5049_v10, %v4481_v27 }
 0x333   : > { %v3667_v20 = vpop.permute.xlu1 %3666 }
 0x334   : > { %v5150_v56 = vadd.f32 %v7904_v8, %v5114_v3  ;;  %v3747_v21 = vsel %vm1259_vm9, %v3714_v23, %v3667_v20  ;;  %v5051_v33 = vpop.f32.mrf.mxu1 }
 0x335   : > { %v4231_v55 = vshll.u32 %v3747_v21, 16  ;;  %5728 = vmatmul.msk.bf16.gmra.mxu0 %vm1805_vm11, %v3747_v21  ;;  %v4229_v39 = vshrl.u32 %v3747_v21, 16 }
 0x336   : > { %v5435_v43 = vadd.f32 %v8062_v30, %v5150_v56  ;;  %v6190_v30 = vor.u32 %v6189_v54, %v6188_v48  ;;  %v8142_v48 = vld [vmem:[%s8240_s4] ss:$0 sm:$0xff] }
 0x337   : > { %v4006_v51 = vpop.permute.xlu0 %4005  ;;  %v4233_v26 = vrot.slane %v4231_v55, 1  ;;  %v4349_v16 = vpop.f32.mrf.mxu3 }
 0x338   : > { %v4086_v5 = vsel %vm1259_vm9, %v4053_v57, %v4006_v51  ;;  %v5471_v37 = vadd.f32 %v7915_v61, %v5435_v43  ;;  %v4483_v46 = vadd.f32 %v4482_v58, %v4349_v16  ;;  %v4487_v34 = vpop.f32.mrf.mxu0  ;;  %v5385_v14 = vpop.f32.mrf.mxu2 }
 0x339   : > { %v4235_v22 = vshll.u32 %v4086_v5, 16  ;;  %v4234_v42 = vor.u32 %v4233_v26, %v4229_v39  ;;  %v4946_v18 = vrot.slane %v4086_v5, 1  ;;  %v4790_v26 = vpop.permute.xlu2 %4789 }
 0x33a   : > { %v5503_v32 = vmax.f32 %v5471_v37, 0.0  ;;  %v5115_v17 = vadd.f32 %v5051_v33, %v4483_v46 }
 0x33b   : > { %v4237_v31 = vrot.slane %v4235_v22, 1  ;;  %v4708_v63 = vpop.permute.xlu1 %4707 }
 0x33c   : > { %5535 = vst.msk [vmem:[%s7931_s11 + $0x50] sm:$0xff] %vm1210_vm10, %v5503_v32  ;;  %v5151_v44 = vadd.f32 %v7904_v8, %v5115_v17  ;;  %v4835_v0 = vsel %vm1210_vm10, %v6190_v30, %v4708_v63  ;;  %v5054_v15 = vpop.f32.mrf.mxu1 }
 0x33d   : > { %v4238_v53 = vsel %vm1631_vm13, %v4234_v42, %v4237_v31  ;;  %v4868_v2 = vsel %vm1259_vm9, %v4835_v0, %v4788_v35 }
 0x33e   : > { %5708 = vmatmul.msk.bf16.gmra.mxu3 %vm1805_vm11, %v4238_v53  ;;  %v5436_v58 = vadd.f32 %v8077_v49, %v5151_v44  ;;  %v4945_v52 = vrot.slane %v4868_v2, 1  ;;  %v4056_v49 = vsel %vm1210_vm10, %v3848_v19, %v3928_v11 }
 0x33f   : > { %v3557_v50 = vpop.permute.xlu0 %3556  ;;  %v4352_v40 = vpop.f32.mrf.mxu3 }
 0x340   : > { %v5472_v12 = vadd.f32 %v7915_v61, %v5436_v58  ;;  %v4486_v60 = vadd.f32 %v4485_v4, %v4352_v40  ;;  %v4947_v47 = vsel %vm2448_vm12, %v4945_v52, %v4946_v18  ;;  %v4490_v38 = vpop.f32.mrf.mxu0  ;;  %v3717_v10 = vsel %vm1210_vm10, %v3299_v9, %v3557_v50  ;;  %v6363_v4 = vld [vmem:[#allocation3 + $0xb4] sm:$0xe]  ;;  %v5387_v28 = vpop.f32.mrf.mxu2 }
 0x341   : > { %5751 = vmatmul.msk.bf16.gmra.mxu1 %vm1805_vm11, %v4947_v47  ;;  %v6364_v39 = vor.u32 %v6363_v4, %v6362_v6 }
 0x342   : > { %v5504_v1 = vmax.f32 %v5472_v12, 0.0  ;;  %v5116_v62 = vadd.f32 %v5054_v15, %v4486_v60 }
 0x343   : > { %v3669_v45 = vpop.permute.xlu1 %3668 }
 0x344   : > { %5536 = vst.msk [vmem:[%s7931_s11 + $0x58] sm:$0xff] %vm1210_vm10, %v5504_v1  ;;  %v5152_v27 = vadd.f32 %v7904_v8, %v5116_v62  ;;  %v3749_v29 = vsel %vm1259_vm9, %v3717_v10, %v3669_v45  ;;  %v5056_v57 = vpop.f32.mrf.mxu1 }
 0x345   : > { %v4241_v24 = vshll.u32 %v3749_v29, 16  ;;  %5729 = vmatmul.msk.bf16.gmra.mxu0 %vm1805_vm11, %v3749_v29  ;;  %v4239_v56 = vshrl.u32 %v3749_v29, 16 }
 0x346   : > { %v5437_v23 = vadd.f32 %v8088_v59, %v5152_v27 }
 0x347   : > { %v4008_v41 = vpop.permute.xlu0 %4007  ;;  %v4243_v21 = vrot.slane %v4241_v24, 1  ;;  %v4354_v51 = vpop.f32.mrf.mxu3 }
 0x348   : > { %v4088_v3 = vsel %vm1259_vm9, %v4056_v49, %v4008_v41  ;;  %v5473_v8 = vadd.f32 %v7915_v61, %v5437_v23  ;;  %v4488_v55 = vadd.f32 %v4487_v34, %v4354_v51  ;;  %v4492_v35 = vpop.f32.mrf.mxu0  ;;  %v5390_v40 = vpop.f32.mrf.mxu2 }
 0x349   : > { %v4245_v20 = vshll.u32 %v4088_v3, 16  ;;  %v4244_v5 = vor.u32 %v4243_v21, %v4239_v56  ;;  %v4949_v31 = vrot.slane %v4088_v3, 1 }
 0x34a   : > { %v5505_v22 = vmax.f32 %v5473_v8, 0.0  ;;  %v5117_v33 = vadd.f32 %v5056_v57, %v4488_v55 }
 0x34b   : > { %v4247_v43 = vrot.slane %v4245_v20, 1  ;;  %v4710_v16 = vpop.permute.xlu1 %4709 }
 0x34c   : > { %5537 = vst.msk [vmem:[%s7931_s11 + $0x60] sm:$0xff] %vm1210_vm10, %v5505_v22  ;;  %v5153_v37 = vadd.f32 %v8142_v48, %v5117_v33  ;;  %v4838_v46 = vsel %vm1210_vm10, %v6364_v39, %v4710_v16  ;;  %v5059_v17 = vpop.f32.mrf.mxu1 }
 0x34d   : > { %v4248_v59 = vsel %vm1631_vm13, %v4244_v5, %v4247_v43  ;;  %v4870_v42 = vsel %vm1259_vm9, %v4838_v46, %v4790_v26 }
 0x34e   : > { %5709 = vmatmul.msk.bf16.gmra.mxu3 %vm1805_vm11, %v4248_v59  ;;  %v5438_v54 = vadd.f32 %v8096_v36, %v5153_v37  ;;  %v4948_v32 = vrot.slane %v4870_v42, 1 }
 0x34f   : > { %v4357_v34 = vpop.f32.mrf.mxu3 }
 0x350   : > { %v5474_v30 = vadd.f32 %v7915_v61, %v5438_v54  ;;  %v4491_v9 = vadd.f32 %v4490_v38, %v4357_v34  ;;  %v4950_v6 = vsel %vm2448_vm12, %v4948_v32, %v4949_v31  ;;  %v4495_v44 = vpop.f32.mrf.mxu0  ;;  %v8159_v61 = vld [vmem:[%s8242_s6] ss:$0 sm:$0xff]  ;;  %v5392_v45 = vpop.f32.mrf.mxu2 }
 0x351   : > { %5752 = vmatmul.msk.bf16.gmra.mxu1 %vm1805_vm11, %v4950_v6 }
 0x352   : > { %v5506_v63 = vmax.f32 %v5474_v30, 0.0  ;;  %v5118_v53 = vadd.f32 %v5059_v17, %v4491_v9 }
 0x354   : > { %5538 = vst.msk [vmem:[%s7931_s11 + $0x68] sm:$0xff] %vm1210_vm10, %v5506_v63  ;;  %v5154_v0 = vadd.f32 %v8142_v48, %v5118_v53  ;;  %v5061_v50 = vpop.f32.mrf.mxu1 }
 0x356   : > { %v5439_v36 = vadd.f32 %v8108_v7, %v5154_v0 }
 0x357   : > { %v4359_v2 = vpop.f32.mrf.mxu3 }
 0x358   : > { %v5475_v25 = vadd.f32 %v8159_v61, %v5439_v36  ;;  %v4493_v18 = vadd.f32 %v4492_v35, %v4359_v2  ;;  %v4497_v15 = vpop.f32.mrf.mxu0  ;;  %v5395_v21 = vpop.f32.mrf.mxu2 }
 0x35a   : > { %v5507_v58 = vmax.f32 %v5475_v25, 0.0  ;;  %v5119_v52 = vadd.f32 %v5061_v50, %v4493_v18 }
 0x35c   : > { %5539 = vst.msk [vmem:[%s7931_s11 + $0x70] sm:$0xff] %vm1210_vm10, %v5507_v58  ;;  %v5155_v12 = vadd.f32 %v8142_v48, %v5119_v52 }
 0x35d   : > { %v5064_v60 = vpop.f32.mrf.mxu1 }
 0x35e   : > { %v5440_v7 = vadd.f32 %v8120_v13, %v5155_v12 }
 0x35f   : > { %v4362_v47 = vpop.f32.mrf.mxu3 }
 0x360   : > { %v5476_v11 = vadd.f32 %v8159_v61, %v5440_v7  ;;  %v4496_v19 = vadd.f32 %v4495_v44, %v4362_v47  ;;  %v5397_v16 = vpop.f32.mrf.mxu2 }
 0x361   : > { %v4500_v38 = vpop.f32.mrf.mxu0 }
 0x362   : > { %v5508_v1 = vmax.f32 %v5476_v11, 0.0  ;;  %v5120_v62 = vadd.f32 %v5064_v60, %v4496_v19 }
 0x364   : > { %5540 = vst.msk [vmem:[%s7931_s11 + $0x78] sm:$0xff] %vm1210_vm10, %v5508_v1  ;;  %v5156_v10 = vadd.f32 %v8142_v48, %v5120_v62 }
 0x365   : > { %v5066_v27 = vpop.f32.mrf.mxu1 }
 0x366   : > { %v5441_v49 = vadd.f32 %v5385_v14, %v5156_v10 }
 0x367   : > { %v4364_v29 = vpop.f32.mrf.mxu3 }
 0x368   : > { %v5477_v41 = vadd.f32 %v8159_v61, %v5441_v49  ;;  %v4498_v13 = vadd.f32 %v4497_v15, %v4364_v29 }
 0x369   : > { %v4502_v4 = vpop.f32.mrf.mxu0 }
 0x36a   : > { %v5509_v24 = vmax.f32 %v5477_v41, 0.0  ;;  %v5121_v3 = vadd.f32 %v5066_v27, %v4498_v13 }
 0x36c   : > { %5541 = vst.msk [vmem:[%s7931_s11 + $0x80] sm:$0xff] %vm1210_vm10, %v5509_v24  ;;  %v5157_v23 = vadd.f32 %v8142_v48, %v5121_v3 }
 0x36d   : > { %v5069_v57 = vpop.f32.mrf.mxu1 }
 0x36e   : > { %v5442_v20 = vadd.f32 %v5387_v28, %v5157_v23  ;;  %v5400_v28 = vpop.f32.mrf.mxu2 }
 0x370   : > { %v4367_v56 = vpop.f32.mrf.mxu3  ;;  %v5478_v51 = vadd.f32 %v8159_v61, %v5442_v20 }
 0x371   : > { %v4501_v14 = vadd.f32 %v4500_v38, %v4367_v56 }
 0x372   : > { %v5510_v8 = vmax.f32 %v5478_v51, 0.0  ;;  %v4505_v5 = vpop.f32.mrf.mxu0 }
 0x373   : > { %v5122_v55 = vadd.f32 %v5069_v57, %v4501_v14 }
 0x374   : > { %5542 = vst.msk [vmem:[%s7931_s11 + $0x88] sm:$0xff] %vm1210_vm10, %v5510_v8 }
 0x375   : > { %v5158_v43 = vadd.f32 %v8142_v48, %v5122_v55  ;;  %v5071_v33 = vpop.f32.mrf.mxu1 }
 0x376   : > { %v5402_v52 = vpop.f32.mrf.mxu2 }
 0x377   : > { %v5443_v22 = vadd.f32 %v5390_v40, %v5158_v43 }
 0x378   : > { %v4369_v35 = vpop.f32.mrf.mxu3 }
 0x379   : > { %v5479_v39 = vadd.f32 %v8159_v61, %v5443_v22  ;;  %v4503_v26 = vadd.f32 %v4502_v4, %v4369_v35 }
 0x37a   : > { %v4507_v46 = vpop.f32.mrf.mxu0 }
 0x37b   : > { %v5511_v59 = vmax.f32 %v5479_v39, 0.0  ;;  %v5123_v37 = vadd.f32 %v5071_v33, %v4503_v26 }
 0x37d   : > { %5543 = vst.msk [vmem:[%s7931_s11 + $0x90] sm:$0xff] %vm1210_vm10, %v5511_v59  ;;  %v5159_v42 = vadd.f32 %v8142_v48, %v5123_v37 }
 0x37e   : > { %v5074_v54 = vpop.f32.mrf.mxu1 }
 0x37f   : > { %v5444_v31 = vadd.f32 %v5392_v45, %v5159_v42  ;;  %v5405_v45 = vpop.f32.mrf.mxu2 }
 0x381   : > { %v4372_v32 = vpop.f32.mrf.mxu3  ;;  %v5480_v17 = vadd.f32 %v8159_v61, %v5444_v31 }
 0x382   : > { %v4506_v34 = vadd.f32 %v4505_v5, %v4372_v32  ;;  %v4510_v6 = vpop.f32.mrf.mxu0 }
 0x383   : > { %v5512_v30 = vmax.f32 %v5480_v17, 0.0 }
 0x384   : > { %v5124_v9 = vadd.f32 %v5074_v54, %v4506_v34 }
 0x385   : > { %5544 = vst.msk [vmem:[%s7931_s11 + $0x98] sm:$0xff] %vm1210_vm10, %v5512_v30 }
 0x386   : > { %v5160_v63 = vadd.f32 %v8142_v48, %v5124_v9  ;;  %v5076_v44 = vpop.f32.mrf.mxu1 }
 0x387   : > { %v5407_v56 = vpop.f32.mrf.mxu2 }
 0x388   : > { %v5445_v53 = vadd.f32 %v5395_v21, %v5160_v63 }
 0x389   : > { %v4374_v0 = vpop.f32.mrf.mxu3 }
 0x38a   : > { %v5481_v36 = vadd.f32 %v8159_v61, %v5445_v53  ;;  %v4508_v50 = vadd.f32 %v4507_v46, %v4374_v0  ;;  %v4512_v18 = vpop.f32.mrf.mxu0 }
 0x38c   : > { %v5513_v2 = vmax.f32 %v5481_v36, 0.0  ;;  %v5125_v25 = vadd.f32 %v5076_v44, %v4508_v50 }
 0x38e   : > { %5545 = vst.msk [vmem:[%s7931_s11 + $0xa0] sm:$0xff] %vm1210_vm10, %v5513_v2  ;;  %v5161_v58 = vadd.f32 %v8142_v48, %v5125_v25  ;;  %v5079_v40 = vpop.f32.mrf.mxu1 }
 0x38f   : > { %v5410_v26 = vpop.f32.mrf.mxu2 }
 0x390   : > { %v5446_v15 = vadd.f32 %v5397_v16, %v5161_v58 }
 0x391   : > { %v4377_v12 = vpop.f32.mrf.mxu3 }
 0x392   : > { %v5482_v7 = vadd.f32 %v8159_v61, %v5446_v15  ;;  %v4511_v60 = vadd.f32 %v4510_v6, %v4377_v12  ;;  %v4515_v19 = vpop.f32.mrf.mxu0 }
 0x394   : > { %v5514_v47 = vmax.f32 %v5482_v7, 0.0  ;;  %v5126_v11 = vadd.f32 %v5079_v40, %v4511_v60 }
 0x396   : > { %5546 = vst.msk [vmem:[%s7931_s11 + $0xa8] sm:$0xff] %vm1210_vm10, %v5514_v47  ;;  %v5162_v1 = vadd.f32 %v8142_v48, %v5126_v11  ;;  %v5081_v38 = vpop.f32.mrf.mxu1 }
 0x397   : > { %v5412_v30 = vpop.f32.mrf.mxu2 }
 0x398   : > { %v5447_v62 = vadd.f32 %v5400_v28, %v5162_v1 }
 0x399   : > { %v4379_v10 = vpop.f32.mrf.mxu3 }
 0x39a   : > { %v5483_v49 = vadd.f32 %v8159_v61, %v5447_v62  ;;  %v4513_v27 = vadd.f32 %v4512_v18, %v4379_v10  ;;  %v4517_v13 = vpop.f32.mrf.mxu0 }
 0x39c   : > { %v5515_v29 = vmax.f32 %v5483_v49, 0.0  ;;  %v5127_v41 = vadd.f32 %v5081_v38, %v4513_v27 }
 0x39e   : > { %5547 = vst.msk [vmem:[%s7931_s11 + $0xb0] sm:$0xff] %vm1210_vm10, %v5515_v29  ;;  %v5163_v24 = vadd.f32 %v8142_v48, %v5127_v41  ;;  %v5084_v4 = vpop.f32.mrf.mxu1 }
 0x39f   : > { %v5415_v18 = vpop.f32.mrf.mxu2 }
 0x3a0   : > { %v5448_v3 = vadd.f32 %v5402_v52, %v5163_v24 }
 0x3a1   : > { %v4382_v23 = vpop.f32.mrf.mxu3 }
 0x3a2   : > { %v5484_v20 = vadd.f32 %v8159_v61, %v5448_v3  ;;  %v4516_v57 = vadd.f32 %v4515_v19, %v4382_v23  ;;  %v4520_v8 = vpop.f32.mrf.mxu0 }
 0x3a4   : > { %v5516_v21 = vmax.f32 %v5484_v20, 0.0  ;;  %v5128_v51 = vadd.f32 %v5084_v4, %v4516_v57 }
 0x3a6   : > { %5548 = vst.msk [vmem:[%s7931_s11 + $0xb8] sm:$0xff] %vm1210_vm10, %v5516_v21  ;;  %v5164_v14 = vadd.f32 %v8142_v48, %v5128_v51  ;;  %v5086_v5 = vpop.f32.mrf.mxu1 }
 0x3a7   : > { %v5417_v38 = vpop.f32.mrf.mxu2 }
 0x3a8   : > { %v5449_v55 = vadd.f32 %v5405_v45, %v5164_v14 }
 0x3a9   : > { %v4384_v43 = vpop.f32.mrf.mxu3 }
 0x3aa   : > { %v5485_v22 = vadd.f32 %v8159_v61, %v5449_v55  ;;  %v4518_v33 = vadd.f32 %v4517_v13, %v4384_v43  ;;  %v4522_v46 = vpop.f32.mrf.mxu0 }
 0x3ac   : > { %v5517_v35 = vmax.f32 %v5485_v22, 0.0  ;;  %v5129_v39 = vadd.f32 %v5086_v5, %v4518_v33 }
 0x3ae   : > { %5549 = vst.msk [vmem:[%s7931_s11 + $0xc0] sm:$0xff] %vm1210_vm10, %v5517_v35  ;;  %v5165_v16 = vadd.f32 %v8142_v48, %v5129_v39  ;;  %v5089_v37 = vpop.f32.mrf.mxu1 }
 0x3af   : > { %v5420_v20 = vpop.f32.mrf.mxu2 }
 0x3b0   : > { %v5450_v59 = vadd.f32 %v5407_v56, %v5165_v16 }
 0x3b1   : > { %v4387_v42 = vpop.f32.mrf.mxu3 }
 0x3b2   : > { %v5486_v31 = vadd.f32 %v8159_v61, %v5450_v59  ;;  %v4521_v54 = vadd.f32 %v4520_v8, %v4387_v42  ;;  %v4525_v44 = vpop.f32.mrf.mxu0 }
 0x3b4   : > { %v5518_v32 = vmax.f32 %v5486_v31, 0.0  ;;  %v5130_v17 = vadd.f32 %v5089_v37, %v4521_v54 }
 0x3b6   : > { %5550 = vst.msk [vmem:[%s7931_s11 + $0xc8] sm:$0xff] %vm1210_vm10, %v5518_v32  ;;  %v5166_v34 = vadd.f32 %v8142_v48, %v5130_v17  ;;  %v5091_v6 = vpop.f32.mrf.mxu1 }
 0x3b7   : > { %v5422_v33 = vpop.f32.mrf.mxu2 }
 0x3b8   : > { %v5451_v9 = vadd.f32 %v5410_v26, %v5166_v34 }
 0x3b9   : > { %v4389_v28 = vpop.f32.mrf.mxu3 }
 0x3ba   : > { %v5487_v63 = vadd.f32 %v8159_v61, %v5451_v9  ;;  %v4523_v53 = vadd.f32 %v4522_v46, %v4389_v28  ;;  %v4527_v7 = vpop.f32.mrf.mxu0 }
 0x3bc   : > { %v5519_v0 = vmax.f32 %v5487_v63, 0.0  ;;  %v5131_v36 = vadd.f32 %v5091_v6, %v4523_v53 }
 0x3be   : > { %5551 = vst.msk [vmem:[%s7931_s11 + $0xd0] sm:$0xff] %vm1210_vm10, %v5519_v0  ;;  %v5167_v50 = vadd.f32 %v8142_v48, %v5131_v36  ;;  %v5094_v25 = vpop.f32.mrf.mxu1 }
 0x3c0   : > { %v5452_v2 = vadd.f32 %v5412_v30, %v5167_v50 }
 0x3c1   : > { %v4392_v58 = vpop.f32.mrf.mxu3 }
 0x3c2   : > { %v5488_v52 = vadd.f32 %v8159_v61, %v5452_v2  ;;  %v4526_v15 = vadd.f32 %v4525_v44, %v4392_v58  ;;  %v4530_v27 = vpop.f32.mrf.mxu0 }
 0x3c4   : > { %v5520_v40 = vmax.f32 %v5488_v52, 0.0  ;;  %v5132_v12 = vadd.f32 %v5094_v25, %v4526_v15 }
 0x3c6   : > { %5552 = vst.msk [vmem:[%s7931_s11 + $0xd8] sm:$0xff] %vm1210_vm10, %v5520_v40  ;;  %v5168_v60 = vadd.f32 %v8142_v48, %v5132_v12  ;;  %v5096_v11 = vpop.f32.mrf.mxu1 }
 0x3c8   : > { %v5453_v47 = vadd.f32 %v5415_v18, %v5168_v60 }
 0x3c9   : > { %v4394_v19 = vpop.f32.mrf.mxu3 }
 0x3ca   : > { %v5489_v1 = vadd.f32 %v8159_v61, %v5453_v47  ;;  %v4528_v62 = vadd.f32 %v4527_v7, %v4394_v19  ;;  %v4532_v21 = vpop.f32.mrf.mxu0 }
 0x3cc   : > { %v5521_v10 = vmax.f32 %v5489_v1, 0.0  ;;  %v5133_v45 = vadd.f32 %v5096_v11, %v4528_v62 }
 0x3ce   : > { %5553 = vst.msk [vmem:[%s7931_s11 + $0xe0] sm:$0xff] %vm1210_vm10, %v5521_v10  ;;  %v5169_v49 = vadd.f32 %v8142_v48, %v5133_v45  ;;  %v5099_v41 = vpop.f32.mrf.mxu1 }
 0x3d0   : > { %v5454_v29 = vadd.f32 %v5417_v38, %v5169_v49 }
 0x3d1   : > { %v4397_v13 = vpop.f32.mrf.mxu3 }
 0x3d2   : > { %v5490_v24 = vadd.f32 %v8159_v61, %v5454_v29  ;;  %v4531_v3 = vadd.f32 %v4530_v27, %v4397_v13 }
 0x3d4   : > { %v5522_v4 = vmax.f32 %v5490_v24, 0.0  ;;  %v5134_v23 = vadd.f32 %v5099_v41, %v4531_v3 }
 0x3d6   : > { %5554 = vst.msk [vmem:[%s7931_s11 + $0xe8] sm:$0xff] %vm1210_vm10, %v5522_v4  ;;  %v5170_v57 = vadd.f32 %v8142_v48, %v5134_v23  ;;  %v5101_v55 = vpop.f32.mrf.mxu1 }
 0x3d8   : > { %v5455_v56 = vadd.f32 %v5420_v20, %v5170_v57 }
 0x3d9   : > { %v4399_v51 = vpop.f32.mrf.mxu3 }
 0x3da   : > { %v5491_v14 = vadd.f32 %v8159_v61, %v5455_v56  ;;  %v4533_v8 = vadd.f32 %v4532_v21, %v4399_v51 }
 0x3dc   : > { %v5523_v5 = vmax.f32 %v5491_v14, 0.0  ;;  %v5135_v43 = vadd.f32 %v5101_v55, %v4533_v8 }
 0x3de   : > { %5555 = vst.msk [vmem:[%s7931_s11 + $0xf0] sm:$0xff] %vm1210_vm10, %v5523_v5  ;;  %v5171_v22 = vadd.f32 %v8142_v48, %v5135_v43 }
 0x3e0   : > { %v5456_v35 = vadd.f32 %v5422_v33, %v5171_v22 }
 0x3e2   : > { %v5492_v39 = vadd.f32 %v8159_v61, %v5456_v35 }
 0x3e4   : > { %v5524_v26 = vmax.f32 %v5492_v39, 0.0 }
 0x3e6   : > { %5556 = vst.msk [vmem:[%s7931_s11 + $0xf8] sm:$0xff] %vm1210_vm10, %v5524_v26 }
 0x3e7 PF: > { %s17_s24 = sadd.s32 1, %s6413_s24  }
 0x3e8   : > { %p14_p4 = scmp.ge.s32.totalorder %s17_s24, 4  }
 0x3ea   :  { %16 = sbr.rel (!%p14_p4) target bundleno = 1 (0x1), region = 86 }

</bundles_post_ra>
